<compile_context>
chip_gen: v7x
topology: tpu7x:2x2x1
jax: 0.10.0
libtpu: 0.0.40
codegen_flags: <defaults>
</compile_context>

<pallas_src>
import functools

import jax
import jax.numpy as jnp
from jax.experimental import pallas as pl
from jax.experimental.pallas import tpu as pltpu

IMG_CHANNELS = 3
IMG_HEIGHT = 50
IMG_WIDTH = 200
D_OUT = IMG_CHANNELS * IMG_HEIGHT * IMG_WIDTH  # 30000


def _round_up(x, m):
    return (x + m - 1) // m * m


TN = 15104                          # 118 * 128 ; lane-dense column tile
N_TILES = pl.cdiv(D_OUT, TN)        # 2 grid steps
D_OUT_PAD = N_TILES * TN            # 30208 = 236 * 128
D_IN_PAD_MULT = 8                   # sublane alignment for the K dimension


def projection_kernel(x_ref, w_ref, o_ref):
    # One grid step computes one lane-dense column tile of the output:
    #   o[:, j*TN:(j+1)*TN] = tanh(x_aug @ W[:, tile])
    # (bias already folded into W as a weight row; x_aug carries the 1.0).
    # x, W are bf16 in VMEM; MXU accumulates in f32; tanh in f32; store bf16.
    acc = jnp.dot(x_ref[...], w_ref[...], preferred_element_type=jnp.float32)
    o_ref[...] = jnp.tanh(acc).astype(o_ref.dtype)


@functools.partial(jax.jit, static_argnames=("tn",))
def generator_forward(x, w_pad, *, tn=TN):
    """x: (B, *input_shape) latent; w_pad: (d_in_pad, D_OUT_PAD) bf16 with the
    bias folded into row `d_in`."""
    B = x.shape[0]
    x2 = x.reshape(B, -1)
    d_in = x2.shape[1]
    d_in_pad, d_out_pad = w_pad.shape
    grid_n = pl.cdiv(D_OUT, tn)
    assert tn % 128 == 0
    assert d_out_pad == grid_n * tn and d_out_pad >= D_OUT
    assert d_in_pad >= d_in + 1 and d_in_pad % D_IN_PAD_MULT == 0

    # Append the implicit bias input (1.0), zero-pad K, cast to bf16
    # (native MXU input type).
    ones = jnp.ones((B, 1), x2.dtype)
    x_aug = jnp.concatenate([x2, ones], axis=1)
    x_aug = jnp.pad(x_aug, ((0, 0), (0, d_in_pad - d_in - 1)))
    x_aug = x_aug.astype(jnp.bfloat16)

    cost = pl.CostEstimate(
        flops=2 * B * d_in_pad * d_out_pad,
        transcendentals=B * d_out_pad,
        bytes_accessed=(w_pad.size * 2 + x_aug.size * 2 + B * D_OUT * 2),
    )

    out = pl.pallas_call(
        projection_kernel,
        out_shape=jax.ShapeDtypeStruct((B, D_OUT), jnp.bfloat16),
        grid_spec=pltpu.PrefetchScalarGridSpec(
            num_scalar_prefetch=0,
            grid=(grid_n,),
            in_specs=[
                pl.BlockSpec((B, d_in_pad), lambda j: (0, 0)),    # full latent
                pl.BlockSpec((d_in_pad, tn), lambda j: (0, j)),   # W column tile
            ],
            # Ragged last block (30000 not a multiple of 15104): out-of-bounds
            # output columns are masked on store, so no post-kernel slice.
            out_specs=pl.BlockSpec((B, tn), lambda j: (0, j)),
        ),
        compiler_params=pltpu.CompilerParams(
            dimension_semantics=("parallel",),   # v7x: even 1 tile per TC
        ),
        cost_estimate=cost,
    )(x_aug, w_pad)

    return out.reshape(B, IMG_CHANNELS, IMG_HEIGHT, IMG_WIDTH)


def init_params(key, d_in):
    """Deterministic init mimicking nn.Linear(d_in, D_OUT) default
    (U(-1/sqrt(fan_in), +1/sqrt(fan_in))).  W is stored bf16 (halves HBM
    traffic); the bias is folded into W as row `d_in` (the input carries a
    matching 1.0 column), so there is no separate bias stream."""
    d_in_pad = _round_up(d_in + 1, D_IN_PAD_MULT)      # 100 (+1 bias row) -> 104
    kw, kb = jax.random.split(key)
    bound = 1.0 / jnp.sqrt(jnp.float32(d_in))
    w = jax.random.uniform(kw, (d_in, D_OUT), jnp.float32, -bound, bound)
    b = jax.random.uniform(kb, (D_OUT,), jnp.float32, -bound, bound)
    w_pad = jnp.zeros((d_in_pad, D_OUT_PAD), jnp.float32)
    w_pad = w_pad.at[:d_in, :D_OUT].set(w)
    w_pad = w_pad.at[d_in, :D_OUT].set(b)              # folded bias row
    return w_pad.astype(jnp.bfloat16)


if __name__ == "__main__":
    key = jax.random.PRNGKey(0)
    k_x, k_p = jax.random.split(key)

    B = 2
    LATENT_DIM = 100  # input_shape = (100,) latent noise vector
    x = jax.random.normal(k_x, (B, LATENT_DIM), jnp.float32)

    w_pad = init_params(k_p, LATENT_DIM)

    out = generator_forward(x, w_pad)
    out = jax.block_until_ready(out)

    # Pure-JAX reference with the same bf16 weights (bias folded), f32 math,
    # quantized to bf16 like the kernel output.
    x_aug = jnp.concatenate([x, jnp.ones((B, 1), x.dtype)], axis=1)
    x_bf = x_aug.astype(jnp.bfloat16).astype(jnp.float32)
    w_f32 = w_pad[:LATENT_DIM + 1, :D_OUT].astype(jnp.float32)
    ref = jnp.tanh(x_bf @ w_f32).astype(jnp.bfloat16).astype(jnp.float32)
    ref = ref.reshape(B, IMG_CHANNELS, IMG_HEIGHT, IMG_WIDTH)

    assert out.shape == (B, IMG_CHANNELS, IMG_HEIGHT, IMG_WIDTH)
    assert out.dtype == jnp.bfloat16
    assert jnp.allclose(out.astype(jnp.float32), ref, atol=1e-2, rtol=1e-2)

    print("KERNEL_OK")
</pallas_src>

<mosaic_0001>
module attributes {stable_mosaic.version = 11 : i64} {
  func.func @projection_kernel(%arg0: i32, %arg1: memref<2x104xbf16, #tpu.memory_space<vmem>>, %arg2: memref<104x15104xbf16, #tpu.memory_space<vmem>>, %arg3: memref<2x15104xbf16, #tpu.memory_space<vmem>>) attributes {dimension_semantics = [#tpu.dimension_semantics<parallel>], iteration_bounds = array<i64: 2>, scalar_prefetch = 0 : i64, scratch_operands = 0 : i64, tpu.core_type = #tpu.core_type<tc>, window_params = [{pipeline_mode = #tpu.pipeline_mode<synchronous>, transform_indices = @transform_0, window_bounds = array<i64: 2, 104>}, {transform_indices = @transform_1, window_bounds = array<i64: 104, 15104>}, {transform_indices = @transform_2, window_bounds = array<i64: 2, 15104>}]} {
    %c0 = arith.constant 0 : index
    %c0_0 = arith.constant 0 : index
    %0 = vector.load %arg1[%c0, %c0_0] : memref<2x104xbf16, #tpu.memory_space<vmem>>, vector<2x104xbf16>
    %c0_1 = arith.constant 0 : index
    %c0_2 = arith.constant 0 : index
    %1 = vector.load %arg2[%c0_1, %c0_2] : memref<104x15104xbf16, #tpu.memory_space<vmem>>, vector<104x15104xbf16>
    %cst = arith.constant dense<0.000000e+00> : vector<2x15104xf32>
    %2 = tpu.matmul %0, %1, %cst {dimension_numbers = #tpu.dot_dimension_numbers<[1], [0], [0], [1], [0, 0, 1, 1], [], []>} : vector<2x104xbf16>, vector<104x15104xbf16>, vector<2x15104xf32> -> vector<2x15104xf32>
    %3 = math.tanh %2 : vector<2x15104xf32>
    %4 = arith.truncf %3 : vector<2x15104xf32> to vector<2x15104xbf16>
    %c0_3 = arith.constant 0 : index
    %c0_4 = arith.constant 0 : index
    %5 = vector.load %arg3[%c0_3, %c0_4] : memref<2x15104xbf16, #tpu.memory_space<vmem>>, vector<2x15104xbf16>
    tpu.vector_store %arg3[%c0_3, %c0_4], %4 {strides = array<i32>} : memref<2x15104xbf16, #tpu.memory_space<vmem>>, vector<2x15104xbf16>,
    return
  }
  func.func @transform_0(%arg0: i32) -> (i32, i32) {
    %c0_i32 = arith.constant 0 : i32
    %c0_i32_0 = arith.constant 0 : i32
    %c0_i32_1 = arith.constant 0 : i32
    return %c0_i32, %c0_i32_0 : i32, i32
  }
  func.func @transform_1(%arg0: i32) -> (i32, i32) {
    %c0_i32 = arith.constant 0 : i32
    %c0_i32_0 = arith.constant 0 : i32
    return %c0_i32, %arg0 : i32, i32
  }
  func.func @transform_2(%arg0: i32) -> (i32, i32) {
    %c0_i32 = arith.constant 0 : i32
    %c0_i32_0 = arith.constant 0 : i32
    return %c0_i32, %arg0 : i32, i32
  }
}

</mosaic_0001>

<bundles_post_ra>
// kernel: generator_forward.1
= control target key start
LH: loop header
LB: loop body
LE: loop exit
PB: predicated region body
PF: predicated region fallthrough
CT: control target
= control target key end

     0   :  { %7 = vsyncpa [#allocation3], 0  ;;  %s13882_s0 = inlined_call_operand.vmem [shape: bf16[2,104], index: 0, kind: input, shape index: {}]   ;;  %s13883_s1 = inlined_call_operand.hbm [shape: bf16[104,30208], index: 1, kind: input, shape index: {}]   ;;  %s13884_s2 = inlined_call_operand.vmem [shape: bf16[2,30000], index: 2, kind: output, shape index: {}]  }
   0x1   :  { %9 = vsyncpa [#allocation3 + $0x1], 0  ;;  %s12067_s9 = smov 0   ;;  %s12069_s10 = smov 0  }
   0x2   :  { %s12071_s11 = smov 0   ;;  %s12073_s12 = smov 0  }
   0x3 LB: > { %s12086_s13 = sadd.s32 4294967295, %s11978_s12   ;;  %s12089_s14 = sadd.s32 1, %s11978_s12   ;;  %s11978_s12 = sphi %s12073_s12, %s13902_s12   ;;  %s11974_s11 = sphi %s12071_s11, %s13901_s11   ;;  %s11970_s10 = sphi %s12069_s10, %s13900_s10   ;;  %s11966_s9 = sphi %s12067_s9, %s13899_s9  }
   0x4   : > { %s40_s15 = ssub.s32 %s11978_s12, %s12089_s14  ;;  %s43_s16 = sadd.s32 1, %s11974_s11 }
   0x5   : > { %p41_p0 = scmp.eq.s32.totalorder %s40_s15, 0  ;;  %p50_p1 = scmp.ne.s32.totalorder %s11974_s11, %s11970_s10 }
   0x6   : > { %p51_p2 = scmp.eq.s32.totalorder %s11978_s12, 0  ;;  %p56_p3 = scmp.ne.s32.totalorder %s11970_s10, %s11966_s9 }
   0x7   : > { %s12099_s17 = scalar_select %p41_p0, %s11974_s11, %s43_s16  }
   0x8   : > { %p52_p4 = por %p51_p2, %p50_p1  ;;  %p57_p5 = scmp.eq.s32.totalorder %s12086_s13, 0 }
   0x9   : > { %p80_p6 = scmp.eq.s32.totalorder %s12086_s13, 1  ;;  %p10261_p8 = scmp.lt.s32.totalorder %s11978_s12, 2 }
   0xa   : > { %p12103_p7 = por %p57_p5, %p56_p3  ;;  %s109_s20 = sand.u32 1, %s11974_s11  }
   0xb   : > { %p12108_p9 = por %p80_p6, %p50_p1  ;;  %s10252_s21 = smul.u32 6136, %s109_s20 }
   0xc   : > { %s10247_s22 = smul.u32 7552, %s11978_s12  ;;  %p12114_p10 = pnand %p10261_p8, %p52_p4 }
   0xd   : > { %s13886_s19 = scalar_select %p12108_p9, 1, 0 }
   0xe   : > { %s12121_s26 = scalar_lea.hbm %s13883_s1, %s10247_s22  ;;  %s113_s27 = scalar_lea.vmem [#allocation2], %s10252_s21 }
   0xf   : > { %s120_s28 = sshll.u32 %s113_s27, 4  ;;  %s12125_s29 = scalar_lea.sflag [#allocation3], %s109_s20  ;;  %s12123_s28 = int_to_ptr.vmem [resolvable:$true] %s120_s28 }
  0x10   : > { %s11850_s30 = scalar_lea.hbm %s12121_s26, 98176  ;;  %p11852_p12 = pneg %p12114_p10 }
  0x11   : > { %p11851_p11 = scmp.ne.s32.totalorder %s12121_s26, %s11850_s30  ;;  %s11855_s5 = scalar_lea.hbm %s13883_s1, 196352 }
  0x12   : > { %p11856_p1 = scmp.lt.u32.totalorder %s12121_s26, %s13883_s1  ;;  %p11857_p2 = scmp.lt.u32.totalorder %s11855_s5, %s11850_s30 }
  0x13   : > { %p11853_p13 = pnand %p11852_p12, %p11851_p11  ;;  %p11859_p4 = scmp.lt.u32.totalorder %s11850_s30, %s12121_s26 }
  0x14   : > { %p11858_p3 = por %p11857_p2, %p11856_p1 }
  0x15   : > { %p11854_p0 = pneg %p11853_p13 }
  0x16   : > { %p11860_p5 = por %p11859_p4, %p11858_p3 }
  0x18   : > { %p11861_p6 = pnand %p11860_p5, %p11854_p0 }
  0x1a   : > { %11864 = shalt.err (!%p11861_p6)
}
  0x1b   : > { %s11865_s8 = scalar_lea.vmem %s12123_s28, 98176  ;;  %s12044_s9 = smov [#allocation2]  }
  0x1c   : > { %p11866_p8 = scmp.ne.s32.totalorder %s12123_s28, %s11865_s8  ;;  %s11870_s15 = sshll.u32 %s12044_s9, 4  ;;  %s11871_s15 = int_to_ptr.vmem [resolvable:$false] %s11870_s15 }
  0x1d   : > { %s11872_s16 = scalar_lea.vmem %s11871_s15, 196352  ;;  %p11873_p9 = scmp.lt.s32.totalorder %s12123_s28, %s11871_s15 }
  0x1e   : > { %p11868_p11 = pnand %p11866_p8, %p11852_p12  ;;  %p11874_p1 = scmp.lt.s32.totalorder %s11872_s16, %s11865_s8 }
  0x20   : > { %p11869_p13 = pneg %p11868_p11  ;;  %p11875_p2 = por %p11874_p1, %p11873_p9 }
  0x22   : > { %p11876_p3 = pnand %p11875_p2, %p11869_p13 }
  0x24   : > { %11879 = shalt.err (!%p11876_p3)
}
  0x25   : > { %s12045_s20 = smov 15104   ;;  %s12046_s21 = smov 7552  }
  0x26   : > { %s12047_s22 = smov 472   ;;  %p9218_p12 = scmp.ge.s32.totalorder %s11978_s12, 1 }
  0x27   : > { %10260 = dma.hbm_to_vmem [thread:$0]  (!%p12114_p10), %s12121_s26, 98176, %s12123_s28, %s12125_s29, %s12045_s20, %s12046_s21, %s12047_s22  }
  0x28   : > { %p128_p0 = scmp.lt.s32.totalorder %s11978_s12, 3 }
  0x2a   : > { %p129_p4 = pnand %p9218_p12, %p128_p0 }
  0x2b   : > { %s12156_s24 = sand.u32 (!%p129_p4), 1, %s11970_s10  }
  0x2c   : > { %132 = sbr.rel (%p129_p4) target bundleno = 1292 (0x50c), region = 28  ;;  %s135_s27 = scalar_lea.sflag (!%p129_p4), [#allocation3], %s12156_s24 }
  0x2d   : > { %s10253_s25 = smul.u32 (!%p129_p4), 6136, %s12156_s24 }
  0x2f   : > { %s12160_s30 = scalar_lea.vmem (!%p129_p4), [#allocation2], %s10253_s25 }
  0x33   : > { %11961 = dma.done.wait (%p12103_p7), %s135_s27, 98176  }
  0x34   : > { %11963 = vsyncadd (%p12103_p7), %s135_s27, 4294869120  ;;  %v12048_v0 = vmov 0   ;;  %v10429_v1 = vld [vmem:[%s12160_s30 + $0x4] ss:$472 sps:$4 sm:$0xff]   ;;  %v10433_v3 = vld [vmem:[%s12160_s30] ss:$472 sps:$4 sm:$0xff]  }
  0x35   : > { %5159 = vmatprep.mubr.bf16.mxu0 %v12048_v0  ;;  %5200 = vmatprep.mubr.bf16.mxu1 %v12048_v0  ;;  %v10431_v2 = vld [vmem:[%s12160_s30 + $0xc] ss:$472 sps:$4 sm:$0xff]   ;;  %v10434_v4 = vld [vmem:[%s12160_s30 + $0x8] ss:$472 sps:$4 sm:$0xff]   ;;  %v10437_v6 = vld [vmem:[%s12160_s30 + $0x3bc] ss:$472 sps:$4 sm:$0xff]  }
  0x36   : > { %5127 = vmatprep.subr.bf16.mxu0 %v10429_v1  ;;  %5168 = vmatprep.subr.bf16.mxu1 %v10431_v2  ;;  %v10435_v5 = vld [vmem:[%s12160_s30 + $0x3b4] ss:$472 sps:$4 sm:$0xff]   ;;  %v10439_v7 = vld [vmem:[%s12160_s30 + $0x3b0] ss:$472 sps:$4 sm:$0xff]   ;;  %v10441_v9 = vld [vmem:[%s12160_s30 + $0x764] ss:$472 sps:$4 sm:$0xff]  }
  0x37   : > { %5128 = vmatpush1.bf16.msra.mxu0 %v10433_v3  ;;  %5169 = vmatpush1.bf16.msra.mxu1 %v10434_v4  ;;  %v10440_v8 = vld [vmem:[%s12160_s30 + $0x3b8] ss:$472 sps:$4 sm:$0xff]   ;;  %v10443_v10 = vld [vmem:[%s12160_s30 + $0x76c] ss:$472 sps:$4 sm:$0xff]   ;;  %v10446_v12 = vld [vmem:[%s12160_s30 + $0x768] ss:$472 sps:$4 sm:$0xff]  }
  0x38   : > { %5129 = vmatprep.subr.bf16.mxu0 %v10435_v5  ;;  %5170 = vmatprep.subr.bf16.mxu1 %v10437_v6  ;;  %v10445_v11 = vld [vmem:[%s12160_s30 + $0x760] ss:$472 sps:$4 sm:$0xff]   ;;  %v10447_v13 = vld [vmem:[%s12160_s30 + $0xb14] ss:$472 sps:$4 sm:$0xff]   ;;  %v10451_v15 = vld [vmem:[%s12160_s30 + $0xb10] ss:$472 sps:$4 sm:$0xff]  }
  0x39   : > { %v10449_v14 = vld [vmem:[%s12160_s30 + $0xb1c] ss:$472 sps:$4 sm:$0xff]   ;;  %v10452_v16 = vld [vmem:[%s12160_s30 + $0xb18] ss:$472 sps:$4 sm:$0xff]   ;;  %v10455_v18 = vld [vmem:[%s12160_s30 + $0xecc] ss:$472 sps:$4 sm:$0xff]  }
  0x3a   : > { %v10453_v17 = vld [vmem:[%s12160_s30 + $0xec4] ss:$472 sps:$4 sm:$0xff]   ;;  %v10457_v19 = vld [vmem:[%s12160_s30 + $0xec0] ss:$472 sps:$4 sm:$0xff]   ;;  %v10459_v21 = vld [vmem:[%s12160_s30 + $0x1274] ss:$472 sps:$4 sm:$0xff]  }
  0x3b   : > { %5130 = vmatpush1.bf16.msra.mxu0 %v10439_v7  ;;  %5171 = vmatpush1.bf16.msra.mxu1 %v10440_v8  ;;  %v10458_v20 = vld [vmem:[%s12160_s30 + $0xec8] ss:$472 sps:$4 sm:$0xff]   ;;  %v10461_v22 = vld [vmem:[%s12160_s30 + $0x127c] ss:$472 sps:$4 sm:$0xff]   ;;  %v10464_v26 = vld [vmem:[%s12160_s30 + $0x1278] ss:$472 sps:$4 sm:$0xff]  }
  0x3c   : > { %5131 = vmatprep.subr.bf16.mxu0 %v10441_v9  ;;  %5172 = vmatprep.subr.bf16.mxu1 %v10443_v10  ;;  %v874_v23 = vld [vmem:[%s12160_s30 + $0x1620] sm:$0xff]  ;;  %v875_v24 = vld [vmem:[%s12160_s30 + $0x1628] sm:$0xff]  ;;  %vm4772_vm0 = vcmask 1043456   ;;  %v10474_v34 = vld [vmem:[%s12160_s30 + $0x1c] ss:$472 sps:$4 sm:$0xff]   ;;  %vm4768_vm1 = vcmask 850944  }
  0x3d   : > { %v10463_v25 = vld [vmem:[%s12160_s30 + $0x1270] ss:$472 sps:$4 sm:$0xff]   ;;  %v9928_v27 = vcombine.high %v874_v23, %v874_v23  ;;  %v9930_v28 = vcombine.high %v875_v24, %v875_v24  ;;  %v9927_v29 = vcombine.low %v874_v23, %v874_v23  ;;  %v9929_v30 = vcombine.low %v875_v24, %v875_v24  ;;  %v10471_v31 = vld [vmem:[%s12160_s30 + $0x14] ss:$472 sps:$4 sm:$0xff]   ;;  %v10477_v38 = vld [vmem:[%s12160_s30 + $0x3c4] ss:$472 sps:$4 sm:$0xff]  }
  0x3e   : > { %v12203_v35 = vld [vmem:[%s13882_s0] sm:$0x1]  ;;  %v10472_v37 = vld [vmem:[%s12160_s30 + $0x18] ss:$472 sps:$4 sm:$0xff]   ;;  %v10480_v39 = vld [vmem:[%s12160_s30 + $0x3cc] ss:$472 sps:$4 sm:$0xff]  }
  0x3f   : > { %5132 = vmatpush1.bf16.msra.mxu0 %v10445_v11  ;;  %5173 = vmatpush1.bf16.msra.mxu1 %v10446_v12  ;;  %v4774_v32 = vsel %vm4772_vm0, %v9927_v29, 0  ;;  %v4780_v33 = vsel %vm4772_vm0, %v9929_v30, 0  ;;  %v10469_v36 = vld [vmem:[%s12160_s30 + $0x10] ss:$472 sps:$4 sm:$0xff]   ;;  %v10475_v40 = vld [vmem:[%s12160_s30 + $0x3c0] ss:$472 sps:$4 sm:$0xff]  }
  0x40   : > { %5133 = vmatprep.subr.bf16.mxu0 %v10447_v13  ;;  %5174 = vmatprep.subr.bf16.mxu1 %v10449_v14  ;;  %v10478_v41 = vld [vmem:[%s12160_s30 + $0x3c8] ss:$472 sps:$4 sm:$0xff]   ;;  %v10483_v42 = vld [vmem:[%s12160_s30 + $0x774] ss:$472 sps:$4 sm:$0xff]   ;;  %v10484_v45 = vld [vmem:[%s12160_s30 + $0x778] ss:$472 sps:$4 sm:$0xff]  }
  0x41   : > { %v10486_v43 = vld [vmem:[%s12160_s30 + $0x77c] ss:$472 sps:$4 sm:$0xff]   ;;  %v10481_v44 = vld [vmem:[%s12160_s30 + $0x770] ss:$472 sps:$4 sm:$0xff]   ;;  %v10492_v47 = vld [vmem:[%s12160_s30 + $0xb2c] ss:$472 sps:$4 sm:$0xff]  }
  0x42   : > { %v10489_v46 = vld [vmem:[%s12160_s30 + $0xb24] ss:$472 sps:$4 sm:$0xff]   ;;  %v10487_v48 = vld [vmem:[%s12160_s30 + $0xb20] ss:$472 sps:$4 sm:$0xff]   ;;  %v10495_v50 = vld [vmem:[%s12160_s30 + $0xed4] ss:$472 sps:$4 sm:$0xff]  }
  0x43   : > { %5134 = vmatpush1.bf16.msra.mxu0 %v10451_v15  ;;  %5175 = vmatpush1.bf16.msra.mxu1 %v10452_v16  ;;  %v10490_v49 = vld [vmem:[%s12160_s30 + $0xb28] ss:$472 sps:$4 sm:$0xff]   ;;  %v10498_v51 = vld [vmem:[%s12160_s30 + $0xedc] ss:$472 sps:$4 sm:$0xff]   ;;  %v10496_v53 = vld [vmem:[%s12160_s30 + $0xed8] ss:$472 sps:$4 sm:$0xff]  }
  0x44   : > { %5135 = vmatprep.subr.bf16.mxu0 %v10453_v17  ;;  %5176 = vmatprep.subr.bf16.mxu1 %v10455_v18  ;;  %v10493_v52 = vld [vmem:[%s12160_s30 + $0xed0] ss:$472 sps:$4 sm:$0xff]   ;;  %v10501_v54 = vld [vmem:[%s12160_s30 + $0x1284] ss:$472 sps:$4 sm:$0xff]   ;;  %v10499_v58 = vld [vmem:[%s12160_s30 + $0x1280] ss:$472 sps:$4 sm:$0xff]  }
  0x45   : > { %v10504_v55 = vld [vmem:[%s12160_s30 + $0x128c] ss:$472 sps:$4 sm:$0xff]   ;;  %v876_v56 = vld [vmem:[%s12160_s30 + $0x1630] sm:$0xff]  ;;  %v877_v57 = vld [vmem:[%s12160_s30 + $0x1638] sm:$0xff]  ;;  %s10254_s3 = smul.u32 118, %s12156_s24  ;;  %p13888_p7 = scmp.ne.s32.totalorder %s13886_s19, 0 }
  0x46   : > { %v10502_v59 = vld [vmem:[%s12160_s30 + $0x1288] ss:$472 sps:$4 sm:$0xff]   ;;  %v9932_v60 = vcombine.high %v876_v56, %v876_v56  ;;  %v9934_v61 = vcombine.high %v877_v57, %v877_v57  ;;  %v9931_v62 = vcombine.low %v876_v56, %v876_v56  ;;  %v9933_v63 = vcombine.low %v877_v57, %v877_v57  ;;  %v10511_v1 = vld [vmem:[%s12160_s30 + $0x24] ss:$472 sps:$4 sm:$0xff]   ;;  %v10517_v7 = vld [vmem:[%s12160_s30 + $0x3d4] ss:$472 sps:$4 sm:$0xff]  }
  0x47   : > { %5136 = vmatpush1.bf16.msra.mxu0 %v10457_v19  ;;  %5177 = vmatpush1.bf16.msra.mxu1 %v10458_v20  ;;  %v10514_v4 = vld [vmem:[%s12160_s30 + $0x2c] ss:$472 sps:$4 sm:$0xff]   ;;  %v10509_v5 = vld [vmem:[%s12160_s30 + $0x20] ss:$472 sps:$4 sm:$0xff]   ;;  %v10520_v8 = vld [vmem:[%s12160_s30 + $0x3dc] ss:$472 sps:$4 sm:$0xff]  }
  0x48   : > { %5137 = vmatprep.subr.bf16.mxu0 %v10459_v21  ;;  %5178 = vmatprep.subr.bf16.mxu1 %v10461_v22  ;;  %v4786_v2 = vsel %vm4772_vm0, %v9931_v62, 0  ;;  %v4792_v3 = vsel %vm4772_vm0, %v9933_v63, 0  ;;  %v10512_v6 = vld [vmem:[%s12160_s30 + $0x28] ss:$472 sps:$4 sm:$0xff]   ;;  %v10518_v10 = vld [vmem:[%s12160_s30 + $0x3d8] ss:$472 sps:$4 sm:$0xff]  }
  0x49   : > { %v10515_v9 = vld [vmem:[%s12160_s30 + $0x3d0] ss:$472 sps:$4 sm:$0xff]   ;;  %v10523_v11 = vld [vmem:[%s12160_s30 + $0x784] ss:$472 sps:$4 sm:$0xff]   ;;  %v10521_v13 = vld [vmem:[%s12160_s30 + $0x780] ss:$472 sps:$4 sm:$0xff]  }
  0x4a   : > { %v10526_v12 = vld [vmem:[%s12160_s30 + $0x78c] ss:$472 sps:$4 sm:$0xff]   ;;  %v10524_v14 = vld [vmem:[%s12160_s30 + $0x788] ss:$472 sps:$4 sm:$0xff]   ;;  %v10532_v16 = vld [vmem:[%s12160_s30 + $0xb3c] ss:$472 sps:$4 sm:$0xff]  }
  0x4b   : > { %5138 = vmatpush1.bf16.msra.mxu0 %v10463_v25  ;;  %5179 = vmatpush1.bf16.msra.mxu1 %v10464_v26  ;;  %v10529_v15 = vld [vmem:[%s12160_s30 + $0xb34] ss:$472 sps:$4 sm:$0xff]   ;;  %v10527_v17 = vld [vmem:[%s12160_s30 + $0xb30] ss:$472 sps:$4 sm:$0xff]   ;;  %v10535_v19 = vld [vmem:[%s12160_s30 + $0xee4] ss:$472 sps:$4 sm:$0xff]  }
  0x4c   : > { %10045 = vmatprep.subr.msk.bf16.mxu0 %vm4772_vm0, %v9928_v27  ;;  %10047 = vmatprep.subr.msk.bf16.mxu1 %vm4772_vm0, %v9930_v28  ;;  %v10530_v18 = vld [vmem:[%s12160_s30 + $0xb38] ss:$472 sps:$4 sm:$0xff]   ;;  %v10538_v20 = vld [vmem:[%s12160_s30 + $0xeec] ss:$472 sps:$4 sm:$0xff]   ;;  %v10536_v22 = vld [vmem:[%s12160_s30 + $0xee8] ss:$472 sps:$4 sm:$0xff]  }
  0x4d   : > { %v10533_v21 = vld [vmem:[%s12160_s30 + $0xee0] ss:$472 sps:$4 sm:$0xff]   ;;  %v10541_v23 = vld [vmem:[%s12160_s30 + $0x1294] ss:$472 sps:$4 sm:$0xff]   ;;  %v10539_v27 = vld [vmem:[%s12160_s30 + $0x1290] ss:$472 sps:$4 sm:$0xff]  }
  0x4e   : > { %v10544_v24 = vld [vmem:[%s12160_s30 + $0x129c] ss:$472 sps:$4 sm:$0xff]   ;;  %v878_v25 = vld [vmem:[%s12160_s30 + $0x1640] sm:$0xff]  ;;  %v879_v26 = vld [vmem:[%s12160_s30 + $0x1648] sm:$0xff]  ;;  %s12581_s4 = scalar_lea.vmem [#allocation4], %s10254_s3   ;;  %s8663_s16 = smul.u32 (%p13888_p7), 118, %s12086_s13 }
  0x4f   : > { %5140 = vmatpush1.bf16.msra.mxu0 %v4774_v32  ;;  %5181 = vmatpush1.bf16.msra.mxu1 %v4780_v33  ;;  %v10542_v28 = vld [vmem:[%s12160_s30 + $0x1298] ss:$472 sps:$4 sm:$0xff]   ;;  %v9936_v29 = vcombine.high %v878_v25, %v878_v25  ;;  %v9938_v30 = vcombine.high %v879_v26, %v879_v26  ;;  %v9937_v32 = vcombine.low %v879_v26, %v879_v26  ;;  %v10551_v33 = vld [vmem:[%s12160_s30 + $0x34] ss:$472 sps:$4 sm:$0xff]   ;;  %v10581_v56 = vld [vmem:[%s12160_s30 + $0x12a4] ss:$472 sps:$4 sm:$0xff]  }
  0x50   : > { %5209 = vmatprep.subr.bf16.mxu0 %v10471_v31  ;;  %5250 = vmatprep.subr.bf16.mxu1 %v10474_v34  ;;  %v9935_v31 = vcombine.low %v878_v25, %v878_v25  ;;  %v10584_v57 = vld [vmem:[%s12160_s30 + $0x12ac] ss:$472 sps:$4 sm:$0xff]   ;;  %v10624_v26 = vld [vmem:[%s12160_s30 + $0x12bc] ss:$472 sps:$4 sm:$0xff]   ;;  %s8664_s20 = ssub.s32 (%p13888_p7), 235, %s8663_s16  ;;  %s13463_s24 = scalar_lea.vmem (%p13888_p7), %s13884_s2, %s8663_s16  }
  0x51   : > { %v10621_v25 = vld [vmem:[%s12160_s30 + $0x12b4] ss:$472 sps:$4 sm:$0xff]   ;;  %p8665_p9 = scmp.lt.s32.totalorder (%p13888_p7), %s8664_s20, 118 }
  0x52   : > { %10046 = vmatmul.mubr.msk.bf16.vlgmr.msra.gmra.mrb[0].mxu0 %vm4768_vm1, %v12203_v35  ;;  %10048 = vmatmul.mubr.msk.bf16.vlgmr.msra.gmra.mrb[0].mxu1 %vm4768_vm1, %v12203_v35  ;;  %v4798_v34 = vsel %vm4772_vm0, %v9935_v31, 0 }
  0x53   : > { %5210 = vmatpush1.bf16.msra.mxu0 %v10469_v36  ;;  %5251 = vmatpush1.bf16.msra.mxu1 %v10472_v37  ;;  %v4804_v36 = vsel %vm4772_vm0, %v9937_v32, 0  ;;  %v10554_v37 = vld [vmem:[%s12160_s30 + $0x3c] ss:$472 sps:$4 sm:$0xff]  }
  0x54   : > { %5211 = vmatprep.subr.bf16.mxu0 %v10477_v38  ;;  %5252 = vmatprep.subr.bf16.mxu1 %v10480_v39  ;;  %v10549_v38 = vld [vmem:[%s12160_s30 + $0x30] ss:$472 sps:$4 sm:$0xff]  }
  0x55   : > { %5241 = vmatprep.mubr.bf16.mxu0 %v12048_v0  ;;  %5282 = vmatprep.mubr.bf16.mxu1 %v12048_v0  ;;  %v10552_v39 = vld [vmem:[%s12160_s30 + $0x38] ss:$472 sps:$4 sm:$0xff]  }
  0x57   : > { %5212 = vmatpush1.bf16.msra.mxu0 %v10475_v40  ;;  %5253 = vmatpush1.bf16.msra.mxu1 %v10478_v41  ;;  %v10557_v40 = vld [vmem:[%s12160_s30 + $0x3e4] ss:$472 sps:$4 sm:$0xff]  }
  0x58   : > { %5213 = vmatprep.subr.bf16.mxu0 %v10483_v42  ;;  %5254 = vmatprep.subr.bf16.mxu1 %v10486_v43  ;;  %v10560_v41 = vld [vmem:[%s12160_s30 + $0x3ec] ss:$472 sps:$4 sm:$0xff]   ;;  %v10555_v42 = vld [vmem:[%s12160_s30 + $0x3e0] ss:$472 sps:$4 sm:$0xff]  }
  0x59   : > { %v10558_v43 = vld [vmem:[%s12160_s30 + $0x3e8] ss:$472 sps:$4 sm:$0xff]  }
  0x5b   : > { %5214 = vmatpush1.bf16.msra.mxu0 %v10481_v44  ;;  %5255 = vmatpush1.bf16.msra.mxu1 %v10484_v45  ;;  %v10563_v44 = vld [vmem:[%s12160_s30 + $0x794] ss:$472 sps:$4 sm:$0xff]  }
  0x5c   : > { %5215 = vmatprep.subr.bf16.mxu0 %v10489_v46  ;;  %5256 = vmatprep.subr.bf16.mxu1 %v10492_v47  ;;  %v10566_v45 = vld [vmem:[%s12160_s30 + $0x79c] ss:$472 sps:$4 sm:$0xff]   ;;  %v10561_v46 = vld [vmem:[%s12160_s30 + $0x790] ss:$472 sps:$4 sm:$0xff]  }
  0x5d   : > { %v10564_v47 = vld [vmem:[%s12160_s30 + $0x798] ss:$472 sps:$4 sm:$0xff]  }
  0x5f   : > { %5216 = vmatpush1.bf16.msra.mxu0 %v10487_v48  ;;  %5257 = vmatpush1.bf16.msra.mxu1 %v10490_v49  ;;  %v10569_v48 = vld [vmem:[%s12160_s30 + $0xb44] ss:$472 sps:$4 sm:$0xff]  }
  0x60   : > { %5217 = vmatprep.subr.bf16.mxu0 %v10495_v50  ;;  %5258 = vmatprep.subr.bf16.mxu1 %v10498_v51  ;;  %v10572_v49 = vld [vmem:[%s12160_s30 + $0xb4c] ss:$472 sps:$4 sm:$0xff]   ;;  %v10567_v50 = vld [vmem:[%s12160_s30 + $0xb40] ss:$472 sps:$4 sm:$0xff]  }
  0x61   : > { %v10570_v51 = vld [vmem:[%s12160_s30 + $0xb48] ss:$472 sps:$4 sm:$0xff]  }
  0x63   : > { %5218 = vmatpush1.bf16.msra.mxu0 %v10493_v52  ;;  %5259 = vmatpush1.bf16.msra.mxu1 %v10496_v53  ;;  %v10575_v52 = vld [vmem:[%s12160_s30 + $0xef4] ss:$472 sps:$4 sm:$0xff]  }
  0x64   : > { %5219 = vmatprep.subr.bf16.mxu0 %v10501_v54  ;;  %5260 = vmatprep.subr.bf16.mxu1 %v10504_v55  ;;  %v10578_v53 = vld [vmem:[%s12160_s30 + $0xefc] ss:$472 sps:$4 sm:$0xff]   ;;  %v10573_v54 = vld [vmem:[%s12160_s30 + $0xef0] ss:$472 sps:$4 sm:$0xff]  }
  0x65   : > { %v10576_v55 = vld [vmem:[%s12160_s30 + $0xef8] ss:$472 sps:$4 sm:$0xff]  }
  0x67   : > { %5220 = vmatpush1.bf16.msra.mxu0 %v10499_v58  ;;  %5261 = vmatpush1.bf16.msra.mxu1 %v10502_v59  ;;  %v880_v58 = vld [vmem:[%s12160_s30 + $0x1650] sm:$0xff]  ;;  %v881_v59 = vld [vmem:[%s12160_s30 + $0x1658] sm:$0xff] }
  0x68   : > { %10049 = vmatprep.subr.msk.bf16.mxu0 %vm4772_vm0, %v9932_v60  ;;  %10051 = vmatprep.subr.msk.bf16.mxu1 %vm4772_vm0, %v9934_v61  ;;  %v10579_v60 = vld [vmem:[%s12160_s30 + $0x12a0] ss:$472 sps:$4 sm:$0xff]   ;;  %v9940_v62 = vcombine.high %v880_v58, %v880_v58  ;;  %v9942_v63 = vcombine.high %v881_v59, %v881_v59 }
  0x69   : > { %v10582_v61 = vld [vmem:[%s12160_s30 + $0x12a8] ss:$472 sps:$4 sm:$0xff]  }
  0x6b   : > { %5222 = vmatpush1.bf16.msra.mxu0 %v4786_v2  ;;  %5263 = vmatpush1.bf16.msra.mxu1 %v4792_v3  ;;  %v9941_v2 = vcombine.low %v881_v59, %v881_v59  ;;  %v10591_v3 = vld [vmem:[%s12160_s30 + $0x44] ss:$472 sps:$4 sm:$0xff]   ;;  %v884_v59 = vld [vmem:[%s12160_s30 + $0x1670] sm:$0xff] }
  0x6c   : > { %5291 = vmatprep.subr.bf16.mxu0 %v10511_v1  ;;  %5332 = vmatprep.subr.bf16.mxu1 %v10514_v4  ;;  %v9939_v1 = vcombine.low %v880_v58, %v880_v58  ;;  %v10664_v58 = vld [vmem:[%s12160_s30 + $0x12cc] ss:$472 sps:$4 sm:$0xff]  }
  0x6e   : > { %10050 = vmatmul.mubr.msk.bf16.vlgmr.msra.gmra.mrb[4].mxu0 %vm4768_vm1, %v12203_v35  ;;  %10052 = vmatmul.mubr.msk.bf16.vlgmr.msra.gmra.mrb[4].mxu1 %vm4768_vm1, %v12203_v35  ;;  %v4810_v4 = vsel %vm4772_vm0, %v9939_v1, 0 }
  0x6f   : > { %5292 = vmatpush1.bf16.msra.mxu0 %v10509_v5  ;;  %5333 = vmatpush1.bf16.msra.mxu1 %v10512_v6  ;;  %v4816_v5 = vsel %vm4772_vm0, %v9941_v2, 0  ;;  %v10594_v6 = vld [vmem:[%s12160_s30 + $0x4c] ss:$472 sps:$4 sm:$0xff]   ;;  %v9947_v2 = vcombine.low %v884_v59, %v884_v59 }
  0x70   : > { %5293 = vmatprep.subr.bf16.mxu0 %v10517_v7  ;;  %5334 = vmatprep.subr.bf16.mxu1 %v10520_v8  ;;  %v10589_v7 = vld [vmem:[%s12160_s30 + $0x40] ss:$472 sps:$4 sm:$0xff]  }
  0x71   : > { %5323 = vmatprep.mubr.bf16.mxu0 %v12048_v0  ;;  %5364 = vmatprep.mubr.bf16.mxu1 %v12048_v0  ;;  %v10592_v8 = vld [vmem:[%s12160_s30 + $0x48] ss:$472 sps:$4 sm:$0xff]  }
  0x73   : > { %5294 = vmatpush1.bf16.msra.mxu0 %v10515_v9  ;;  %5335 = vmatpush1.bf16.msra.mxu1 %v10518_v10  ;;  %v10597_v9 = vld [vmem:[%s12160_s30 + $0x3f4] ss:$472 sps:$4 sm:$0xff]  }
  0x74   : > { %5295 = vmatprep.subr.bf16.mxu0 %v10523_v11  ;;  %5336 = vmatprep.subr.bf16.mxu1 %v10526_v12  ;;  %v10600_v10 = vld [vmem:[%s12160_s30 + $0x3fc] ss:$472 sps:$4 sm:$0xff]   ;;  %v10595_v11 = vld [vmem:[%s12160_s30 + $0x3f0] ss:$472 sps:$4 sm:$0xff]  }
  0x75   : > { %v10598_v12 = vld [vmem:[%s12160_s30 + $0x3f8] ss:$472 sps:$4 sm:$0xff]  }
  0x77   : > { %5296 = vmatpush1.bf16.msra.mxu0 %v10521_v13  ;;  %5337 = vmatpush1.bf16.msra.mxu1 %v10524_v14  ;;  %v10603_v13 = vld [vmem:[%s12160_s30 + $0x7a4] ss:$472 sps:$4 sm:$0xff]  }
  0x78   : > { %5297 = vmatprep.subr.bf16.mxu0 %v10529_v15  ;;  %5338 = vmatprep.subr.bf16.mxu1 %v10532_v16  ;;  %v10606_v14 = vld [vmem:[%s12160_s30 + $0x7ac] ss:$472 sps:$4 sm:$0xff]   ;;  %v10601_v15 = vld [vmem:[%s12160_s30 + $0x7a0] ss:$472 sps:$4 sm:$0xff]  }
  0x79   : > { %v10604_v16 = vld [vmem:[%s12160_s30 + $0x7a8] ss:$472 sps:$4 sm:$0xff]  }
  0x7b   : > { %5298 = vmatpush1.bf16.msra.mxu0 %v10527_v17  ;;  %5339 = vmatpush1.bf16.msra.mxu1 %v10530_v18  ;;  %v10609_v17 = vld [vmem:[%s12160_s30 + $0xb54] ss:$472 sps:$4 sm:$0xff]  }
  0x7c   : > { %5299 = vmatprep.subr.bf16.mxu0 %v10535_v19  ;;  %5340 = vmatprep.subr.bf16.mxu1 %v10538_v20  ;;  %v10612_v18 = vld [vmem:[%s12160_s30 + $0xb5c] ss:$472 sps:$4 sm:$0xff]   ;;  %v10607_v19 = vld [vmem:[%s12160_s30 + $0xb50] ss:$472 sps:$4 sm:$0xff]  }
  0x7d   : > { %v10610_v20 = vld [vmem:[%s12160_s30 + $0xb58] ss:$472 sps:$4 sm:$0xff]  }
  0x7f   : > { %5300 = vmatpush1.bf16.msra.mxu0 %v10533_v21  ;;  %5341 = vmatpush1.bf16.msra.mxu1 %v10536_v22  ;;  %v10615_v21 = vld [vmem:[%s12160_s30 + $0xf04] ss:$472 sps:$4 sm:$0xff]  }
  0x80   : > { %5301 = vmatprep.subr.bf16.mxu0 %v10541_v23  ;;  %5342 = vmatprep.subr.bf16.mxu1 %v10544_v24  ;;  %v10618_v22 = vld [vmem:[%s12160_s30 + $0xf0c] ss:$472 sps:$4 sm:$0xff]   ;;  %v10613_v23 = vld [vmem:[%s12160_s30 + $0xf00] ss:$472 sps:$4 sm:$0xff]  }
  0x81   : > { %v10616_v24 = vld [vmem:[%s12160_s30 + $0xf08] ss:$472 sps:$4 sm:$0xff]  }
  0x83   : > { %5302 = vmatpush1.bf16.msra.mxu0 %v10539_v27  ;;  %5343 = vmatpush1.bf16.msra.mxu1 %v10542_v28  ;;  %v882_v27 = vld [vmem:[%s12160_s30 + $0x1660] sm:$0xff]  ;;  %v883_v28 = vld [vmem:[%s12160_s30 + $0x1668] sm:$0xff] }
  0x84   : > { %10053 = vmatprep.subr.msk.bf16.mxu0 %vm4772_vm0, %v9936_v29  ;;  %10055 = vmatprep.subr.msk.bf16.mxu1 %vm4772_vm0, %v9938_v30  ;;  %v10619_v29 = vld [vmem:[%s12160_s30 + $0x12b0] ss:$472 sps:$4 sm:$0xff]   ;;  %v9944_v31 = vcombine.high %v882_v27, %v882_v27  ;;  %v9946_v32 = vcombine.high %v883_v28, %v883_v28 }
  0x85   : > { %v10622_v30 = vld [vmem:[%s12160_s30 + $0x12b8] ss:$472 sps:$4 sm:$0xff]  }
  0x87   : > { %5304 = vmatpush1.bf16.msra.mxu0 %v4798_v34  ;;  %5345 = vmatpush1.bf16.msra.mxu1 %v4804_v36  ;;  %v9945_v34 = vcombine.low %v883_v28, %v883_v28  ;;  %v10631_v36 = vld [vmem:[%s12160_s30 + $0x54] ss:$472 sps:$4 sm:$0xff]  }
  0x88   : > { %5373 = vmatprep.subr.bf16.mxu0 %v10551_v33  ;;  %5414 = vmatprep.subr.bf16.mxu1 %v10554_v37  ;;  %v9943_v33 = vcombine.low %v882_v27, %v882_v27  ;;  %v10701_v27 = vld [vmem:[%s12160_s30 + $0x12d4] ss:$472 sps:$4 sm:$0xff]  }
  0x89   : > { %v10704_v28 = vld [vmem:[%s12160_s30 + $0x12dc] ss:$472 sps:$4 sm:$0xff]  }
  0x8a   : > { %10054 = vmatmul.mubr.msk.bf16.vlgmr.msra.gmra.mrb[8].mxu0 %vm4768_vm1, %v12203_v35  ;;  %10056 = vmatmul.mubr.msk.bf16.vlgmr.msra.gmra.mrb[8].mxu1 %vm4768_vm1, %v12203_v35  ;;  %v4822_v37 = vsel %vm4772_vm0, %v9943_v33, 0 }
  0x8b   : > { %5374 = vmatpush1.bf16.msra.mxu0 %v10549_v38  ;;  %5415 = vmatpush1.bf16.msra.mxu1 %v10552_v39  ;;  %v4828_v38 = vsel %vm4772_vm0, %v9945_v34, 0  ;;  %v10634_v39 = vld [vmem:[%s12160_s30 + $0x5c] ss:$472 sps:$4 sm:$0xff]  }
  0x8c   : > { %5375 = vmatprep.subr.bf16.mxu0 %v10557_v40  ;;  %5416 = vmatprep.subr.bf16.mxu1 %v10560_v41  ;;  %v10629_v40 = vld [vmem:[%s12160_s30 + $0x50] ss:$472 sps:$4 sm:$0xff]  }
  0x8d   : > { %5405 = vmatprep.mubr.bf16.mxu0 %v12048_v0  ;;  %5446 = vmatprep.mubr.bf16.mxu1 %v12048_v0  ;;  %v10632_v41 = vld [vmem:[%s12160_s30 + $0x58] ss:$472 sps:$4 sm:$0xff]  }
  0x8f   : > { %5376 = vmatpush1.bf16.msra.mxu0 %v10555_v42  ;;  %5417 = vmatpush1.bf16.msra.mxu1 %v10558_v43  ;;  %v10637_v42 = vld [vmem:[%s12160_s30 + $0x404] ss:$472 sps:$4 sm:$0xff]  }
  0x90   : > { %5377 = vmatprep.subr.bf16.mxu0 %v10563_v44  ;;  %5418 = vmatprep.subr.bf16.mxu1 %v10566_v45  ;;  %v10640_v43 = vld [vmem:[%s12160_s30 + $0x40c] ss:$472 sps:$4 sm:$0xff]   ;;  %v10635_v44 = vld [vmem:[%s12160_s30 + $0x400] ss:$472 sps:$4 sm:$0xff]  }
  0x91   : > { %v10638_v45 = vld [vmem:[%s12160_s30 + $0x408] ss:$472 sps:$4 sm:$0xff]  }
  0x93   : > { %5378 = vmatpush1.bf16.msra.mxu0 %v10561_v46  ;;  %5419 = vmatpush1.bf16.msra.mxu1 %v10564_v47  ;;  %v10643_v46 = vld [vmem:[%s12160_s30 + $0x7b4] ss:$472 sps:$4 sm:$0xff]  }
  0x94   : > { %5379 = vmatprep.subr.bf16.mxu0 %v10569_v48  ;;  %5420 = vmatprep.subr.bf16.mxu1 %v10572_v49  ;;  %v10646_v47 = vld [vmem:[%s12160_s30 + $0x7bc] ss:$472 sps:$4 sm:$0xff]   ;;  %v10641_v48 = vld [vmem:[%s12160_s30 + $0x7b0] ss:$472 sps:$4 sm:$0xff]  }
  0x95   : > { %v10649_v49 = vld [vmem:[%s12160_s30 + $0xb64] ss:$472 sps:$4 sm:$0xff]  }
  0x97   : > { %5380 = vmatpush1.bf16.msra.mxu0 %v10567_v50  ;;  %5421 = vmatpush1.bf16.msra.mxu1 %v10570_v51  ;;  %v10652_v50 = vld [vmem:[%s12160_s30 + $0xb6c] ss:$472 sps:$4 sm:$0xff]   ;;  %v10647_v51 = vld [vmem:[%s12160_s30 + $0xb60] ss:$472 sps:$4 sm:$0xff]  }
  0x98   : > { %5381 = vmatprep.subr.bf16.mxu0 %v10575_v52  ;;  %5422 = vmatprep.subr.bf16.mxu1 %v10578_v53  ;;  %v10650_v52 = vld [vmem:[%s12160_s30 + $0xb68] ss:$472 sps:$4 sm:$0xff]   ;;  %v10655_v53 = vld [vmem:[%s12160_s30 + $0xf14] ss:$472 sps:$4 sm:$0xff]  }
  0x9b   : > { %5382 = vmatpush1.bf16.msra.mxu0 %v10573_v54  ;;  %5423 = vmatpush1.bf16.msra.mxu1 %v10576_v55  ;;  %v10658_v54 = vld [vmem:[%s12160_s30 + $0xf1c] ss:$472 sps:$4 sm:$0xff]   ;;  %v10653_v55 = vld [vmem:[%s12160_s30 + $0xf10] ss:$472 sps:$4 sm:$0xff]  }
  0x9c   : > { %5383 = vmatprep.subr.bf16.mxu0 %v10581_v56  ;;  %5424 = vmatprep.subr.bf16.mxu1 %v10584_v57  ;;  %v10656_v56 = vld [vmem:[%s12160_s30 + $0xf18] ss:$472 sps:$4 sm:$0xff]   ;;  %v10661_v57 = vld [vmem:[%s12160_s30 + $0x12c4] ss:$472 sps:$4 sm:$0xff]  }
  0x9f   : > { %5384 = vmatpush1.bf16.msra.mxu0 %v10579_v60  ;;  %5425 = vmatpush1.bf16.msra.mxu1 %v10582_v61  ;;  %v885_v60 = vld [vmem:[%s12160_s30 + $0x1678] sm:$0xff] }
  0xa0   : > { %10057 = vmatprep.subr.msk.bf16.mxu0 %vm4772_vm0, %v9940_v62  ;;  %10059 = vmatprep.subr.msk.bf16.mxu1 %vm4772_vm0, %v9942_v63  ;;  %v10659_v61 = vld [vmem:[%s12160_s30 + $0x12c0] ss:$472 sps:$4 sm:$0xff]   ;;  %v9948_v63 = vcombine.high %v884_v59, %v884_v59  ;;  %v9950_v1 = vcombine.high %v885_v60, %v885_v60  ;;  %v10741_v59 = vld [vmem:[%s12160_s30 + $0x12e4] ss:$472 sps:$4 sm:$0xff]  }
  0xa1   : > { %v10662_v62 = vld [vmem:[%s12160_s30 + $0x12c8] ss:$472 sps:$4 sm:$0xff]  }
  0xa3   : > { %5386 = vmatpush1.bf16.msra.mxu0 %v4810_v4  ;;  %5427 = vmatpush1.bf16.msra.mxu1 %v4816_v5  ;;  %v10671_v4 = vld [vmem:[%s12160_s30 + $0x64] ss:$472 sps:$4 sm:$0xff]   ;;  %v4834_v5 = vsel %vm4772_vm0, %v9947_v2, 0 }
  0xa4   : > { %5455 = vmatprep.subr.bf16.mxu0 %v10591_v3  ;;  %5496 = vmatprep.subr.bf16.mxu1 %v10594_v6  ;;  %v9949_v3 = vcombine.low %v885_v60, %v885_v60  ;;  %v10744_v60 = vld [vmem:[%s12160_s30 + $0x12ec] ss:$472 sps:$4 sm:$0xff]  }
  0xa6   : > { %10058 = vmatmul.mubr.msk.bf16.vlgmr.msra.gmra.mrb[12].mxu0 %vm4768_vm1, %v12203_v35  ;;  %10060 = vmatmul.mubr.msk.bf16.vlgmr.msra.gmra.mrb[12].mxu1 %vm4768_vm1, %v12203_v35  ;;  %v4840_v6 = vsel %vm4772_vm0, %v9949_v3, 0 }
  0xa7   : > { %5456 = vmatpush1.bf16.msra.mxu0 %v10589_v7  ;;  %5497 = vmatpush1.bf16.msra.mxu1 %v10592_v8  ;;  %v10674_v7 = vld [vmem:[%s12160_s30 + $0x6c] ss:$472 sps:$4 sm:$0xff]   ;;  %v10669_v8 = vld [vmem:[%s12160_s30 + $0x60] ss:$472 sps:$4 sm:$0xff]  }
  0xa8   : > { %5457 = vmatprep.subr.bf16.mxu0 %v10597_v9  ;;  %5498 = vmatprep.subr.bf16.mxu1 %v10600_v10  ;;  %v10672_v9 = vld [vmem:[%s12160_s30 + $0x68] ss:$472 sps:$4 sm:$0xff]   ;;  %v10677_v10 = vld [vmem:[%s12160_s30 + $0x414] ss:$472 sps:$4 sm:$0xff]  }
  0xa9   : > { %5487 = vmatprep.mubr.bf16.mxu0 %v12048_v0  ;;  %5528 = vmatprep.mubr.bf16.mxu1 %v12048_v0 }
  0xab   : > { %5458 = vmatpush1.bf16.msra.mxu0 %v10595_v11  ;;  %5499 = vmatpush1.bf16.msra.mxu1 %v10598_v12  ;;  %v10680_v11 = vld [vmem:[%s12160_s30 + $0x41c] ss:$472 sps:$4 sm:$0xff]   ;;  %v12392_v12 = vld [vmem:[%s13882_s0] sm:$0x1] }
  0xac   : > { %5459 = vmatprep.subr.bf16.mxu0 %v10603_v13  ;;  %5500 = vmatprep.subr.bf16.mxu1 %v10606_v14  ;;  %v10675_v13 = vld [vmem:[%s12160_s30 + $0x410] ss:$472 sps:$4 sm:$0xff]  }
  0xad   : > { %v10678_v14 = vld [vmem:[%s12160_s30 + $0x418] ss:$472 sps:$4 sm:$0xff]  }
  0xaf   : > { %5460 = vmatpush1.bf16.msra.mxu0 %v10601_v15  ;;  %5501 = vmatpush1.bf16.msra.mxu1 %v10604_v16  ;;  %v10683_v15 = vld [vmem:[%s12160_s30 + $0x7c4] ss:$472 sps:$4 sm:$0xff]  }
  0xb0   : > { %5461 = vmatprep.subr.bf16.mxu0 %v10609_v17  ;;  %5502 = vmatprep.subr.bf16.mxu1 %v10612_v18  ;;  %v10686_v16 = vld [vmem:[%s12160_s30 + $0x7cc] ss:$472 sps:$4 sm:$0xff]   ;;  %v10681_v17 = vld [vmem:[%s12160_s30 + $0x7c0] ss:$472 sps:$4 sm:$0xff]  }
  0xb1   : > { %v10684_v18 = vld [vmem:[%s12160_s30 + $0x7c8] ss:$472 sps:$4 sm:$0xff]  }
  0xb3   : > { %5462 = vmatpush1.bf16.msra.mxu0 %v10607_v19  ;;  %5503 = vmatpush1.bf16.msra.mxu1 %v10610_v20  ;;  %v10689_v19 = vld [vmem:[%s12160_s30 + $0xb74] ss:$472 sps:$4 sm:$0xff]  }
  0xb4   : > { %5463 = vmatprep.subr.bf16.mxu0 %v10615_v21  ;;  %5504 = vmatprep.subr.bf16.mxu1 %v10618_v22  ;;  %v10692_v20 = vld [vmem:[%s12160_s30 + $0xb7c] ss:$472 sps:$4 sm:$0xff]   ;;  %v10687_v21 = vld [vmem:[%s12160_s30 + $0xb70] ss:$472 sps:$4 sm:$0xff]  }
  0xb5   : > { %v10690_v22 = vld [vmem:[%s12160_s30 + $0xb78] ss:$472 sps:$4 sm:$0xff]  }
  0xb7   : > { %5464 = vmatpush1.bf16.msra.mxu0 %v10613_v23  ;;  %5505 = vmatpush1.bf16.msra.mxu1 %v10616_v24  ;;  %v10695_v23 = vld [vmem:[%s12160_s30 + $0xf24] ss:$472 sps:$4 sm:$0xff]  }
  0xb8   : > { %5465 = vmatprep.subr.bf16.mxu0 %v10621_v25  ;;  %5506 = vmatprep.subr.bf16.mxu1 %v10624_v26  ;;  %v10698_v24 = vld [vmem:[%s12160_s30 + $0xf2c] ss:$472 sps:$4 sm:$0xff]   ;;  %v10693_v25 = vld [vmem:[%s12160_s30 + $0xf20] ss:$472 sps:$4 sm:$0xff]  }
  0xb9   : > { %v10696_v26 = vld [vmem:[%s12160_s30 + $0xf28] ss:$472 sps:$4 sm:$0xff]  }
  0xbb   : > { %5466 = vmatpush1.bf16.msra.mxu0 %v10619_v29  ;;  %5507 = vmatpush1.bf16.msra.mxu1 %v10622_v30  ;;  %v886_v29 = vld [vmem:[%s12160_s30 + $0x1680] sm:$0xff]  ;;  %v887_v30 = vld [vmem:[%s12160_s30 + $0x1688] sm:$0xff] }
  0xbc   : > { %10061 = vmatprep.subr.msk.bf16.mxu0 %vm4772_vm0, %v9944_v31  ;;  %10063 = vmatprep.subr.msk.bf16.mxu1 %vm4772_vm0, %v9946_v32  ;;  %v10699_v31 = vld [vmem:[%s12160_s30 + $0x12d0] ss:$472 sps:$4 sm:$0xff]   ;;  %v9952_v33 = vcombine.high %v886_v29, %v886_v29  ;;  %v9954_v34 = vcombine.high %v887_v30, %v887_v30 }
  0xbd   : > { %v10702_v32 = vld [vmem:[%s12160_s30 + $0x12d8] ss:$472 sps:$4 sm:$0xff]  }
  0xbf   : > { %5468 = vmatpush1.bf16.msra.mxu0 %v4822_v37  ;;  %5509 = vmatpush1.bf16.msra.mxu1 %v4828_v38  ;;  %v9953_v37 = vcombine.low %v887_v30, %v887_v30  ;;  %v10711_v38 = vld [vmem:[%s12160_s30 + $0x74] ss:$472 sps:$4 sm:$0xff]  }
  0xc0   : > { %5537 = vmatprep.subr.bf16.mxu0 %v10631_v36  ;;  %5578 = vmatprep.subr.bf16.mxu1 %v10634_v39  ;;  %v9951_v36 = vcombine.low %v886_v29, %v886_v29  ;;  %v10781_v29 = vld [vmem:[%s12160_s30 + $0x12f4] ss:$472 sps:$4 sm:$0xff]  }
  0xc1   : > { %v10784_v30 = vld [vmem:[%s12160_s30 + $0x12fc] ss:$472 sps:$4 sm:$0xff]  }
  0xc2   : > { %10062 = vmatmul.mubr.msk.bf16.vlgmr.msra.gmra.mrb[16].mxu0 %vm4768_vm1, %v12203_v35  ;;  %10064 = vmatmul.mubr.msk.bf16.vlgmr.msra.gmra.mrb[16].mxu1 %vm4768_vm1, %v12203_v35  ;;  %v10644_v35 = vld [vmem:[%s12160_s30 + $0x7b8] ss:$472 sps:$4 sm:$0xff]   ;;  %v4846_v39 = vsel %vm4772_vm0, %v9951_v36, 0 }
  0xc3   : > { %5538 = vmatpush1.bf16.msra.mxu0 %v10629_v40  ;;  %5579 = vmatpush1.bf16.msra.mxu1 %v10632_v41  ;;  %v4852_v40 = vsel %vm4772_vm0, %v9953_v37, 0  ;;  %v10714_v41 = vld [vmem:[%s12160_s30 + $0x7c] ss:$472 sps:$4 sm:$0xff]  }
  0xc4   : > { %5539 = vmatprep.subr.bf16.mxu0 %v10637_v42  ;;  %5580 = vmatprep.subr.bf16.mxu1 %v10640_v43  ;;  %v10709_v42 = vld [vmem:[%s12160_s30 + $0x70] ss:$472 sps:$4 sm:$0xff]  }
  0xc5   : > { %5569 = vmatprep.mubr.bf16.mxu0 %v12048_v0  ;;  %5610 = vmatprep.mubr.bf16.mxu1 %v12048_v0  ;;  %v10712_v43 = vld [vmem:[%s12160_s30 + $0x78] ss:$472 sps:$4 sm:$0xff]  }
  0xc7   : > { %5540 = vmatpush1.bf16.msra.mxu0 %v10635_v44  ;;  %5581 = vmatpush1.bf16.msra.mxu1 %v10638_v45  ;;  %v10717_v44 = vld [vmem:[%s12160_s30 + $0x424] ss:$472 sps:$4 sm:$0xff]  }
  0xc8   : > { %5541 = vmatprep.subr.bf16.mxu0 %v10643_v46  ;;  %5582 = vmatprep.subr.bf16.mxu1 %v10646_v47  ;;  %v10720_v45 = vld [vmem:[%s12160_s30 + $0x42c] ss:$472 sps:$4 sm:$0xff]   ;;  %v10715_v46 = vld [vmem:[%s12160_s30 + $0x420] ss:$472 sps:$4 sm:$0xff]  }
  0xc9   : > { %v10718_v47 = vld [vmem:[%s12160_s30 + $0x428] ss:$472 sps:$4 sm:$0xff]  }
  0xcb   : > { %5542 = vmatpush1.bf16.msra.mxu0 %v10641_v48  ;;  %5583 = vmatpush1.bf16.msra.mxu1 %v10644_v35  ;;  %v10723_v48 = vld [vmem:[%s12160_s30 + $0x7d4] ss:$472 sps:$4 sm:$0xff]  }
  0xcc   : > { %5543 = vmatprep.subr.bf16.mxu0 %v10649_v49  ;;  %5584 = vmatprep.subr.bf16.mxu1 %v10652_v50  ;;  %v10726_v35 = vld [vmem:[%s12160_s30 + $0x7dc] ss:$472 sps:$4 sm:$0xff]   ;;  %v10721_v49 = vld [vmem:[%s12160_s30 + $0x7d0] ss:$472 sps:$4 sm:$0xff]  }
  0xcd   : > { %v10724_v50 = vld [vmem:[%s12160_s30 + $0x7d8] ss:$472 sps:$4 sm:$0xff]  }
  0xcf   : > { %5544 = vmatpush1.bf16.msra.mxu0 %v10647_v51  ;;  %5585 = vmatpush1.bf16.msra.mxu1 %v10650_v52  ;;  %v10729_v51 = vld [vmem:[%s12160_s30 + $0xb84] ss:$472 sps:$4 sm:$0xff]  }
  0xd0   : > { %5545 = vmatprep.subr.bf16.mxu0 %v10655_v53  ;;  %5586 = vmatprep.subr.bf16.mxu1 %v10658_v54  ;;  %v10732_v52 = vld [vmem:[%s12160_s30 + $0xb8c] ss:$472 sps:$4 sm:$0xff]   ;;  %v10727_v53 = vld [vmem:[%s12160_s30 + $0xb80] ss:$472 sps:$4 sm:$0xff]  }
  0xd1   : > { %v10730_v54 = vld [vmem:[%s12160_s30 + $0xb88] ss:$472 sps:$4 sm:$0xff]  }
  0xd3   : > { %5546 = vmatpush1.bf16.msra.mxu0 %v10653_v55  ;;  %5587 = vmatpush1.bf16.msra.mxu1 %v10656_v56  ;;  %v10735_v55 = vld [vmem:[%s12160_s30 + $0xf34] ss:$472 sps:$4 sm:$0xff]  }
  0xd4   : > { %5547 = vmatprep.subr.bf16.mxu0 %v10661_v57  ;;  %5588 = vmatprep.subr.bf16.mxu1 %v10664_v58  ;;  %v10738_v56 = vld [vmem:[%s12160_s30 + $0xf3c] ss:$472 sps:$4 sm:$0xff]   ;;  %v10733_v57 = vld [vmem:[%s12160_s30 + $0xf30] ss:$472 sps:$4 sm:$0xff]  }
  0xd5   : > { %v10736_v58 = vld [vmem:[%s12160_s30 + $0xf38] ss:$472 sps:$4 sm:$0xff]  }
  0xd7   : > { %5548 = vmatpush1.bf16.msra.mxu0 %v10659_v61  ;;  %5589 = vmatpush1.bf16.msra.mxu1 %v10662_v62  ;;  %v888_v61 = vld [vmem:[%s12160_s30 + $0x1690] sm:$0xff]  ;;  %v889_v62 = vld [vmem:[%s12160_s30 + $0x1698] sm:$0xff] }
  0xd8   : > { %10065 = vmatprep.subr.msk.bf16.mxu0 %vm4772_vm0, %v9948_v63  ;;  %10067 = vmatprep.subr.msk.bf16.mxu1 %vm4772_vm0, %v9950_v1  ;;  %v10739_v63 = vld [vmem:[%s12160_s30 + $0x12e0] ss:$472 sps:$4 sm:$0xff]   ;;  %v9956_v2 = vcombine.high %v888_v61, %v888_v61  ;;  %v9958_v3 = vcombine.high %v889_v62, %v889_v62 }
  0xd9   : > { %v10742_v1 = vld [vmem:[%s12160_s30 + $0x12e8] ss:$472 sps:$4 sm:$0xff]  }
  0xdb   : > { %5550 = vmatpush1.bf16.msra.mxu0 %v4834_v5  ;;  %5591 = vmatpush1.bf16.msra.mxu1 %v4840_v6  ;;  %v9957_v5 = vcombine.low %v889_v62, %v889_v62  ;;  %v10751_v6 = vld [vmem:[%s12160_s30 + $0x84] ss:$472 sps:$4 sm:$0xff]  }
  0xdc   : > { %5619 = vmatprep.subr.bf16.mxu0 %v10671_v4  ;;  %5660 = vmatprep.subr.bf16.mxu1 %v10674_v7  ;;  %v9955_v4 = vcombine.low %v888_v61, %v888_v61  ;;  %v10754_v7 = vld [vmem:[%s12160_s30 + $0x8c] ss:$472 sps:$4 sm:$0xff]  }
  0xde   : > { %10066 = vmatmul.mubr.msk.bf16.vlgmr.msra.gmra.mrb[20].mxu0 %vm4768_vm1, %v12392_v12  ;;  %10068 = vmatmul.mubr.msk.bf16.vlgmr.msra.gmra.mrb[20].mxu1 %vm4768_vm1, %v12392_v12 }
  0xdf   : > { %5620 = vmatpush1.bf16.msra.mxu0 %v10669_v8  ;;  %5661 = vmatpush1.bf16.msra.mxu1 %v10672_v9  ;;  %v4858_v8 = vsel %vm4772_vm0, %v9955_v4, 0  ;;  %v4864_v9 = vsel %vm4772_vm0, %v9957_v5, 0  ;;  %v10803_v5 = vld [vmem:[%s12160_s30 + $0x7f4] ss:$472 sps:$4 sm:$0xff]  }
  0xe0   : > { %5621 = vmatprep.subr.bf16.mxu0 %v10677_v10  ;;  %5662 = vmatprep.subr.bf16.mxu1 %v10680_v11  ;;  %v10749_v10 = vld [vmem:[%s12160_s30 + $0x80] ss:$472 sps:$4 sm:$0xff]  }
  0xe1   : > { %5651 = vmatprep.mubr.bf16.mxu0 %v12048_v0  ;;  %5692 = vmatprep.mubr.bf16.mxu1 %v12048_v0  ;;  %v10752_v11 = vld [vmem:[%s12160_s30 + $0x88] ss:$472 sps:$4 sm:$0xff]  }
  0xe3   : > { %5622 = vmatpush1.bf16.msra.mxu0 %v10675_v13  ;;  %5663 = vmatpush1.bf16.msra.mxu1 %v10678_v14  ;;  %v10757_v13 = vld [vmem:[%s12160_s30 + $0x434] ss:$472 sps:$4 sm:$0xff]  }
  0xe4   : > { %5623 = vmatprep.subr.bf16.mxu0 %v10683_v15  ;;  %5664 = vmatprep.subr.bf16.mxu1 %v10686_v16  ;;  %v10760_v14 = vld [vmem:[%s12160_s30 + $0x43c] ss:$472 sps:$4 sm:$0xff]   ;;  %v10755_v15 = vld [vmem:[%s12160_s30 + $0x430] ss:$472 sps:$4 sm:$0xff]  }
  0xe5   : > { %v10758_v16 = vld [vmem:[%s12160_s30 + $0x438] ss:$472 sps:$4 sm:$0xff]  }
  0xe7   : > { %5624 = vmatpush1.bf16.msra.mxu0 %v10681_v17  ;;  %5665 = vmatpush1.bf16.msra.mxu1 %v10684_v18  ;;  %v10763_v17 = vld [vmem:[%s12160_s30 + $0x7e4] ss:$472 sps:$4 sm:$0xff]  }
  0xe8   : > { %5625 = vmatprep.subr.bf16.mxu0 %v10689_v19  ;;  %5666 = vmatprep.subr.bf16.mxu1 %v10692_v20  ;;  %v10766_v18 = vld [vmem:[%s12160_s30 + $0x7ec] ss:$472 sps:$4 sm:$0xff]   ;;  %v10761_v19 = vld [vmem:[%s12160_s30 + $0x7e0] ss:$472 sps:$4 sm:$0xff]  }
  0xe9   : > { %v10764_v20 = vld [vmem:[%s12160_s30 + $0x7e8] ss:$472 sps:$4 sm:$0xff]  }
  0xeb   : > { %5626 = vmatpush1.bf16.msra.mxu0 %v10687_v21  ;;  %5667 = vmatpush1.bf16.msra.mxu1 %v10690_v22  ;;  %v10769_v21 = vld [vmem:[%s12160_s30 + $0xb94] ss:$472 sps:$4 sm:$0xff]  }
  0xec   : > { %5627 = vmatprep.subr.bf16.mxu0 %v10695_v23  ;;  %5668 = vmatprep.subr.bf16.mxu1 %v10698_v24  ;;  %v10772_v22 = vld [vmem:[%s12160_s30 + $0xb9c] ss:$472 sps:$4 sm:$0xff]   ;;  %v10767_v23 = vld [vmem:[%s12160_s30 + $0xb90] ss:$472 sps:$4 sm:$0xff]  }
  0xed   : > { %v10770_v24 = vld [vmem:[%s12160_s30 + $0xb98] ss:$472 sps:$4 sm:$0xff]  }
  0xef   : > { %5628 = vmatpush1.bf16.msra.mxu0 %v10693_v25  ;;  %5669 = vmatpush1.bf16.msra.mxu1 %v10696_v26  ;;  %v10775_v25 = vld [vmem:[%s12160_s30 + $0xf44] ss:$472 sps:$4 sm:$0xff]  }
  0xf0   : > { %5629 = vmatprep.subr.bf16.mxu0 %v10701_v27  ;;  %5670 = vmatprep.subr.bf16.mxu1 %v10704_v28  ;;  %v10778_v26 = vld [vmem:[%s12160_s30 + $0xf4c] ss:$472 sps:$4 sm:$0xff]   ;;  %v10773_v27 = vld [vmem:[%s12160_s30 + $0xf40] ss:$472 sps:$4 sm:$0xff]  }
  0xf1   : > { %v10776_v28 = vld [vmem:[%s12160_s30 + $0xf48] ss:$472 sps:$4 sm:$0xff]  }
  0xf3   : > { %5630 = vmatpush1.bf16.msra.mxu0 %v10699_v31  ;;  %5671 = vmatpush1.bf16.msra.mxu1 %v10702_v32  ;;  %v890_v31 = vld [vmem:[%s12160_s30 + $0x16a0] sm:$0xff]  ;;  %v891_v32 = vld [vmem:[%s12160_s30 + $0x16a8] sm:$0xff] }
  0xf4   : > { %10069 = vmatprep.subr.msk.bf16.mxu0 %vm4772_vm0, %v9952_v33  ;;  %10071 = vmatprep.subr.msk.bf16.mxu1 %vm4772_vm0, %v9954_v34 }
  0xf7   : > { %5632 = vmatpush1.bf16.msra.mxu0 %v4846_v39  ;;  %5673 = vmatpush1.bf16.msra.mxu1 %v4852_v40  ;;  %v10779_v39 = vld [vmem:[%s12160_s30 + $0x12f0] ss:$472 sps:$4 sm:$0xff]  }
  0xf8   : > { %5701 = vmatprep.subr.bf16.mxu0 %v10711_v38  ;;  %5742 = vmatprep.subr.bf16.mxu1 %v10714_v41  ;;  %v10782_v40 = vld [vmem:[%s12160_s30 + $0x12f8] ss:$472 sps:$4 sm:$0xff]   ;;  %v9960_v41 = vcombine.high %v890_v31, %v890_v31 }
  0xfa   : > { %10070 = vmatmul.mubr.msk.bf16.vlgmr.msra.gmra.mrb[24].mxu0 %vm4768_vm1, %v12392_v12  ;;  %10072 = vmatmul.mubr.msk.bf16.vlgmr.msra.gmra.mrb[24].mxu1 %vm4768_vm1, %v12392_v12 }
  0xfb   : > { %5702 = vmatpush1.bf16.msra.mxu0 %v10709_v42  ;;  %5743 = vmatpush1.bf16.msra.mxu1 %v10712_v43 }
  0xfc   : > { %5703 = vmatprep.subr.bf16.mxu0 %v10717_v44  ;;  %5744 = vmatprep.subr.bf16.mxu1 %v10720_v45  ;;  %v9962_v44 = vcombine.high %v891_v32, %v891_v32  ;;  %v9959_v45 = vcombine.low %v890_v31, %v890_v31  ;;  %v10822_v31 = vld [vmem:[%s12160_s30 + $0x1308] ss:$472 sps:$4 sm:$0xff]  }
  0xfd   : > { %5733 = vmatprep.mubr.bf16.mxu0 %v12048_v0  ;;  %5774 = vmatprep.mubr.bf16.mxu1 %v12048_v0 }
  0xff   : > { %5704 = vmatpush1.bf16.msra.mxu0 %v10715_v46  ;;  %5745 = vmatpush1.bf16.msra.mxu1 %v10718_v47  ;;  %v9961_v46 = vcombine.low %v891_v32, %v891_v32 }
 0x100   : > { %5705 = vmatprep.subr.bf16.mxu0 %v10723_v48  ;;  %5746 = vmatprep.subr.bf16.mxu1 %v10726_v35  ;;  %v12049_v48 = vmov 1966171168  }
 0x101   : > { %v7905_v35 = vunpack.c.l.s4 %v12049_v48 }
 0x103   : > { %5706 = vmatpush1.bf16.msra.mxu0 %v10721_v49  ;;  %5747 = vmatpush1.bf16.msra.mxu1 %v10724_v50  ;;  %v7907_v49 = vlaneseq  ;;  %v10791_v50 = vld [vmem:[%s12160_s30 + $0x94] ss:$472 sps:$4 sm:$0xff]  }
 0x104   : > { %5707 = vmatprep.subr.bf16.mxu0 %v10729_v51  ;;  %5748 = vmatprep.subr.bf16.mxu1 %v10732_v52  ;;  %v4870_v51 = vsel %vm4772_vm0, %v9959_v45, 0  ;;  %v4876_v52 = vsel %vm4772_vm0, %v9961_v46, 0  ;;  %v10832_v45 = vld [vmem:[%s12160_s30 + $0xa8] ss:$472 sps:$4 sm:$0xff]   ;;  %v10837_v46 = vld [vmem:[%s12160_s30 + $0x454] ss:$472 sps:$4 sm:$0xff]  }
 0x107   : > { %5708 = vmatpush1.bf16.msra.mxu0 %v10727_v53  ;;  %5749 = vmatpush1.bf16.msra.mxu1 %v10730_v54  ;;  %v10794_v53 = vld [vmem:[%s12160_s30 + $0x9c] ss:$472 sps:$4 sm:$0xff]   ;;  %v7906_v54 = vunpack.c.0.s8 %v7905_v35 }
 0x108   : > { %5709 = vmatprep.subr.bf16.mxu0 %v10735_v55  ;;  %5750 = vmatprep.subr.bf16.mxu1 %v10738_v56  ;;  %v7908_v55 = vshrl.u32 %v7907_v49, 7  ;;  %v10789_v56 = vld [vmem:[%s12160_s30 + $0x90] ss:$472 sps:$4 sm:$0xff]  }
 0x10a   : > { %v12502_v62 = vsub.s32 %v7906_v54, %v7908_v55  ;;  %v10843_v55 = vld [vmem:[%s12160_s30 + $0x804] ss:$472 sps:$4 sm:$0xff]  }
 0x10b   : > { %5710 = vmatpush1.bf16.msra.mxu0 %v10733_v57  ;;  %5751 = vmatpush1.bf16.msra.mxu1 %v10736_v58  ;;  %v10792_v57 = vld [vmem:[%s12160_s30 + $0x98] ss:$472 sps:$4 sm:$0xff]   ;;  %v10797_v58 = vld [vmem:[%s12160_s30 + $0x444] ss:$472 sps:$4 sm:$0xff]  }
 0x10c   : > { %5711 = vmatprep.subr.bf16.mxu0 %v10741_v59  ;;  %5752 = vmatprep.subr.bf16.mxu1 %v10744_v60  ;;  %v10800_v59 = vld [vmem:[%s12160_s30 + $0x44c] ss:$472 sps:$4 sm:$0xff]  }
 0x10f   : > { %5712 = vmatpush1.bf16.msra.mxu0 %v10739_v63  ;;  %5753 = vmatpush1.bf16.msra.mxu1 %v10742_v1  ;;  %v10795_v1 = vld [vmem:[%s12160_s30 + $0x440] ss:$472 sps:$4 sm:$0xff]  }
 0x110   : > { %10073 = vmatprep.subr.msk.bf16.mxu0 %vm4772_vm0, %v9956_v2  ;;  %10075 = vmatprep.subr.msk.bf16.mxu1 %vm4772_vm0, %v9958_v3  ;;  %v10798_v2 = vld [vmem:[%s12160_s30 + $0x448] ss:$472 sps:$4 sm:$0xff]  }
 0x113   : > { %5714 = vmatpush1.bf16.msra.mxu0 %v4858_v8  ;;  %5755 = vmatpush1.bf16.msra.mxu1 %v4864_v9  ;;  %v10801_v9 = vld [vmem:[%s12160_s30 + $0x7f0] ss:$472 sps:$4 sm:$0xff]  }
 0x114   : > { %5783 = vmatprep.subr.bf16.mxu0 %v10751_v6  ;;  %5824 = vmatprep.subr.bf16.mxu1 %v10754_v7  ;;  %v10806_v6 = vld [vmem:[%s12160_s30 + $0x7fc] ss:$472 sps:$4 sm:$0xff]  }
 0x116   : > { %10074 = vmatmul.mubr.msk.bf16.vlgmr.msra.gmra.mrb[28].mxu0 %vm4768_vm1, %v12392_v12  ;;  %10076 = vmatmul.mubr.msk.bf16.vlgmr.msra.gmra.mrb[28].mxu1 %vm4768_vm1, %v12392_v12 }
 0x117   : > { %5784 = vmatpush1.bf16.msra.mxu0 %v10749_v10  ;;  %5825 = vmatpush1.bf16.msra.mxu1 %v10752_v11  ;;  %v10804_v10 = vld [vmem:[%s12160_s30 + $0x7f8] ss:$472 sps:$4 sm:$0xff]   ;;  %v10809_v11 = vld [vmem:[%s12160_s30 + $0xba4] ss:$472 sps:$4 sm:$0xff]  }
 0x118   : > { %5785 = vmatprep.subr.bf16.mxu0 %v10757_v13  ;;  %5826 = vmatprep.subr.bf16.mxu1 %v10760_v14  ;;  %v10812_v13 = vld [vmem:[%s12160_s30 + $0xbac] ss:$472 sps:$4 sm:$0xff]  }
 0x119   : > { %5815 = vmatprep.mubr.bf16.mxu0 %v12048_v0  ;;  %5856 = vmatprep.mubr.bf16.mxu1 %v12048_v0 }
 0x11b   : > { %5786 = vmatpush1.bf16.msra.mxu0 %v10755_v15  ;;  %5827 = vmatpush1.bf16.msra.mxu1 %v10758_v16  ;;  %v10807_v15 = vld [vmem:[%s12160_s30 + $0xba0] ss:$472 sps:$4 sm:$0xff]  }
 0x11c   : > { %5787 = vmatprep.subr.bf16.mxu0 %v10763_v17  ;;  %5828 = vmatprep.subr.bf16.mxu1 %v10766_v18  ;;  %v10810_v16 = vld [vmem:[%s12160_s30 + $0xba8] ss:$472 sps:$4 sm:$0xff]   ;;  %v10815_v17 = vld [vmem:[%s12160_s30 + $0xf54] ss:$472 sps:$4 sm:$0xff]  }
 0x11d   : > { %v10818_v18 = vld [vmem:[%s12160_s30 + $0xf5c] ss:$472 sps:$4 sm:$0xff]  }
 0x11f   : > { %5788 = vmatpush1.bf16.msra.mxu0 %v10761_v19  ;;  %5829 = vmatpush1.bf16.msra.mxu1 %v10764_v20  ;;  %v10813_v19 = vld [vmem:[%s12160_s30 + $0xf50] ss:$472 sps:$4 sm:$0xff]  }
 0x120   : > { %5789 = vmatprep.subr.bf16.mxu0 %v10769_v21  ;;  %5830 = vmatprep.subr.bf16.mxu1 %v10772_v22  ;;  %v10816_v20 = vld [vmem:[%s12160_s30 + $0xf58] ss:$472 sps:$4 sm:$0xff]   ;;  %v10821_v21 = vld [vmem:[%s12160_s30 + $0x1304] ss:$472 sps:$4 sm:$0xff]  }
 0x121   : > { %v10824_v22 = vld [vmem:[%s12160_s30 + $0x130c] ss:$472 sps:$4 sm:$0xff]  }
 0x123   : > { %5790 = vmatpush1.bf16.msra.mxu0 %v10767_v23  ;;  %5831 = vmatpush1.bf16.msra.mxu1 %v10770_v24  ;;  %v892_v23 = vld [vmem:[%s12160_s30 + $0x16b0] sm:$0xff]  ;;  %v893_v24 = vld [vmem:[%s12160_s30 + $0x16b8] sm:$0xff] }
 0x124   : > { %5791 = vmatprep.subr.bf16.mxu0 %v10775_v25  ;;  %5832 = vmatprep.subr.bf16.mxu1 %v10778_v26  ;;  %v9964_v32 = vcombine.high %v892_v23, %v892_v23 }
 0x125   : > { %v5161_v33 = vpop.f32.mrb[0].mxu0  ;;  %v5202_v34 = vpop.f32.mrb[0].mxu1 }
 0x126   : > { %11609 = vtanh.f32 %v5161_v33  ;;  %v5163_v36 = vpop.f32.mrb[1].mxu0  ;;  %v5204_v37 = vpop.f32.mrb[1].mxu1 }
 0x127   : > { %11611 = vtanh.f32 %v5202_v34  ;;  %v5165_v38 = vpop.f32.mrb[2].mxu0  ;;  %5792 = vmatpush1.bf16.msra.mxu0 %v10773_v27  ;;  %5833 = vmatpush1.bf16.msra.mxu1 %v10776_v28  ;;  %v5206_v42 = vpop.f32.mrb[2].mxu1 }
 0x128   : > { %11613 = vtanh.f32 %v5163_v36  ;;  %v5166_v43 = vpop.f32.mrb[3].mxu0  ;;  %5793 = vmatprep.subr.bf16.mxu0 %v10781_v29  ;;  %5834 = vmatprep.subr.bf16.mxu1 %v10784_v30  ;;  %v5207_v47 = vpop.f32.mrb[3].mxu1  ;;  %v10819_v30 = vld [vmem:[%s12160_s30 + $0x1300] ss:$472 sps:$4 sm:$0xff]   ;;  %v9966_v36 = vcombine.high %v893_v24, %v893_v24  ;;  %v9965_v38 = vcombine.low %v893_v24, %v893_v24 }
 0x129   : > { %11615 = vtanh.f32 %v5204_v37  ;;  %v9963_v37 = vcombine.low %v892_v23, %v892_v23  ;;  %v10840_v47 = vld [vmem:[%s12160_s30 + $0x45c] ss:$472 sps:$4 sm:$0xff]  }
 0x12a   : > { %v4888_v43 = vsel %vm4772_vm0, %v9965_v38, 0  ;;  %v10880_v38 = vld [vmem:[%s12160_s30 + $0x46c] ss:$472 sps:$4 sm:$0xff]  }
 0x12b   : > { %5794 = vmatpush1.bf16.msra.mxu0 %v10779_v39  ;;  %5835 = vmatpush1.bf16.msra.mxu1 %v10782_v40  ;;  %v10831_v40 = vld [vmem:[%s12160_s30 + $0xa4] ss:$472 sps:$4 sm:$0xff]   ;;  %v4882_v42 = vsel %vm4772_vm0, %v9963_v37, 0 }
 0x12c   : > { %10077 = vmatprep.subr.msk.bf16.mxu0 %vm4772_vm0, %v9960_v41  ;;  %10079 = vmatprep.subr.msk.bf16.mxu1 %vm4772_vm0, %v9962_v44  ;;  %v10834_v41 = vld [vmem:[%s12160_s30 + $0xac] ss:$472 sps:$4 sm:$0xff]   ;;  %v10829_v44 = vld [vmem:[%s12160_s30 + $0xa0] ss:$472 sps:$4 sm:$0xff]  }
 0x12d   : > { %v10877_v37 = vld [vmem:[%s12160_s30 + $0x464] ss:$472 sps:$4 sm:$0xff]  }
 0x12f   : > { %5796 = vmatpush1.bf16.msra.mxu0 %v4870_v51  ;;  %5837 = vmatpush1.bf16.msra.mxu1 %v4876_v52  ;;  %v10835_v51 = vld [vmem:[%s12160_s30 + $0x450] ss:$472 sps:$4 sm:$0xff]  }
 0x130   : > { %v11610_v60 = vpop.eup %11609  ;;  %5865 = vmatprep.subr.bf16.mxu0 %v10791_v50  ;;  %5906 = vmatprep.subr.bf16.mxu1 %v10794_v53  ;;  %v12551_v50 = vld [vmem:[%s13882_s0] sm:$0x1]  ;;  %v10838_v52 = vld [vmem:[%s12160_s30 + $0x458] ss:$472 sps:$4 sm:$0xff]  }
 0x131   : > { %v11612_v61 = vpop.eup %11611 }
 0x132   : > { %v11614_v63 = vpop.eup %11613  ;;  %10078 = vmatmul.mubr.msk.bf16.vlgmr.msra.gmra.mrb[32].mxu0 %vm4768_vm1, %v12392_v12  ;;  %10080 = vmatmul.mubr.msk.bf16.vlgmr.msra.gmra.mrb[32].mxu1 %vm4768_vm1, %v12392_v12 }
 0x133   : > { %v11616_v3 = vpop.eup %11615  ;;  %v10163_v4 = vpack.c.bf16 %v11614_v63, %v11610_v60  ;;  %5866 = vmatpush1.bf16.msra.mxu0 %v10789_v56  ;;  %5907 = vmatpush1.bf16.msra.mxu1 %v10792_v57  ;;  %v10846_v56 = vld [vmem:[%s12160_s30 + $0x80c] ss:$472 sps:$4 sm:$0xff]   ;;  %v10841_v60 = vld [vmem:[%s12160_s30 + $0x800] ss:$472 sps:$4 sm:$0xff]  }
 0x134   : > { %v10164_v7 = vpack.c.bf16 %v11616_v3, %v11612_v61  ;;  %5867 = vmatprep.subr.bf16.mxu0 %v10797_v58  ;;  %5908 = vmatprep.subr.bf16.mxu1 %v10800_v59  ;;  %v10844_v61 = vld [vmem:[%s12160_s30 + $0x808] ss:$472 sps:$4 sm:$0xff]   ;;  %v10849_v63 = vld [vmem:[%s12160_s30 + $0xbb4] ss:$472 sps:$4 sm:$0xff]  }
 0x135   : > { %v12513_v12 = vrot.slane %v10163_v4, %v12502_v62  ;;  %5897 = vmatprep.mubr.bf16.mxu0 %v12048_v0  ;;  %5938 = vmatprep.mubr.bf16.mxu1 %v12048_v0  ;;  %v10847_v3 = vld [vmem:[%s12160_s30 + $0xbb0] ss:$472 sps:$4 sm:$0xff]  }
 0x136   : > { %v12518_v8 = vrot.slane %v10164_v7, %v12502_v62  ;;  %v10850_v4 = vld [vmem:[%s12160_s30 + $0xbb8] ss:$472 sps:$4 sm:$0xff]   ;;  %v10855_v7 = vld [vmem:[%s12160_s30 + $0xf64] ss:$472 sps:$4 sm:$0xff]  }
 0x137   : > { %5868 = vmatpush1.bf16.msra.mxu0 %v10795_v1  ;;  %5909 = vmatpush1.bf16.msra.mxu1 %v10798_v2  ;;  %v10852_v1 = vld [vmem:[%s12160_s30 + $0xbbc] ss:$472 sps:$4 sm:$0xff]  }
 0x138   : > { %v7932_v14 = vcombine.low %v12513_v12, %v12518_v8  ;;  %5869 = vmatprep.subr.bf16.mxu0 %v10803_v5  ;;  %5910 = vmatprep.subr.bf16.mxu1 %v10806_v6  ;;  %v10864_v12 = vld [vmem:[%s12160_s30 + $0x131c] ss:$472 sps:$4 sm:$0xff]   ;;  %v894_v8 = vld [vmem:[%s12160_s30 + $0x16c0] sm:$0xff] }
 0x139   : > { %v9968_v23 = vcombine.high %v894_v8, %v894_v8 }
 0x13a   : > { %v7940_v5 = vrot.slane %v7932_v14, %v12502_v62  ;;  %v895_v14 = vld [vmem:[%s12160_s30 + $0x16c8] sm:$0xff] }
 0x13b   : > { %5870 = vmatpush1.bf16.msra.mxu0 %v10801_v9  ;;  %5911 = vmatpush1.bf16.msra.mxu1 %v10804_v10  ;;  %v10858_v9 = vld [vmem:[%s12160_s30 + $0xf6c] ss:$472 sps:$4 sm:$0xff]  }
 0x13c   : > { %5871 = vmatprep.subr.bf16.mxu0 %v10809_v11  ;;  %5912 = vmatprep.subr.bf16.mxu1 %v10812_v13  ;;  %v10853_v11 = vld [vmem:[%s12160_s30 + $0xf60] ss:$472 sps:$4 sm:$0xff]  }
 0x13d   : > { %v10856_v13 = vld [vmem:[%s12160_s30 + $0xf68] ss:$472 sps:$4 sm:$0xff]  }
 0x13f   : > { %5872 = vmatpush1.bf16.msra.mxu0 %v10807_v15  ;;  %5913 = vmatpush1.bf16.msra.mxu1 %v10810_v16  ;;  %v10861_v15 = vld [vmem:[%s12160_s30 + $0x1314] ss:$472 sps:$4 sm:$0xff]  }
 0x140   : > { %5873 = vmatprep.subr.bf16.mxu0 %v10815_v17  ;;  %5914 = vmatprep.subr.bf16.mxu1 %v10818_v18 }
 0x141   : > { %v5243_v25 = vpop.f32.mrb[4].mxu0  ;;  %v5284_v26 = vpop.f32.mrb[4].mxu1 }
 0x142   : > { %11617 = vtanh.f32 %v5243_v25  ;;  %v5245_v27 = vpop.f32.mrb[5].mxu0  ;;  %v5286_v28 = vpop.f32.mrb[5].mxu1 }
 0x143   : > { %11619 = vtanh.f32 %v5284_v26  ;;  %v5247_v29 = vpop.f32.mrb[6].mxu0  ;;  %5874 = vmatpush1.bf16.msra.mxu0 %v10813_v19  ;;  %5915 = vmatpush1.bf16.msra.mxu1 %v10816_v20  ;;  %v5288_v33 = vpop.f32.mrb[6].mxu1  ;;  %v9970_v26 = vcombine.high %v895_v14, %v895_v14 }
 0x144   : > { %11621 = vtanh.f32 %v5245_v27  ;;  %v5248_v34 = vpop.f32.mrb[7].mxu0  ;;  %5875 = vmatprep.subr.bf16.mxu0 %v10821_v21  ;;  %5916 = vmatprep.subr.bf16.mxu1 %v10824_v22  ;;  %v5289_v39 = vpop.f32.mrb[7].mxu1  ;;  %v10859_v21 = vld [vmem:[%s12160_s30 + $0x1310] ss:$472 sps:$4 sm:$0xff]   ;;  %v9967_v27 = vcombine.low %v894_v8, %v894_v8  ;;  %v10874_v33 = vld [vmem:[%s12160_s30 + $0xbc] ss:$472 sps:$4 sm:$0xff]  }
 0x145   : > { %11623 = vtanh.f32 %v5286_v28  ;;  %v10862_v22 = vld [vmem:[%s12160_s30 + $0x1318] ss:$472 sps:$4 sm:$0xff]   ;;  %v9969_v28 = vcombine.low %v895_v14, %v895_v14 }
 0x146   : > { %v10869_v34 = vld [vmem:[%s12160_s30 + $0xb0] ss:$472 sps:$4 sm:$0xff]  }
 0x147   : > { %5876 = vmatpush1.bf16.msra.mxu0 %v10819_v30  ;;  %5917 = vmatpush1.bf16.msra.mxu1 %v10822_v31  ;;  %v10871_v30 = vld [vmem:[%s12160_s30 + $0xb4] ss:$472 sps:$4 sm:$0xff]   ;;  %v4894_v31 = vsel %vm4772_vm0, %v9967_v27, 0 }
 0x148   : > { %10081 = vmatprep.subr.msk.bf16.mxu0 %vm4772_vm0, %v9964_v32  ;;  %10083 = vmatprep.subr.msk.bf16.mxu1 %vm4772_vm0, %v9966_v36  ;;  %v4900_v32 = vsel %vm4772_vm0, %v9969_v28, 0  ;;  %v10872_v36 = vld [vmem:[%s12160_s30 + $0xb8] ss:$472 sps:$4 sm:$0xff]  }
 0x14b   : > { %5878 = vmatpush1.bf16.msra.mxu0 %v4882_v42  ;;  %5919 = vmatpush1.bf16.msra.mxu1 %v4888_v43  ;;  %v10875_v42 = vld [vmem:[%s12160_s30 + $0x460] ss:$472 sps:$4 sm:$0xff]  }
 0x14c   : > { %v11618_v48 = vpop.eup %11617  ;;  %5947 = vmatprep.subr.bf16.mxu0 %v10831_v40  ;;  %5988 = vmatprep.subr.bf16.mxu1 %v10834_v41  ;;  %v10878_v43 = vld [vmem:[%s12160_s30 + $0x468] ss:$472 sps:$4 sm:$0xff]  }
 0x14d   : > { %v11620_v35 = vpop.eup %11619 }
 0x14e   : > { %v11622_v49 = vpop.eup %11621  ;;  %10082 = vmatmul.mubr.msk.bf16.vlgmr.msra.gmra.mrb[36].mxu0 %vm4768_vm1, %v12551_v50  ;;  %10084 = vmatmul.mubr.msk.bf16.vlgmr.msra.gmra.mrb[36].mxu1 %vm4768_vm1, %v12551_v50 }
 0x14f   : > { %v11624_v53 = vpop.eup %11623  ;;  %v10165_v54 = vpack.c.bf16 %v11622_v49, %v11618_v48  ;;  %5948 = vmatpush1.bf16.msra.mxu0 %v10829_v44  ;;  %5989 = vmatpush1.bf16.msra.mxu1 %v10832_v45 }
 0x150   : > { %v10166_v57 = vpack.c.bf16 %v11624_v53, %v11620_v35  ;;  %5949 = vmatprep.subr.bf16.mxu0 %v10837_v46  ;;  %5990 = vmatprep.subr.bf16.mxu1 %v10840_v47  ;;  %v10883_v46 = vld [vmem:[%s12160_s30 + $0x814] ss:$472 sps:$4 sm:$0xff]   ;;  %v10889_v53 = vld [vmem:[%s12160_s30 + $0xbc4] ss:$472 sps:$4 sm:$0xff]  }
 0x151   : > { %v7924_v58 = vrot.slane %v10165_v54, %v12502_v62  ;;  %5979 = vmatprep.mubr.bf16.mxu0 %v12048_v0  ;;  %6020 = vmatprep.mubr.bf16.mxu1 %v12048_v0  ;;  %v10886_v47 = vld [vmem:[%s12160_s30 + $0x81c] ss:$472 sps:$4 sm:$0xff]   ;;  %v10892_v54 = vld [vmem:[%s12160_s30 + $0xbcc] ss:$472 sps:$4 sm:$0xff]  }
 0x152   : > { %v7931_v59 = vrot.slane %v10166_v57, %v12502_v62  ;;  %v10890_v57 = vld [vmem:[%s12160_s30 + $0xbc8] ss:$472 sps:$4 sm:$0xff]  }
 0x153   : > { %5950 = vmatpush1.bf16.msra.mxu0 %v10835_v51  ;;  %5991 = vmatpush1.bf16.msra.mxu1 %v10838_v52  ;;  %v10881_v51 = vld [vmem:[%s12160_s30 + $0x810] ss:$472 sps:$4 sm:$0xff]  }
 0x154   : > { %v7933_v2 = vcombine.low %v7924_v58, %v7931_v59  ;;  %5951 = vmatprep.subr.bf16.mxu0 %v10843_v55  ;;  %5992 = vmatprep.subr.bf16.mxu1 %v10846_v56  ;;  %v10884_v52 = vld [vmem:[%s12160_s30 + $0x818] ss:$472 sps:$4 sm:$0xff]   ;;  %v10895_v58 = vld [vmem:[%s12160_s30 + $0xf74] ss:$472 sps:$4 sm:$0xff]  }
 0x155   : > { %v10887_v56 = vld [vmem:[%s12160_s30 + $0xbc0] ss:$472 sps:$4 sm:$0xff]   ;;  %v10898_v59 = vld [vmem:[%s12160_s30 + $0xf7c] ss:$472 sps:$4 sm:$0xff]  }
 0x156   : > { %v7947_v6 = vrot.slane %v7933_v2, %v12502_v62  ;;  %v896_v2 = vld [vmem:[%s12160_s30 + $0x16d0] sm:$0xff] }
 0x157   : > { %5952 = vmatpush1.bf16.msra.mxu0 %v10841_v60  ;;  %5993 = vmatpush1.bf16.msra.mxu1 %v10844_v61  ;;  %v10893_v60 = vld [vmem:[%s12160_s30 + $0xf70] ss:$472 sps:$4 sm:$0xff]   ;;  %v9971_v14 = vcombine.low %v896_v2, %v896_v2 }
 0x158   : > { %v7948_v10 = vcombine.low %v7940_v5, %v7947_v6  ;;  %5953 = vmatprep.subr.bf16.mxu0 %v10849_v63  ;;  %5994 = vmatprep.subr.bf16.mxu1 %v10852_v1  ;;  %v10896_v61 = vld [vmem:[%s12160_s30 + $0xf78] ss:$472 sps:$4 sm:$0xff]   ;;  %v10901_v63 = vld [vmem:[%s12160_s30 + $0x1324] ss:$472 sps:$4 sm:$0xff]  }
 0x159   : > { %v10904_v1 = vld [vmem:[%s12160_s30 + $0x132c] ss:$472 sps:$4 sm:$0xff]  }
 0x15a   : > { %8641 = vst [vmem:[%s12581_s4] sm:$0xff] %v7948_v10  ;;  %v10899_v10 = vld [vmem:[%s12160_s30 + $0x1320] ss:$472 sps:$4 sm:$0xff]  }
 0x15b   : > { %5954 = vmatpush1.bf16.msra.mxu0 %v10847_v3  ;;  %5995 = vmatpush1.bf16.msra.mxu1 %v10850_v4  ;;  %v897_v3 = vld [vmem:[%s12160_s30 + $0x16d8] sm:$0xff] }
 0x15c   : > { %5955 = vmatprep.subr.bf16.mxu0 %v10855_v7  ;;  %5996 = vmatprep.subr.bf16.mxu1 %v10858_v9  ;;  %v9974_v8 = vcombine.high %v897_v3, %v897_v3 }
 0x15d   : > { %v5325_v16 = vpop.f32.mrb[8].mxu0  ;;  %v5366_v17 = vpop.f32.mrb[8].mxu1 }
 0x15e   : > { %11625 = vtanh.f32 %v5325_v16  ;;  %v5327_v18 = vpop.f32.mrb[9].mxu0  ;;  %v5368_v19 = vpop.f32.mrb[9].mxu1  ;;  %v9973_v16 = vcombine.low %v897_v3, %v897_v3 }
 0x15f   : > { %11627 = vtanh.f32 %v5366_v17  ;;  %v5329_v20 = vpop.f32.mrb[10].mxu0  ;;  %5956 = vmatpush1.bf16.msra.mxu0 %v10853_v11  ;;  %5997 = vmatpush1.bf16.msra.mxu1 %v10856_v13  ;;  %v5370_v24 = vpop.f32.mrb[10].mxu1  ;;  %v10902_v11 = vld [vmem:[%s12160_s30 + $0x1328] ss:$472 sps:$4 sm:$0xff]   ;;  %v9972_v13 = vcombine.high %v896_v2, %v896_v2 }
 0x160   : > { %11629 = vtanh.f32 %v5327_v18  ;;  %v5330_v25 = vpop.f32.mrb[11].mxu0  ;;  %5957 = vmatprep.subr.bf16.mxu0 %v10861_v15  ;;  %5998 = vmatprep.subr.bf16.mxu1 %v10864_v12  ;;  %v5371_v29 = vpop.f32.mrb[11].mxu1  ;;  %v10911_v18 = vld [vmem:[%s12160_s30 + $0xc4] ss:$472 sps:$4 sm:$0xff]   ;;  %v4906_v20 = vsel %vm4772_vm0, %v9971_v14, 0 }
 0x161   : > { %11631 = vtanh.f32 %v5368_v19  ;;  %v10914_v19 = vld [vmem:[%s12160_s30 + $0xcc] ss:$472 sps:$4 sm:$0xff]   ;;  %v10920_v25 = vld [vmem:[%s12160_s30 + $0x47c] ss:$472 sps:$4 sm:$0xff]   ;;  %v10915_v29 = vld [vmem:[%s12160_s30 + $0x470] ss:$472 sps:$4 sm:$0xff]  }
 0x162   : > { %v10917_v24 = vld [vmem:[%s12160_s30 + $0x474] ss:$472 sps:$4 sm:$0xff]   ;;  %v10957_v14 = vld [vmem:[%s12160_s30 + $0x484] ss:$472 sps:$4 sm:$0xff]  }
 0x163   : > { %5958 = vmatpush1.bf16.msra.mxu0 %v10859_v21  ;;  %5999 = vmatpush1.bf16.msra.mxu1 %v10862_v22  ;;  %v4912_v21 = vsel %vm4772_vm0, %v9973_v16, 0  ;;  %v10909_v22 = vld [vmem:[%s12160_s30 + $0xc0] ss:$472 sps:$4 sm:$0xff]   ;;  %v10960_v16 = vld [vmem:[%s12160_s30 + $0x48c] ss:$472 sps:$4 sm:$0xff]  }
 0x164   : > { %10085 = vmatprep.subr.msk.bf16.mxu0 %vm4772_vm0, %v9968_v23  ;;  %10087 = vmatprep.subr.msk.bf16.mxu1 %vm4772_vm0, %v9970_v26  ;;  %v10912_v23 = vld [vmem:[%s12160_s30 + $0xc8] ss:$472 sps:$4 sm:$0xff]  }
 0x167   : > { %5960 = vmatpush1.bf16.msra.mxu0 %v4894_v31  ;;  %6001 = vmatpush1.bf16.msra.mxu1 %v4900_v32 }
 0x168   : > { %v11626_v39 = vpop.eup %11625  ;;  %6029 = vmatprep.subr.bf16.mxu0 %v10871_v30  ;;  %6070 = vmatprep.subr.bf16.mxu1 %v10874_v33  ;;  %v10918_v30 = vld [vmem:[%s12160_s30 + $0x478] ss:$472 sps:$4 sm:$0xff]   ;;  %v10923_v33 = vld [vmem:[%s12160_s30 + $0x824] ss:$472 sps:$4 sm:$0xff]  }
 0x169   : > { %v11628_v40 = vpop.eup %11627 }
 0x16a   : > { %v11630_v41 = vpop.eup %11629  ;;  %10086 = vmatmul.mubr.msk.bf16.vlgmr.msra.gmra.mrb[40].mxu0 %vm4768_vm1, %v12551_v50  ;;  %10088 = vmatmul.mubr.msk.bf16.vlgmr.msra.gmra.mrb[40].mxu1 %vm4768_vm1, %v12551_v50 }
 0x16b   : > { %v11632_v44 = vpop.eup %11631  ;;  %v10167_v45 = vpack.c.bf16 %v11630_v41, %v11626_v39  ;;  %6030 = vmatpush1.bf16.msra.mxu0 %v10869_v34  ;;  %6071 = vmatpush1.bf16.msra.mxu1 %v10872_v36  ;;  %v10926_v34 = vld [vmem:[%s12160_s30 + $0x82c] ss:$472 sps:$4 sm:$0xff]   ;;  %v10921_v39 = vld [vmem:[%s12160_s30 + $0x820] ss:$472 sps:$4 sm:$0xff]  }
 0x16c   : > { %v10168_v48 = vpack.c.bf16 %v11632_v44, %v11628_v40  ;;  %6031 = vmatprep.subr.bf16.mxu0 %v10877_v37  ;;  %6072 = vmatprep.subr.bf16.mxu1 %v10880_v38  ;;  %v10924_v40 = vld [vmem:[%s12160_s30 + $0x828] ss:$472 sps:$4 sm:$0xff]   ;;  %v10929_v41 = vld [vmem:[%s12160_s30 + $0xbd4] ss:$472 sps:$4 sm:$0xff]  }
 0x16d   : > { %v12609_v35 = vrot.slane %v10167_v45, %v12502_v62  ;;  %6061 = vmatprep.mubr.bf16.mxu0 %v12048_v0  ;;  %6102 = vmatprep.mubr.bf16.mxu1 %v12048_v0  ;;  %v10927_v44 = vld [vmem:[%s12160_s30 + $0xbd0] ss:$472 sps:$4 sm:$0xff]  }
 0x16e   : > { %v12614_v49 = vrot.slane %v10168_v48, %v12502_v62  ;;  %v10930_v45 = vld [vmem:[%s12160_s30 + $0xbd8] ss:$472 sps:$4 sm:$0xff]   ;;  %v10935_v48 = vld [vmem:[%s12160_s30 + $0xf84] ss:$472 sps:$4 sm:$0xff]  }
 0x16f   : > { %6032 = vmatpush1.bf16.msra.mxu0 %v10875_v42  ;;  %6073 = vmatpush1.bf16.msra.mxu1 %v10878_v43  ;;  %v10932_v42 = vld [vmem:[%s12160_s30 + $0xbdc] ss:$472 sps:$4 sm:$0xff]  }
 0x170   : > { %v7981_v55 = vcombine.low %v12609_v35, %v12614_v49  ;;  %6033 = vmatprep.subr.bf16.mxu0 %v10883_v46  ;;  %6074 = vmatprep.subr.bf16.mxu1 %v10886_v47  ;;  %v898_v35 = vld [vmem:[%s12160_s30 + $0x16e0] sm:$0xff]  ;;  %v899_v49 = vld [vmem:[%s12160_s30 + $0x16e8] sm:$0xff] }
 0x171   : > { %v9975_v2 = vcombine.low %v898_v35, %v898_v35 }
 0x172   : > { %v7989_v46 = vrot.slane %v7981_v55, %v12502_v62 }
 0x173   : > { %6034 = vmatpush1.bf16.msra.mxu0 %v10881_v51  ;;  %6075 = vmatpush1.bf16.msra.mxu1 %v10884_v52  ;;  %v10938_v51 = vld [vmem:[%s12160_s30 + $0xf8c] ss:$472 sps:$4 sm:$0xff]  }
 0x174   : > { %6035 = vmatprep.subr.bf16.mxu0 %v10889_v53  ;;  %6076 = vmatprep.subr.bf16.mxu1 %v10892_v54  ;;  %v10933_v53 = vld [vmem:[%s12160_s30 + $0xf80] ss:$472 sps:$4 sm:$0xff]  }
 0x175   : > { %v10936_v54 = vld [vmem:[%s12160_s30 + $0xf88] ss:$472 sps:$4 sm:$0xff]  }
 0x177   : > { %6036 = vmatpush1.bf16.msra.mxu0 %v10887_v56  ;;  %6077 = vmatpush1.bf16.msra.mxu1 %v10890_v57  ;;  %v10941_v56 = vld [vmem:[%s12160_s30 + $0x1334] ss:$472 sps:$4 sm:$0xff]  }
 0x178   : > { %6037 = vmatprep.subr.bf16.mxu0 %v10895_v58  ;;  %6078 = vmatprep.subr.bf16.mxu1 %v10898_v59  ;;  %v10944_v57 = vld [vmem:[%s12160_s30 + $0x133c] ss:$472 sps:$4 sm:$0xff]  }
 0x179   : > { %v5407_v4 = vpop.f32.mrb[12].mxu0  ;;  %v5448_v5 = vpop.f32.mrb[12].mxu1 }
 0x17a   : > { %11633 = vtanh.f32 %v5407_v4  ;;  %v5409_v6 = vpop.f32.mrb[13].mxu0  ;;  %v5450_v7 = vpop.f32.mrb[13].mxu1 }
 0x17b   : > { %11635 = vtanh.f32 %v5448_v5  ;;  %v5411_v9 = vpop.f32.mrb[14].mxu0  ;;  %6038 = vmatpush1.bf16.msra.mxu0 %v10893_v60  ;;  %6079 = vmatpush1.bf16.msra.mxu1 %v10896_v61  ;;  %v5452_v15 = vpop.f32.mrb[14].mxu1  ;;  %v9976_v5 = vcombine.high %v898_v35, %v898_v35 }
 0x17c   : > { %11637 = vtanh.f32 %v5409_v6  ;;  %v5412_v12 = vpop.f32.mrb[15].mxu0  ;;  %6039 = vmatprep.subr.bf16.mxu0 %v10901_v63  ;;  %6080 = vmatprep.subr.bf16.mxu1 %v10904_v1  ;;  %v5453_v17 = vpop.f32.mrb[15].mxu1  ;;  %v10939_v63 = vld [vmem:[%s12160_s30 + $0x1330] ss:$472 sps:$4 sm:$0xff]   ;;  %v9978_v6 = vcombine.high %v899_v49, %v899_v49  ;;  %v10954_v15 = vld [vmem:[%s12160_s30 + $0xdc] ss:$472 sps:$4 sm:$0xff]  }
 0x17d   : > { %11639 = vtanh.f32 %v5450_v7  ;;  %v10942_v1 = vld [vmem:[%s12160_s30 + $0x1338] ss:$472 sps:$4 sm:$0xff]   ;;  %v9977_v7 = vcombine.low %v899_v49, %v899_v49 }
 0x17e   : > { %v10949_v12 = vld [vmem:[%s12160_s30 + $0xd0] ss:$472 sps:$4 sm:$0xff]  }
 0x17f   : > { %6040 = vmatpush1.bf16.msra.mxu0 %v10899_v10  ;;  %6081 = vmatpush1.bf16.msra.mxu1 %v10902_v11  ;;  %v4918_v10 = vsel %vm4772_vm0, %v9975_v2, 0  ;;  %v4924_v11 = vsel %vm4772_vm0, %v9977_v7, 0  ;;  %v10997_v2 = vld [vmem:[%s12160_s30 + $0x494] ss:$472 sps:$4 sm:$0xff]   ;;  %v12735_v7 = vld [vmem:[%s13882_s0] sm:$0x1] }
 0x180   : > { %10089 = vmatprep.subr.msk.bf16.mxu0 %vm4772_vm0, %v9972_v13  ;;  %10091 = vmatprep.subr.msk.bf16.mxu1 %vm4772_vm0, %v9974_v8  ;;  %v10951_v13 = vld [vmem:[%s12160_s30 + $0xd4] ss:$472 sps:$4 sm:$0xff]   ;;  %v10952_v8 = vld [vmem:[%s12160_s30 + $0xd8] ss:$472 sps:$4 sm:$0xff]  }
 0x183   : > { %6042 = vmatpush1.bf16.msra.mxu0 %v4906_v20  ;;  %6083 = vmatpush1.bf16.msra.mxu1 %v4912_v21  ;;  %v10955_v20 = vld [vmem:[%s12160_s30 + $0x480] ss:$472 sps:$4 sm:$0xff]  }
 0x184   : > { %v11634_v26 = vpop.eup %11633  ;;  %6111 = vmatprep.subr.bf16.mxu0 %v10911_v18  ;;  %6152 = vmatprep.subr.bf16.mxu1 %v10914_v19  ;;  %v10958_v21 = vld [vmem:[%s12160_s30 + $0x488] ss:$472 sps:$4 sm:$0xff]  }
 0x185   : > { %v11636_v27 = vpop.eup %11635 }
 0x186   : > { %v11638_v28 = vpop.eup %11637  ;;  %10090 = vmatmul.mubr.msk.bf16.vlgmr.msra.gmra.mrb[44].mxu0 %vm4768_vm1, %v12551_v50  ;;  %10092 = vmatmul.mubr.msk.bf16.vlgmr.msra.gmra.mrb[44].mxu1 %vm4768_vm1, %v12551_v50 }
 0x187   : > { %v11640_v31 = vpop.eup %11639  ;;  %v10169_v32 = vpack.c.bf16 %v11638_v28, %v11634_v26  ;;  %6112 = vmatpush1.bf16.msra.mxu0 %v10909_v22  ;;  %6153 = vmatpush1.bf16.msra.mxu1 %v10912_v23  ;;  %v10961_v28 = vld [vmem:[%s12160_s30 + $0x830] ss:$472 sps:$4 sm:$0xff]  }
 0x188   : > { %v10170_v36 = vpack.c.bf16 %v11640_v31, %v11636_v27  ;;  %6113 = vmatprep.subr.bf16.mxu0 %v10917_v24  ;;  %6154 = vmatprep.subr.bf16.mxu1 %v10920_v25  ;;  %v10963_v24 = vld [vmem:[%s12160_s30 + $0x834] ss:$472 sps:$4 sm:$0xff]  }
 0x189   : > { %v7973_v37 = vrot.slane %v10169_v32, %v12502_v62  ;;  %6143 = vmatprep.mubr.bf16.mxu0 %v12048_v0  ;;  %6184 = vmatprep.mubr.bf16.mxu1 %v12048_v0  ;;  %v10966_v25 = vld [vmem:[%s12160_s30 + $0x83c] ss:$472 sps:$4 sm:$0xff]   ;;  %v10972_v31 = vld [vmem:[%s12160_s30 + $0xbec] ss:$472 sps:$4 sm:$0xff]  }
 0x18a   : > { %v7980_v38 = vrot.slane %v10170_v36, %v12502_v62  ;;  %v10975_v36 = vld [vmem:[%s12160_s30 + $0xf94] ss:$472 sps:$4 sm:$0xff]  }
 0x18b   : > { %6114 = vmatpush1.bf16.msra.mxu0 %v10915_v29  ;;  %6155 = vmatpush1.bf16.msra.mxu1 %v10918_v30  ;;  %v10964_v29 = vld [vmem:[%s12160_s30 + $0x838] ss:$472 sps:$4 sm:$0xff]   ;;  %v10969_v30 = vld [vmem:[%s12160_s30 + $0xbe4] ss:$472 sps:$4 sm:$0xff]  }
 0x18c   : > { %v7982_v43 = vcombine.low %v7973_v37, %v7980_v38  ;;  %6115 = vmatprep.subr.bf16.mxu0 %v10923_v33  ;;  %6156 = vmatprep.subr.bf16.mxu1 %v10926_v34  ;;  %v10967_v33 = vld [vmem:[%s12160_s30 + $0xbe0] ss:$472 sps:$4 sm:$0xff]   ;;  %v10978_v37 = vld [vmem:[%s12160_s30 + $0xf9c] ss:$472 sps:$4 sm:$0xff]   ;;  %v10973_v38 = vld [vmem:[%s12160_s30 + $0xf90] ss:$472 sps:$4 sm:$0xff]  }
 0x18d   : > { %v10970_v34 = vld [vmem:[%s12160_s30 + $0xbe8] ss:$472 sps:$4 sm:$0xff]  }
 0x18e   : > { %v7996_v47 = vrot.slane %v7982_v43, %v12502_v62  ;;  %v901_v43 = vld [vmem:[%s12160_s30 + $0x16f8] sm:$0xff] }
 0x18f   : > { %6116 = vmatpush1.bf16.msra.mxu0 %v10921_v39  ;;  %6157 = vmatpush1.bf16.msra.mxu1 %v10924_v40  ;;  %v10976_v39 = vld [vmem:[%s12160_s30 + $0xf98] ss:$472 sps:$4 sm:$0xff]   ;;  %v10981_v40 = vld [vmem:[%s12160_s30 + $0x1344] ss:$472 sps:$4 sm:$0xff]   ;;  %v9981_v49 = vcombine.low %v901_v43, %v901_v43 }
 0x190   : > { %v7997_v52 = vcombine.low %v7989_v46, %v7996_v47  ;;  %6117 = vmatprep.subr.bf16.mxu0 %v10929_v41  ;;  %6158 = vmatprep.subr.bf16.mxu1 %v10932_v42  ;;  %v10984_v41 = vld [vmem:[%s12160_s30 + $0x134c] ss:$472 sps:$4 sm:$0xff]   ;;  %v900_v42 = vld [vmem:[%s12160_s30 + $0x16f0] sm:$0xff] }
 0x191   : > { %v9979_v35 = vcombine.low %v900_v42, %v900_v42 }
 0x192   : > { %8642 = vst [vmem:[%s12581_s4 + $0x8] sm:$0xff] %v7997_v52  ;;  %v10982_v52 = vld [vmem:[%s12160_s30 + $0x1348] ss:$472 sps:$4 sm:$0xff]  }
 0x193   : > { %6118 = vmatpush1.bf16.msra.mxu0 %v10927_v44  ;;  %6159 = vmatpush1.bf16.msra.mxu1 %v10930_v45 }
 0x194   : > { %6119 = vmatprep.subr.bf16.mxu0 %v10935_v48  ;;  %6160 = vmatprep.subr.bf16.mxu1 %v10938_v51  ;;  %v10979_v51 = vld [vmem:[%s12160_s30 + $0x1340] ss:$472 sps:$4 sm:$0xff]  }
 0x195   : > { %v5489_v55 = vpop.f32.mrb[16].mxu0  ;;  %v5530_v58 = vpop.f32.mrb[16].mxu1 }
 0x196   : > { %11641 = vtanh.f32 %v5489_v55  ;;  %v5491_v59 = vpop.f32.mrb[17].mxu0  ;;  %v5532_v60 = vpop.f32.mrb[17].mxu1 }
 0x197   : > { %11643 = vtanh.f32 %v5530_v58  ;;  %v5493_v61 = vpop.f32.mrb[18].mxu0  ;;  %6120 = vmatpush1.bf16.msra.mxu0 %v10933_v53  ;;  %6161 = vmatpush1.bf16.msra.mxu1 %v10936_v54  ;;  %v5534_v3 = vpop.f32.mrb[18].mxu1  ;;  %v9980_v53 = vcombine.high %v900_v42, %v900_v42  ;;  %v10991_v58 = vld [vmem:[%s12160_s30 + $0xe4] ss:$472 sps:$4 sm:$0xff]  }
 0x198   : > { %11645 = vtanh.f32 %v5491_v59  ;;  %v5494_v4 = vpop.f32.mrb[19].mxu0  ;;  %6121 = vmatprep.subr.bf16.mxu0 %v10941_v56  ;;  %6162 = vmatprep.subr.bf16.mxu1 %v10944_v57  ;;  %v5535_v9 = vpop.f32.mrb[19].mxu1  ;;  %v9982_v57 = vcombine.high %v901_v43, %v901_v43  ;;  %v10994_v59 = vld [vmem:[%s12160_s30 + $0xec] ss:$472 sps:$4 sm:$0xff]   ;;  %v4936_v61 = vsel %vm4772_vm0, %v9981_v49, 0 }
 0x199   : > { %11647 = vtanh.f32 %v5532_v60  ;;  %v4930_v60 = vsel %vm4772_vm0, %v9979_v35, 0  ;;  %v11000_v3 = vld [vmem:[%s12160_s30 + $0x49c] ss:$472 sps:$4 sm:$0xff]   ;;  %v10995_v9 = vld [vmem:[%s12160_s30 + $0x490] ss:$472 sps:$4 sm:$0xff]  }
 0x19a   : > { %v11037_v49 = vld [vmem:[%s12160_s30 + $0x4a4] ss:$472 sps:$4 sm:$0xff]  }
 0x19b   : > { %6122 = vmatpush1.bf16.msra.mxu0 %v10939_v63  ;;  %6163 = vmatpush1.bf16.msra.mxu1 %v10942_v1  ;;  %v10989_v63 = vld [vmem:[%s12160_s30 + $0xe0] ss:$472 sps:$4 sm:$0xff]  }
 0x19c   : > { %10093 = vmatprep.subr.msk.bf16.mxu0 %vm4772_vm0, %v9976_v5  ;;  %10095 = vmatprep.subr.msk.bf16.mxu1 %vm4772_vm0, %v9978_v6  ;;  %v10992_v1 = vld [vmem:[%s12160_s30 + $0xe8] ss:$472 sps:$4 sm:$0xff]  }
 0x19f   : > { %6124 = vmatpush1.bf16.msra.mxu0 %v4918_v10  ;;  %6165 = vmatpush1.bf16.msra.mxu1 %v4924_v11  ;;  %v10998_v10 = vld [vmem:[%s12160_s30 + $0x498] ss:$472 sps:$4 sm:$0xff]  }
 0x1a0   : > { %v11642_v17 = vpop.eup %11641  ;;  %6193 = vmatprep.subr.bf16.mxu0 %v10951_v13  ;;  %6234 = vmatprep.subr.bf16.mxu1 %v10954_v15  ;;  %v11003_v15 = vld [vmem:[%s12160_s30 + $0x844] ss:$472 sps:$4 sm:$0xff]  }
 0x1a1   : > { %v11644_v18 = vpop.eup %11643 }
 0x1a2   : > { %v11646_v19 = vpop.eup %11645  ;;  %10094 = vmatmul.mubr.msk.bf16.vlgmr.msra.gmra.mrb[48].mxu0 %vm4768_vm1, %v12551_v50  ;;  %10096 = vmatmul.mubr.msk.bf16.vlgmr.msra.gmra.mrb[48].mxu1 %vm4768_vm1, %v12551_v50 }
 0x1a3   : > { %v11648_v22 = vpop.eup %11647  ;;  %v10171_v23 = vpack.c.bf16 %v11646_v19, %v11642_v17  ;;  %6194 = vmatpush1.bf16.msra.mxu0 %v10949_v12  ;;  %6235 = vmatpush1.bf16.msra.mxu1 %v10952_v8  ;;  %v11006_v12 = vld [vmem:[%s12160_s30 + $0x84c] ss:$472 sps:$4 sm:$0xff]   ;;  %v11001_v17 = vld [vmem:[%s12160_s30 + $0x840] ss:$472 sps:$4 sm:$0xff]  }
 0x1a4   : > { %v10172_v26 = vpack.c.bf16 %v11648_v22, %v11644_v18  ;;  %6195 = vmatprep.subr.bf16.mxu0 %v10957_v14  ;;  %6236 = vmatprep.subr.bf16.mxu1 %v10960_v16  ;;  %v11004_v18 = vld [vmem:[%s12160_s30 + $0x848] ss:$472 sps:$4 sm:$0xff]   ;;  %v11009_v19 = vld [vmem:[%s12160_s30 + $0xbf4] ss:$472 sps:$4 sm:$0xff]  }
 0x1a5   : > { %v12697_v50 = vrot.slane %v10171_v23, %v12502_v62  ;;  %6225 = vmatprep.mubr.bf16.mxu0 %v12048_v0  ;;  %6266 = vmatprep.mubr.bf16.mxu1 %v12048_v0  ;;  %v11007_v22 = vld [vmem:[%s12160_s30 + $0xbf0] ss:$472 sps:$4 sm:$0xff]  }
 0x1a6   : > { %v12702_v27 = vrot.slane %v10172_v26, %v12502_v62  ;;  %v11010_v23 = vld [vmem:[%s12160_s30 + $0xbf8] ss:$472 sps:$4 sm:$0xff]   ;;  %v11015_v26 = vld [vmem:[%s12160_s30 + $0xfa4] ss:$472 sps:$4 sm:$0xff]  }
 0x1a7   : > { %6196 = vmatpush1.bf16.msra.mxu0 %v10955_v20  ;;  %6237 = vmatpush1.bf16.msra.mxu1 %v10958_v21  ;;  %v11012_v20 = vld [vmem:[%s12160_s30 + $0xbfc] ss:$472 sps:$4 sm:$0xff]  }
 0x1a8   : > { %v8030_v32 = vcombine.low %v12697_v50, %v12702_v27  ;;  %6197 = vmatprep.subr.bf16.mxu0 %v10963_v24  ;;  %6238 = vmatprep.subr.bf16.mxu1 %v10966_v25  ;;  %v11021_v50 = vld [vmem:[%s12160_s30 + $0x1354] ss:$472 sps:$4 sm:$0xff]  }
 0x1a9   : > { %v11024_v27 = vld [vmem:[%s12160_s30 + $0x135c] ss:$472 sps:$4 sm:$0xff]  }
 0x1aa   : > { %v8038_v24 = vrot.slane %v8030_v32, %v12502_v62  ;;  %v902_v32 = vld [vmem:[%s12160_s30 + $0x1700] sm:$0xff] }
 0x1ab   : > { %6198 = vmatpush1.bf16.msra.mxu0 %v10961_v28  ;;  %6239 = vmatpush1.bf16.msra.mxu1 %v10964_v29  ;;  %v11018_v28 = vld [vmem:[%s12160_s30 + $0xfac] ss:$472 sps:$4 sm:$0xff]   ;;  %v9984_v42 = vcombine.high %v902_v32, %v902_v32 }
 0x1ac   : > { %6199 = vmatprep.subr.bf16.mxu0 %v10969_v30  ;;  %6240 = vmatprep.subr.bf16.mxu1 %v10972_v31  ;;  %v11013_v30 = vld [vmem:[%s12160_s30 + $0xfa0] ss:$472 sps:$4 sm:$0xff]  }
 0x1ad   : > { %v11016_v31 = vld [vmem:[%s12160_s30 + $0xfa8] ss:$472 sps:$4 sm:$0xff]  }
 0x1af   : > { %6200 = vmatpush1.bf16.msra.mxu0 %v10967_v33  ;;  %6241 = vmatpush1.bf16.msra.mxu1 %v10970_v34 }
 0x1b0   : > { %6201 = vmatprep.subr.bf16.mxu0 %v10975_v36  ;;  %6242 = vmatprep.subr.bf16.mxu1 %v10978_v37  ;;  %v903_v36 = vld [vmem:[%s12160_s30 + $0x1708] sm:$0xff] }
 0x1b1   : > { %v5571_v44 = vpop.f32.mrb[20].mxu0  ;;  %v5612_v45 = vpop.f32.mrb[20].mxu1 }
 0x1b2   : > { %11649 = vtanh.f32 %v5571_v44  ;;  %v5573_v46 = vpop.f32.mrb[21].mxu0  ;;  %v5614_v47 = vpop.f32.mrb[21].mxu1 }
 0x1b3   : > { %11651 = vtanh.f32 %v5612_v45  ;;  %v5575_v48 = vpop.f32.mrb[22].mxu0  ;;  %6202 = vmatpush1.bf16.msra.mxu0 %v10973_v38  ;;  %6243 = vmatpush1.bf16.msra.mxu1 %v10976_v39  ;;  %v5616_v54 = vpop.f32.mrb[22].mxu1  ;;  %v9986_v45 = vcombine.high %v903_v36, %v903_v36 }
 0x1b4   : > { %11653 = vtanh.f32 %v5573_v46  ;;  %v5576_v56 = vpop.f32.mrb[23].mxu0  ;;  %6203 = vmatprep.subr.bf16.mxu0 %v10981_v40  ;;  %6244 = vmatprep.subr.bf16.mxu1 %v10984_v41  ;;  %v5617_v55 = vpop.f32.mrb[23].mxu1  ;;  %v11019_v40 = vld [vmem:[%s12160_s30 + $0x1350] ss:$472 sps:$4 sm:$0xff]   ;;  %v9983_v46 = vcombine.low %v902_v32, %v902_v32  ;;  %v11034_v54 = vld [vmem:[%s12160_s30 + $0xfc] ss:$472 sps:$4 sm:$0xff]  }
 0x1b5   : > { %11655 = vtanh.f32 %v5614_v47  ;;  %v11022_v41 = vld [vmem:[%s12160_s30 + $0x1358] ss:$472 sps:$4 sm:$0xff]   ;;  %v9985_v47 = vcombine.low %v903_v36, %v903_v36  ;;  %v11040_v55 = vld [vmem:[%s12160_s30 + $0x4ac] ss:$472 sps:$4 sm:$0xff]  }
 0x1b6   : > { %v11029_v56 = vld [vmem:[%s12160_s30 + $0xf0] ss:$472 sps:$4 sm:$0xff]  }
 0x1b7   : > { %6204 = vmatpush1.bf16.msra.mxu0 %v10979_v51  ;;  %6245 = vmatpush1.bf16.msra.mxu1 %v10982_v52  ;;  %v4942_v51 = vsel %vm4772_vm0, %v9983_v46, 0  ;;  %v4948_v52 = vsel %vm4772_vm0, %v9985_v47, 0 }
 0x1b8   : > { %10097 = vmatprep.subr.msk.bf16.mxu0 %vm4772_vm0, %v9980_v53  ;;  %10099 = vmatprep.subr.msk.bf16.mxu1 %vm4772_vm0, %v9982_v57  ;;  %v11031_v53 = vld [vmem:[%s12160_s30 + $0xf4] ss:$472 sps:$4 sm:$0xff]   ;;  %v11032_v57 = vld [vmem:[%s12160_s30 + $0xf8] ss:$472 sps:$4 sm:$0xff]  }
 0x1bb   : > { %6206 = vmatpush1.bf16.msra.mxu0 %v4930_v60  ;;  %6247 = vmatpush1.bf16.msra.mxu1 %v4936_v61 }
 0x1bc   : > { %v11650_v4 = vpop.eup %11649  ;;  %6275 = vmatprep.subr.bf16.mxu0 %v10991_v58  ;;  %6316 = vmatprep.subr.bf16.mxu1 %v10994_v59 }
 0x1bd   : > { %v11652_v5 = vpop.eup %11651 }
 0x1be   : > { %v11654_v6 = vpop.eup %11653  ;;  %10098 = vmatmul.mubr.msk.bf16.vlgmr.msra.gmra.mrb[52].mxu0 %vm4768_vm1, %v12735_v7  ;;  %10100 = vmatmul.mubr.msk.bf16.vlgmr.msra.gmra.mrb[52].mxu1 %vm4768_vm1, %v12735_v7 }
 0x1bf   : > { %v11656_v11 = vpop.eup %11655  ;;  %v10173_v13 = vpack.c.bf16 %v11654_v6, %v11650_v4  ;;  %6276 = vmatpush1.bf16.msra.mxu0 %v10989_v63  ;;  %6317 = vmatpush1.bf16.msra.mxu1 %v10992_v1  ;;  %v11035_v63 = vld [vmem:[%s12160_s30 + $0x4a0] ss:$472 sps:$4 sm:$0xff]   ;;  %v11046_v4 = vld [vmem:[%s12160_s30 + $0x85c] ss:$472 sps:$4 sm:$0xff]  }
 0x1c0   : > { %v10174_v8 = vpack.c.bf16 %v11656_v11, %v11652_v5  ;;  %6277 = vmatprep.subr.bf16.mxu0 %v10997_v2  ;;  %6318 = vmatprep.subr.bf16.mxu1 %v11000_v3  ;;  %v11038_v1 = vld [vmem:[%s12160_s30 + $0x4a8] ss:$472 sps:$4 sm:$0xff]   ;;  %v11043_v3 = vld [vmem:[%s12160_s30 + $0x854] ss:$472 sps:$4 sm:$0xff]  }
 0x1c1   : > { %v8022_v14 = vrot.slane %v10173_v13, %v12502_v62  ;;  %6307 = vmatprep.mubr.bf16.mxu0 %v12048_v0  ;;  %6348 = vmatprep.mubr.bf16.mxu1 %v12048_v0  ;;  %v11049_v13 = vld [vmem:[%s12160_s30 + $0xc04] ss:$472 sps:$4 sm:$0xff]  }
 0x1c2   : > { %v8029_v16 = vrot.slane %v10174_v8, %v12502_v62  ;;  %v11050_v8 = vld [vmem:[%s12160_s30 + $0xc08] ss:$472 sps:$4 sm:$0xff]  }
 0x1c3   : > { %6278 = vmatpush1.bf16.msra.mxu0 %v10995_v9  ;;  %6319 = vmatpush1.bf16.msra.mxu1 %v10998_v10  ;;  %v11041_v9 = vld [vmem:[%s12160_s30 + $0x850] ss:$472 sps:$4 sm:$0xff]  }
 0x1c4   : > { %v8031_v21 = vcombine.low %v8022_v14, %v8029_v16  ;;  %6279 = vmatprep.subr.bf16.mxu0 %v11003_v15  ;;  %6320 = vmatprep.subr.bf16.mxu1 %v11006_v12  ;;  %v11044_v10 = vld [vmem:[%s12160_s30 + $0x858] ss:$472 sps:$4 sm:$0xff]   ;;  %v11052_v15 = vld [vmem:[%s12160_s30 + $0xc0c] ss:$472 sps:$4 sm:$0xff]   ;;  %v11058_v16 = vld [vmem:[%s12160_s30 + $0xfbc] ss:$472 sps:$4 sm:$0xff]  }
 0x1c5   : > { %v11047_v12 = vld [vmem:[%s12160_s30 + $0xc00] ss:$472 sps:$4 sm:$0xff]   ;;  %v11055_v14 = vld [vmem:[%s12160_s30 + $0xfb4] ss:$472 sps:$4 sm:$0xff]  }
 0x1c6   : > { %v8045_v25 = vrot.slane %v8031_v21, %v12502_v62  ;;  %v904_v21 = vld [vmem:[%s12160_s30 + $0x1710] sm:$0xff] }
 0x1c7   : > { %6280 = vmatpush1.bf16.msra.mxu0 %v11001_v17  ;;  %6321 = vmatpush1.bf16.msra.mxu1 %v11004_v18  ;;  %v11053_v17 = vld [vmem:[%s12160_s30 + $0xfb0] ss:$472 sps:$4 sm:$0xff]  }
 0x1c8   : > { %v8046_v29 = vcombine.low %v8038_v24, %v8045_v25  ;;  %6281 = vmatprep.subr.bf16.mxu0 %v11009_v19  ;;  %6322 = vmatprep.subr.bf16.mxu1 %v11012_v20  ;;  %v11056_v18 = vld [vmem:[%s12160_s30 + $0xfb8] ss:$472 sps:$4 sm:$0xff]   ;;  %v11061_v19 = vld [vmem:[%s12160_s30 + $0x1364] ss:$472 sps:$4 sm:$0xff]  }
 0x1c9   : > { %v11064_v20 = vld [vmem:[%s12160_s30 + $0x136c] ss:$472 sps:$4 sm:$0xff]   ;;  %v905_v24 = vld [vmem:[%s12160_s30 + $0x1718] sm:$0xff] }
 0x1ca   : > { %8643 = vst [vmem:[%s12581_s4 + $0x10] sm:$0xff] %v8046_v29  ;;  %v11059_v29 = vld [vmem:[%s12160_s30 + $0x1360] ss:$472 sps:$4 sm:$0xff]   ;;  %v9990_v32 = vcombine.high %v905_v24, %v905_v24 }
 0x1cb   : > { %6282 = vmatpush1.bf16.msra.mxu0 %v11007_v22  ;;  %6323 = vmatpush1.bf16.msra.mxu1 %v11010_v23 }
 0x1cc   : > { %6283 = vmatprep.subr.bf16.mxu0 %v11015_v26  ;;  %6324 = vmatprep.subr.bf16.mxu1 %v11018_v28 }
 0x1cd   : > { %v5653_v33 = vpop.f32.mrb[24].mxu0  ;;  %v5694_v34 = vpop.f32.mrb[24].mxu1 }
 0x1ce   : > { %11657 = vtanh.f32 %v5653_v33  ;;  %v5655_v37 = vpop.f32.mrb[25].mxu0  ;;  %v5696_v38 = vpop.f32.mrb[25].mxu1  ;;  %v9987_v33 = vcombine.low %v904_v21, %v904_v21 }
 0x1cf   : > { %11659 = vtanh.f32 %v5694_v34  ;;  %v5657_v39 = vpop.f32.mrb[26].mxu0  ;;  %6284 = vmatpush1.bf16.msra.mxu0 %v11013_v30  ;;  %6325 = vmatpush1.bf16.msra.mxu1 %v11016_v31  ;;  %v5698_v43 = vpop.f32.mrb[26].mxu1  ;;  %v11062_v30 = vld [vmem:[%s12160_s30 + $0x1368] ss:$472 sps:$4 sm:$0xff]   ;;  %v9988_v31 = vcombine.high %v904_v21, %v904_v21  ;;  %v9989_v34 = vcombine.low %v905_v24, %v905_v24 }
 0x1d0   : > { %11661 = vtanh.f32 %v5655_v37  ;;  %v5658_v44 = vpop.f32.mrb[27].mxu0  ;;  %6285 = vmatprep.subr.bf16.mxu0 %v11021_v50  ;;  %6326 = vmatprep.subr.bf16.mxu1 %v11024_v27  ;;  %v5699_v48 = vpop.f32.mrb[27].mxu1  ;;  %v4954_v37 = vsel %vm4772_vm0, %v9987_v33, 0  ;;  %v11071_v39 = vld [vmem:[%s12160_s30 + $0x104] ss:$472 sps:$4 sm:$0xff]  }
 0x1d1   : > { %11663 = vtanh.f32 %v5696_v38  ;;  %v4960_v38 = vsel %vm4772_vm0, %v9989_v34, 0  ;;  %v11077_v44 = vld [vmem:[%s12160_s30 + $0x4b4] ss:$472 sps:$4 sm:$0xff]   ;;  %v11117_v34 = vld [vmem:[%s12160_s30 + $0x4c4] ss:$472 sps:$4 sm:$0xff]  }
 0x1d3   : > { %6286 = vmatpush1.bf16.msra.mxu0 %v11019_v40  ;;  %6327 = vmatpush1.bf16.msra.mxu1 %v11022_v41  ;;  %v11074_v40 = vld [vmem:[%s12160_s30 + $0x10c] ss:$472 sps:$4 sm:$0xff]   ;;  %v11069_v41 = vld [vmem:[%s12160_s30 + $0x100] ss:$472 sps:$4 sm:$0xff]  }
 0x1d4   : > { %10101 = vmatprep.subr.msk.bf16.mxu0 %vm4772_vm0, %v9984_v42  ;;  %10103 = vmatprep.subr.msk.bf16.mxu1 %vm4772_vm0, %v9986_v45  ;;  %v11072_v42 = vld [vmem:[%s12160_s30 + $0x108] ss:$472 sps:$4 sm:$0xff]   ;;  %v11080_v45 = vld [vmem:[%s12160_s30 + $0x4bc] ss:$472 sps:$4 sm:$0xff]  }
 0x1d7   : > { %6288 = vmatpush1.bf16.msra.mxu0 %v4942_v51  ;;  %6329 = vmatpush1.bf16.msra.mxu1 %v4948_v52  ;;  %v11075_v52 = vld [vmem:[%s12160_s30 + $0x4b0] ss:$472 sps:$4 sm:$0xff]  }
 0x1d8   : > { %v11658_v35 = vpop.eup %11657  ;;  %6357 = vmatprep.subr.bf16.mxu0 %v11031_v53  ;;  %6398 = vmatprep.subr.bf16.mxu1 %v11034_v54  ;;  %v11078_v53 = vld [vmem:[%s12160_s30 + $0x4b8] ss:$472 sps:$4 sm:$0xff]  }
 0x1d9   : > { %v11660_v58 = vpop.eup %11659 }
 0x1da   : > { %v11662_v59 = vpop.eup %11661  ;;  %10102 = vmatmul.mubr.msk.bf16.vlgmr.msra.gmra.mrb[56].mxu0 %vm4768_vm1, %v12735_v7  ;;  %10104 = vmatmul.mubr.msk.bf16.vlgmr.msra.gmra.mrb[56].mxu1 %vm4768_vm1, %v12735_v7 }
 0x1db   : > { %v11664_v60 = vpop.eup %11663  ;;  %v10175_v61 = vpack.c.bf16 %v11662_v59, %v11658_v35  ;;  %6358 = vmatpush1.bf16.msra.mxu0 %v11029_v56  ;;  %6399 = vmatpush1.bf16.msra.mxu1 %v11032_v57  ;;  %v11083_v56 = vld [vmem:[%s12160_s30 + $0x864] ss:$472 sps:$4 sm:$0xff]  }
 0x1dc   : > { %v10176_v2 = vpack.c.bf16 %v11664_v60, %v11660_v58  ;;  %6359 = vmatprep.subr.bf16.mxu0 %v11037_v49  ;;  %6400 = vmatprep.subr.bf16.mxu1 %v11040_v55  ;;  %v11086_v57 = vld [vmem:[%s12160_s30 + $0x86c] ss:$472 sps:$4 sm:$0xff]   ;;  %v11081_v55 = vld [vmem:[%s12160_s30 + $0x860] ss:$472 sps:$4 sm:$0xff]  }
 0x1dd   : > { %v12790_v5 = vrot.slane %v10175_v61, %v12502_v62  ;;  %6389 = vmatprep.mubr.bf16.mxu0 %v12048_v0  ;;  %6430 = vmatprep.mubr.bf16.mxu1 %v12048_v0  ;;  %v11084_v58 = vld [vmem:[%s12160_s30 + $0x868] ss:$472 sps:$4 sm:$0xff]   ;;  %v11089_v60 = vld [vmem:[%s12160_s30 + $0xc14] ss:$472 sps:$4 sm:$0xff]  }
 0x1de   : > { %v12795_v6 = vrot.slane %v10176_v2, %v12502_v62  ;;  %v11092_v61 = vld [vmem:[%s12160_s30 + $0xc1c] ss:$472 sps:$4 sm:$0xff]   ;;  %v11087_v2 = vld [vmem:[%s12160_s30 + $0xc10] ss:$472 sps:$4 sm:$0xff]  }
 0x1df   : > { %6360 = vmatpush1.bf16.msra.mxu0 %v11035_v63  ;;  %6401 = vmatpush1.bf16.msra.mxu1 %v11038_v1 }
 0x1e0   : > { %v8079_v11 = vcombine.low %v12790_v5, %v12795_v6  ;;  %6361 = vmatprep.subr.bf16.mxu0 %v11043_v3  ;;  %6402 = vmatprep.subr.bf16.mxu1 %v11046_v4  ;;  %v11090_v3 = vld [vmem:[%s12160_s30 + $0xc18] ss:$472 sps:$4 sm:$0xff]   ;;  %v11096_v6 = vld [vmem:[%s12160_s30 + $0xfc8] ss:$472 sps:$4 sm:$0xff]  }
 0x1e1   : > { %v11093_v5 = vld [vmem:[%s12160_s30 + $0xfc0] ss:$472 sps:$4 sm:$0xff]  }
 0x1e2   : > { %v8087_v63 = vrot.slane %v8079_v11, %v12502_v62  ;;  %v11101_v11 = vld [vmem:[%s12160_s30 + $0x1374] ss:$472 sps:$4 sm:$0xff]  }
 0x1e3   : > { %6362 = vmatpush1.bf16.msra.mxu0 %v11041_v9  ;;  %6403 = vmatpush1.bf16.msra.mxu1 %v11044_v10  ;;  %v11095_v9 = vld [vmem:[%s12160_s30 + $0xfc4] ss:$472 sps:$4 sm:$0xff]  }
 0x1e4   : > { %6363 = vmatprep.subr.bf16.mxu0 %v11049_v13  ;;  %6404 = vmatprep.subr.bf16.mxu1 %v11052_v15  ;;  %v11098_v10 = vld [vmem:[%s12160_s30 + $0xfcc] ss:$472 sps:$4 sm:$0xff]   ;;  %v11104_v13 = vld [vmem:[%s12160_s30 + $0x137c] ss:$472 sps:$4 sm:$0xff]  }
 0x1e5   : > { %v906_v15 = vld [vmem:[%s12160_s30 + $0x1720] sm:$0xff] }
 0x1e6   : > { %v9992_v21 = vcombine.high %v906_v15, %v906_v15 }
 0x1e7   : > { %6364 = vmatpush1.bf16.msra.mxu0 %v11047_v12  ;;  %6405 = vmatpush1.bf16.msra.mxu1 %v11050_v8 }
 0x1e8   : > { %6365 = vmatprep.subr.bf16.mxu0 %v11055_v14  ;;  %6406 = vmatprep.subr.bf16.mxu1 %v11058_v16  ;;  %v907_v14 = vld [vmem:[%s12160_s30 + $0x1728] sm:$0xff] }
 0x1e9   : > { %v5735_v22 = vpop.f32.mrb[28].mxu0  ;;  %v5776_v23 = vpop.f32.mrb[28].mxu1  ;;  %v9994_v24 = vcombine.high %v907_v14, %v907_v14 }
 0x1ea   : > { %11665 = vtanh.f32 %v5735_v22  ;;  %v5737_v25 = vpop.f32.mrb[29].mxu0  ;;  %v5778_v26 = vpop.f32.mrb[29].mxu1 }
 0x1eb   : > { %11667 = vtanh.f32 %v5776_v23  ;;  %v5739_v28 = vpop.f32.mrb[30].mxu0  ;;  %6366 = vmatpush1.bf16.msra.mxu0 %v11053_v17  ;;  %6407 = vmatpush1.bf16.msra.mxu1 %v11056_v18  ;;  %v5780_v50 = vpop.f32.mrb[30].mxu1 }
 0x1ec   : > { %11669 = vtanh.f32 %v5737_v25  ;;  %v5740_v27 = vpop.f32.mrb[31].mxu0  ;;  %6367 = vmatprep.subr.bf16.mxu0 %v11061_v19  ;;  %6408 = vmatprep.subr.bf16.mxu1 %v11064_v20  ;;  %v5781_v36 = vpop.f32.mrb[31].mxu1  ;;  %v11099_v19 = vld [vmem:[%s12160_s30 + $0x1370] ss:$472 sps:$4 sm:$0xff]   ;;  %v9991_v25 = vcombine.low %v906_v15, %v906_v15  ;;  %v11114_v50 = vld [vmem:[%s12160_s30 + $0x11c] ss:$472 sps:$4 sm:$0xff]  }
 0x1ed   : > { %11671 = vtanh.f32 %v5778_v26  ;;  %v11102_v20 = vld [vmem:[%s12160_s30 + $0x1378] ss:$472 sps:$4 sm:$0xff]   ;;  %v9993_v26 = vcombine.low %v907_v14, %v907_v14  ;;  %v11120_v36 = vld [vmem:[%s12160_s30 + $0x4cc] ss:$472 sps:$4 sm:$0xff]  }
 0x1ee   : > { %v11109_v27 = vld [vmem:[%s12160_s30 + $0x110] ss:$472 sps:$4 sm:$0xff]  }
 0x1ef   : > { %6368 = vmatpush1.bf16.msra.mxu0 %v11059_v29  ;;  %6409 = vmatpush1.bf16.msra.mxu1 %v11062_v30  ;;  %v4966_v29 = vsel %vm4772_vm0, %v9991_v25, 0  ;;  %v4972_v30 = vsel %vm4772_vm0, %v9993_v26, 0 }
 0x1f0   : > { %10105 = vmatprep.subr.msk.bf16.mxu0 %vm4772_vm0, %v9988_v31  ;;  %10107 = vmatprep.subr.msk.bf16.mxu1 %vm4772_vm0, %v9990_v32  ;;  %v11111_v31 = vld [vmem:[%s12160_s30 + $0x114] ss:$472 sps:$4 sm:$0xff]   ;;  %v11112_v32 = vld [vmem:[%s12160_s30 + $0x118] ss:$472 sps:$4 sm:$0xff]  }
 0x1f3   : > { %6370 = vmatpush1.bf16.msra.mxu0 %v4954_v37  ;;  %6411 = vmatpush1.bf16.msra.mxu1 %v4960_v38 }
 0x1f4   : > { %v11666_v43 = vpop.eup %11665  ;;  %6439 = vmatprep.subr.bf16.mxu0 %v11071_v39  ;;  %6480 = vmatprep.subr.bf16.mxu1 %v11074_v40 }
 0x1f5   : > { %v11668_v46 = vpop.eup %11667 }
 0x1f6   : > { %v11670_v47 = vpop.eup %11669  ;;  %10106 = vmatmul.mubr.msk.bf16.vlgmr.msra.gmra.mrb[60].mxu0 %vm4768_vm1, %v12735_v7  ;;  %10108 = vmatmul.mubr.msk.bf16.vlgmr.msra.gmra.mrb[60].mxu1 %vm4768_vm1, %v12735_v7 }
 0x1f7   : > { %v11672_v48 = vpop.eup %11671  ;;  %v10177_v51 = vpack.c.bf16 %v11670_v47, %v11666_v43  ;;  %6440 = vmatpush1.bf16.msra.mxu0 %v11069_v41  ;;  %6481 = vmatpush1.bf16.msra.mxu1 %v11072_v42  ;;  %v11115_v41 = vld [vmem:[%s12160_s30 + $0x4c0] ss:$472 sps:$4 sm:$0xff]  }
 0x1f8   : > { %v10178_v54 = vpack.c.bf16 %v11672_v48, %v11668_v46  ;;  %6441 = vmatprep.subr.bf16.mxu0 %v11077_v44  ;;  %6482 = vmatprep.subr.bf16.mxu1 %v11080_v45  ;;  %v11118_v42 = vld [vmem:[%s12160_s30 + $0x4c8] ss:$472 sps:$4 sm:$0xff]   ;;  %v11123_v44 = vld [vmem:[%s12160_s30 + $0x874] ss:$472 sps:$4 sm:$0xff]  }
 0x1f9   : > { %v8071_v35 = vrot.slane %v10177_v51, %v12502_v62  ;;  %6471 = vmatprep.mubr.bf16.mxu0 %v12048_v0  ;;  %6512 = vmatprep.mubr.bf16.mxu1 %v12048_v0  ;;  %v11126_v45 = vld [vmem:[%s12160_s30 + $0x87c] ss:$472 sps:$4 sm:$0xff]   ;;  %v11121_v48 = vld [vmem:[%s12160_s30 + $0x870] ss:$472 sps:$4 sm:$0xff]  }
 0x1fa   : > { %v8078_v49 = vrot.slane %v10178_v54, %v12502_v62  ;;  %v11124_v51 = vld [vmem:[%s12160_s30 + $0x878] ss:$472 sps:$4 sm:$0xff]   ;;  %v11132_v54 = vld [vmem:[%s12160_s30 + $0xc2c] ss:$472 sps:$4 sm:$0xff]  }
 0x1fb   : > { %6442 = vmatpush1.bf16.msra.mxu0 %v11075_v52  ;;  %6483 = vmatpush1.bf16.msra.mxu1 %v11078_v53  ;;  %v11129_v53 = vld [vmem:[%s12160_s30 + $0xc24] ss:$472 sps:$4 sm:$0xff]  }
 0x1fc   : > { %v8080_v59 = vcombine.low %v8071_v35, %v8078_v49  ;;  %6443 = vmatprep.subr.bf16.mxu0 %v11083_v56  ;;  %6484 = vmatprep.subr.bf16.mxu1 %v11086_v57  ;;  %v11127_v56 = vld [vmem:[%s12160_s30 + $0xc20] ss:$472 sps:$4 sm:$0xff]   ;;  %v11135_v35 = vld [vmem:[%s12160_s30 + $0xfd4] ss:$472 sps:$4 sm:$0xff]  }
 0x1fd   : > { %v11130_v57 = vld [vmem:[%s12160_s30 + $0xc28] ss:$472 sps:$4 sm:$0xff]   ;;  %v11138_v49 = vld [vmem:[%s12160_s30 + $0xfdc] ss:$472 sps:$4 sm:$0xff]  }
 0x1fe   : > { %v8094_v1 = vrot.slane %v8080_v59, %v12502_v62  ;;  %v11141_v59 = vld [vmem:[%s12160_s30 + $0x1384] ss:$472 sps:$4 sm:$0xff]  }
 0x1ff   : > { %6444 = vmatpush1.bf16.msra.mxu0 %v11081_v55  ;;  %6485 = vmatpush1.bf16.msra.mxu1 %v11084_v58  ;;  %v11133_v55 = vld [vmem:[%s12160_s30 + $0xfd0] ss:$472 sps:$4 sm:$0xff]  }
 0x200   : > { %v8095_v4 = vcombine.low %v8087_v63, %v8094_v1  ;;  %6445 = vmatprep.subr.bf16.mxu0 %v11089_v60  ;;  %6486 = vmatprep.subr.bf16.mxu1 %v11092_v61  ;;  %v11136_v58 = vld [vmem:[%s12160_s30 + $0xfd8] ss:$472 sps:$4 sm:$0xff]   ;;  %v11144_v60 = vld [vmem:[%s12160_s30 + $0x138c] ss:$472 sps:$4 sm:$0xff]  }
 0x201   : > { %v908_v61 = vld [vmem:[%s12160_s30 + $0x1730] sm:$0xff] }
 0x202   : > { %8644 = vst [vmem:[%s12581_s4 + $0x18] sm:$0xff] %v8095_v4 }
 0x203   : > { %6446 = vmatpush1.bf16.msra.mxu0 %v11087_v2  ;;  %6487 = vmatpush1.bf16.msra.mxu1 %v11090_v3  ;;  %v909_v2 = vld [vmem:[%s12160_s30 + $0x1738] sm:$0xff] }
 0x204   : > { %6447 = vmatprep.subr.bf16.mxu0 %v11095_v9  ;;  %6488 = vmatprep.subr.bf16.mxu1 %v11098_v10  ;;  %v11139_v10 = vld [vmem:[%s12160_s30 + $0x1380] ss:$472 sps:$4 sm:$0xff]   ;;  %v9998_v15 = vcombine.high %v909_v2, %v909_v2 }
 0x205   : > { %v5817_v12 = vpop.f32.mrb[32].mxu0  ;;  %v5858_v8 = vpop.f32.mrb[32].mxu1 }
 0x206   : > { %11673 = vtanh.f32 %v5817_v12  ;;  %v5819_v16 = vpop.f32.mrb[33].mxu0  ;;  %v5860_v17 = vpop.f32.mrb[33].mxu1  ;;  %v9995_v12 = vcombine.low %v908_v61, %v908_v61 }
 0x207   : > { %11675 = vtanh.f32 %v5858_v8  ;;  %v5821_v18 = vpop.f32.mrb[34].mxu0  ;;  %6448 = vmatpush1.bf16.msra.mxu0 %v11093_v5  ;;  %6489 = vmatpush1.bf16.msra.mxu1 %v11096_v6  ;;  %v5862_v22 = vpop.f32.mrb[34].mxu1  ;;  %v11142_v5 = vld [vmem:[%s12160_s30 + $0x1388] ss:$472 sps:$4 sm:$0xff]   ;;  %v9996_v6 = vcombine.high %v908_v61, %v908_v61  ;;  %v9997_v8 = vcombine.low %v909_v2, %v909_v2 }
 0x208   : > { %11677 = vtanh.f32 %v5819_v16  ;;  %v5822_v23 = vpop.f32.mrb[35].mxu0  ;;  %6449 = vmatprep.subr.bf16.mxu0 %v11101_v11  ;;  %6490 = vmatprep.subr.bf16.mxu1 %v11104_v13  ;;  %v5863_v28 = vpop.f32.mrb[35].mxu1  ;;  %v4978_v16 = vsel %vm4772_vm0, %v9995_v12, 0  ;;  %v11151_v18 = vld [vmem:[%s12160_s30 + $0x124] ss:$472 sps:$4 sm:$0xff]  }
 0x209   : > { %11679 = vtanh.f32 %v5860_v17  ;;  %v4984_v17 = vsel %vm4772_vm0, %v9997_v8, 0  ;;  %v11157_v23 = vld [vmem:[%s12160_s30 + $0x4d4] ss:$472 sps:$4 sm:$0xff]   ;;  %v11197_v8 = vld [vmem:[%s12160_s30 + $0x4e4] ss:$472 sps:$4 sm:$0xff]  }
 0x20b   : > { %6450 = vmatpush1.bf16.msra.mxu0 %v11099_v19  ;;  %6491 = vmatpush1.bf16.msra.mxu1 %v11102_v20  ;;  %v11154_v19 = vld [vmem:[%s12160_s30 + $0x12c] ss:$472 sps:$4 sm:$0xff]   ;;  %v11149_v20 = vld [vmem:[%s12160_s30 + $0x120] ss:$472 sps:$4 sm:$0xff]  }
 0x20c   : > { %10109 = vmatprep.subr.msk.bf16.mxu0 %vm4772_vm0, %v9992_v21  ;;  %10111 = vmatprep.subr.msk.bf16.mxu1 %vm4772_vm0, %v9994_v24  ;;  %v11152_v21 = vld [vmem:[%s12160_s30 + $0x128] ss:$472 sps:$4 sm:$0xff]   ;;  %v11160_v24 = vld [vmem:[%s12160_s30 + $0x4dc] ss:$472 sps:$4 sm:$0xff]  }
 0x20f   : > { %6452 = vmatpush1.bf16.msra.mxu0 %v4966_v29  ;;  %6493 = vmatpush1.bf16.msra.mxu1 %v4972_v30  ;;  %v11155_v30 = vld [vmem:[%s12160_s30 + $0x4d0] ss:$472 sps:$4 sm:$0xff]  }
 0x210   : > { %v11674_v33 = vpop.eup %11673  ;;  %6521 = vmatprep.subr.bf16.mxu0 %v11111_v31  ;;  %6562 = vmatprep.subr.bf16.mxu1 %v11114_v50  ;;  %v11158_v31 = vld [vmem:[%s12160_s30 + $0x4d8] ss:$472 sps:$4 sm:$0xff]  }
 0x211   : > { %v11676_v37 = vpop.eup %11675 }
 0x212   : > { %v11678_v38 = vpop.eup %11677  ;;  %10110 = vmatmul.mubr.msk.bf16.vlgmr.msra.gmra.mrb[64].mxu0 %vm4768_vm1, %v12735_v7  ;;  %10112 = vmatmul.mubr.msk.bf16.vlgmr.msra.gmra.mrb[64].mxu1 %vm4768_vm1, %v12735_v7 }
 0x213   : > { %v11680_v39 = vpop.eup %11679  ;;  %v10179_v40 = vpack.c.bf16 %v11678_v38, %v11674_v33  ;;  %6522 = vmatpush1.bf16.msra.mxu0 %v11109_v27  ;;  %6563 = vmatpush1.bf16.msra.mxu1 %v11112_v32  ;;  %v11163_v27 = vld [vmem:[%s12160_s30 + $0x884] ss:$472 sps:$4 sm:$0xff]  }
 0x214   : > { %v10180_v43 = vpack.c.bf16 %v11680_v39, %v11676_v37  ;;  %6523 = vmatprep.subr.bf16.mxu0 %v11117_v34  ;;  %6564 = vmatprep.subr.bf16.mxu1 %v11120_v36  ;;  %v11166_v32 = vld [vmem:[%s12160_s30 + $0x88c] ss:$472 sps:$4 sm:$0xff]   ;;  %v11161_v36 = vld [vmem:[%s12160_s30 + $0x880] ss:$472 sps:$4 sm:$0xff]  }
 0x215   : > { %v12878_v46 = vrot.slane %v10179_v40, %v12502_v62  ;;  %6553 = vmatprep.mubr.bf16.mxu0 %v12048_v0  ;;  %6594 = vmatprep.mubr.bf16.mxu1 %v12048_v0  ;;  %v11164_v37 = vld [vmem:[%s12160_s30 + $0x888] ss:$472 sps:$4 sm:$0xff]   ;;  %v11169_v39 = vld [vmem:[%s12160_s30 + $0xc34] ss:$472 sps:$4 sm:$0xff]  }
 0x216   : > { %v12883_v47 = vrot.slane %v10180_v43, %v12502_v62  ;;  %v11172_v40 = vld [vmem:[%s12160_s30 + $0xc3c] ss:$472 sps:$4 sm:$0xff]   ;;  %v11167_v43 = vld [vmem:[%s12160_s30 + $0xc30] ss:$472 sps:$4 sm:$0xff]  }
 0x217   : > { %6524 = vmatpush1.bf16.msra.mxu0 %v11115_v41  ;;  %6565 = vmatpush1.bf16.msra.mxu1 %v11118_v42 }
 0x218   : > { %v8128_v52 = vcombine.low %v12878_v46, %v12883_v47  ;;  %6525 = vmatprep.subr.bf16.mxu0 %v11123_v44  ;;  %6566 = vmatprep.subr.bf16.mxu1 %v11126_v45  ;;  %v11170_v44 = vld [vmem:[%s12160_s30 + $0xc38] ss:$472 sps:$4 sm:$0xff]   ;;  %v11176_v47 = vld [vmem:[%s12160_s30 + $0xfe8] ss:$472 sps:$4 sm:$0xff]  }
 0x219   : > { %v11173_v46 = vld [vmem:[%s12160_s30 + $0xfe0] ss:$472 sps:$4 sm:$0xff]  }
 0x21a   : > { %v8136_v41 = vrot.slane %v8128_v52, %v12502_v62  ;;  %v11181_v52 = vld [vmem:[%s12160_s30 + $0x1394] ss:$472 sps:$4 sm:$0xff]  }
 0x21b   : > { %6526 = vmatpush1.bf16.msra.mxu0 %v11121_v48  ;;  %6567 = vmatpush1.bf16.msra.mxu1 %v11124_v51  ;;  %v11175_v48 = vld [vmem:[%s12160_s30 + $0xfe4] ss:$472 sps:$4 sm:$0xff]  }
 0x21c   : > { %6527 = vmatprep.subr.bf16.mxu0 %v11129_v53  ;;  %6568 = vmatprep.subr.bf16.mxu1 %v11132_v54  ;;  %v11178_v51 = vld [vmem:[%s12160_s30 + $0xfec] ss:$472 sps:$4 sm:$0xff]   ;;  %v11184_v53 = vld [vmem:[%s12160_s30 + $0x139c] ss:$472 sps:$4 sm:$0xff]  }
 0x21d   : > { %v910_v54 = vld [vmem:[%s12160_s30 + $0x1740] sm:$0xff] }
 0x21e   : > { %v10000_v61 = vcombine.high %v910_v54, %v910_v54 }
 0x21f   : > { %6528 = vmatpush1.bf16.msra.mxu0 %v11127_v56  ;;  %6569 = vmatpush1.bf16.msra.mxu1 %v11130_v57 }
 0x220   : > { %6529 = vmatprep.subr.bf16.mxu0 %v11135_v35  ;;  %6570 = vmatprep.subr.bf16.mxu1 %v11138_v49  ;;  %v911_v35 = vld [vmem:[%s12160_s30 + $0x1748] sm:$0xff] }
 0x221   : > { %v5899_v63 = vpop.f32.mrb[36].mxu0  ;;  %v5940_v1 = vpop.f32.mrb[36].mxu1  ;;  %v10002_v2 = vcombine.high %v911_v35, %v911_v35 }
 0x222   : > { %11681 = vtanh.f32 %v5899_v63  ;;  %v5901_v3 = vpop.f32.mrb[37].mxu0  ;;  %v5942_v4 = vpop.f32.mrb[37].mxu1 }
 0x223   : > { %11683 = vtanh.f32 %v5940_v1  ;;  %v5903_v9 = vpop.f32.mrb[38].mxu0  ;;  %6530 = vmatpush1.bf16.msra.mxu0 %v11133_v55  ;;  %6571 = vmatpush1.bf16.msra.mxu1 %v11136_v58  ;;  %v5944_v11 = vpop.f32.mrb[38].mxu1 }
 0x224   : > { %11685 = vtanh.f32 %v5901_v3  ;;  %v5904_v13 = vpop.f32.mrb[39].mxu0  ;;  %6531 = vmatprep.subr.bf16.mxu0 %v11141_v59  ;;  %6572 = vmatprep.subr.bf16.mxu1 %v11144_v60  ;;  %v5945_v14 = vpop.f32.mrb[39].mxu1  ;;  %v11179_v59 = vld [vmem:[%s12160_s30 + $0x1390] ss:$472 sps:$4 sm:$0xff]   ;;  %v9999_v3 = vcombine.low %v910_v54, %v910_v54  ;;  %v11194_v11 = vld [vmem:[%s12160_s30 + $0x13c] ss:$472 sps:$4 sm:$0xff]  }
 0x225   : > { %11687 = vtanh.f32 %v5942_v4  ;;  %v11182_v60 = vld [vmem:[%s12160_s30 + $0x1398] ss:$472 sps:$4 sm:$0xff]   ;;  %v10001_v4 = vcombine.low %v911_v35, %v911_v35  ;;  %v11200_v14 = vld [vmem:[%s12160_s30 + $0x4ec] ss:$472 sps:$4 sm:$0xff]  }
 0x226   : > { %v11189_v13 = vld [vmem:[%s12160_s30 + $0x130] ss:$472 sps:$4 sm:$0xff]  }
 0x227   : > { %6532 = vmatpush1.bf16.msra.mxu0 %v11139_v10  ;;  %6573 = vmatpush1.bf16.msra.mxu1 %v11142_v5  ;;  %v4990_v10 = vsel %vm4772_vm0, %v9999_v3, 0  ;;  %v4996_v5 = vsel %vm4772_vm0, %v10001_v4, 0  ;;  %v13004_v4 = vld [vmem:[%s13882_s0] sm:$0x1] }
 0x228   : > { %10113 = vmatprep.subr.msk.bf16.mxu0 %vm4772_vm0, %v9996_v6  ;;  %10115 = vmatprep.subr.msk.bf16.mxu1 %vm4772_vm0, %v9998_v15  ;;  %v11191_v6 = vld [vmem:[%s12160_s30 + $0x134] ss:$472 sps:$4 sm:$0xff]   ;;  %v11192_v15 = vld [vmem:[%s12160_s30 + $0x138] ss:$472 sps:$4 sm:$0xff]  }
 0x22b   : > { %6534 = vmatpush1.bf16.msra.mxu0 %v4978_v16  ;;  %6575 = vmatpush1.bf16.msra.mxu1 %v4984_v17 }
 0x22c   : > { %v11682_v22 = vpop.eup %11681  ;;  %6603 = vmatprep.subr.bf16.mxu0 %v11151_v18  ;;  %6644 = vmatprep.subr.bf16.mxu1 %v11154_v19 }
 0x22d   : > { %v11684_v25 = vpop.eup %11683 }
 0x22e   : > { %v11686_v26 = vpop.eup %11685  ;;  %10114 = vmatmul.mubr.msk.bf16.vlgmr.msra.gmra.mrb[68].mxu0 %vm4768_vm1, %v12735_v7  ;;  %10116 = vmatmul.mubr.msk.bf16.vlgmr.msra.gmra.mrb[68].mxu1 %vm4768_vm1, %v12735_v7 }
 0x22f   : > { %v11688_v28 = vpop.eup %11687  ;;  %v10181_v29 = vpack.c.bf16 %v11686_v26, %v11682_v22  ;;  %6604 = vmatpush1.bf16.msra.mxu0 %v11149_v20  ;;  %6645 = vmatpush1.bf16.msra.mxu1 %v11152_v21  ;;  %v11195_v20 = vld [vmem:[%s12160_s30 + $0x4e0] ss:$472 sps:$4 sm:$0xff]   ;;  %v11201_v26 = vld [vmem:[%s12160_s30 + $0x890] ss:$472 sps:$4 sm:$0xff]  }
 0x230   : > { %v10182_v50 = vpack.c.bf16 %v11688_v28, %v11684_v25  ;;  %6605 = vmatprep.subr.bf16.mxu0 %v11157_v23  ;;  %6646 = vmatprep.subr.bf16.mxu1 %v11160_v24  ;;  %v11198_v21 = vld [vmem:[%s12160_s30 + $0x4e8] ss:$472 sps:$4 sm:$0xff]   ;;  %v11203_v23 = vld [vmem:[%s12160_s30 + $0x894] ss:$472 sps:$4 sm:$0xff]   ;;  %v11204_v28 = vld [vmem:[%s12160_s30 + $0x898] ss:$472 sps:$4 sm:$0xff]  }
 0x231   : > { %v8120_v33 = vrot.slane %v10181_v29, %v12502_v62  ;;  %6635 = vmatprep.mubr.bf16.mxu0 %v12048_v0  ;;  %6676 = vmatprep.mubr.bf16.mxu1 %v12048_v0  ;;  %v11206_v24 = vld [vmem:[%s12160_s30 + $0x89c] ss:$472 sps:$4 sm:$0xff]  }
 0x232   : > { %v8127_v34 = vrot.slane %v10182_v50, %v12502_v62  ;;  %v11207_v50 = vld [vmem:[%s12160_s30 + $0xc40] ss:$472 sps:$4 sm:$0xff]  }
 0x233   : > { %6606 = vmatpush1.bf16.msra.mxu0 %v11155_v30  ;;  %6647 = vmatpush1.bf16.msra.mxu1 %v11158_v31  ;;  %v11209_v30 = vld [vmem:[%s12160_s30 + $0xc44] ss:$472 sps:$4 sm:$0xff]  }
 0x234   : > { %v8129_v38 = vcombine.low %v8120_v33, %v8127_v34  ;;  %6607 = vmatprep.subr.bf16.mxu0 %v11163_v27  ;;  %6648 = vmatprep.subr.bf16.mxu1 %v11166_v32  ;;  %v11212_v31 = vld [vmem:[%s12160_s30 + $0xc4c] ss:$472 sps:$4 sm:$0xff]   ;;  %v11210_v27 = vld [vmem:[%s12160_s30 + $0xc48] ss:$472 sps:$4 sm:$0xff]   ;;  %v11218_v33 = vld [vmem:[%s12160_s30 + $0xffc] ss:$472 sps:$4 sm:$0xff]  }
 0x235   : > { %v11215_v32 = vld [vmem:[%s12160_s30 + $0xff4] ss:$472 sps:$4 sm:$0xff]   ;;  %v11213_v34 = vld [vmem:[%s12160_s30 + $0xff0] ss:$472 sps:$4 sm:$0xff]  }
 0x236   : > { %v8143_v42 = vrot.slane %v8129_v38, %v12502_v62  ;;  %v11224_v38 = vld [vmem:[%s12160_s30 + $0x13ac] ss:$472 sps:$4 sm:$0xff]  }
 0x237   : > { %6608 = vmatpush1.bf16.msra.mxu0 %v11161_v36  ;;  %6649 = vmatpush1.bf16.msra.mxu1 %v11164_v37  ;;  %v11216_v36 = vld [vmem:[%s12160_s30 + $0xff8] ss:$472 sps:$4 sm:$0xff]   ;;  %v11221_v37 = vld [vmem:[%s12160_s30 + $0x13a4] ss:$472 sps:$4 sm:$0xff]  }
 0x238   : > { %v8144_v45 = vcombine.low %v8136_v41, %v8143_v42  ;;  %6609 = vmatprep.subr.bf16.mxu0 %v11169_v39  ;;  %6650 = vmatprep.subr.bf16.mxu1 %v11172_v40  ;;  %v912_v39 = vld [vmem:[%s12160_s30 + $0x1750] sm:$0xff]  ;;  %v913_v42 = vld [vmem:[%s12160_s30 + $0x1758] sm:$0xff] }
 0x239   : > { %v10003_v54 = vcombine.low %v912_v39, %v912_v39 }
 0x23a   : > { %8645 = vst [vmem:[%s12581_s4 + $0x20] sm:$0xff] %v8144_v45 }
 0x23b   : > { %6610 = vmatpush1.bf16.msra.mxu0 %v11167_v43  ;;  %6651 = vmatpush1.bf16.msra.mxu1 %v11170_v44  ;;  %v5002_v35 = vsel %vm4772_vm0, %v10003_v54, 0 }
 0x23c   : > { %6611 = vmatprep.subr.bf16.mxu0 %v11175_v48  ;;  %6652 = vmatprep.subr.bf16.mxu1 %v11178_v51  ;;  %v11219_v48 = vld [vmem:[%s12160_s30 + $0x13a0] ss:$472 sps:$4 sm:$0xff]  }
 0x23d   : > { %v5981_v56 = vpop.f32.mrb[40].mxu0  ;;  %v6022_v57 = vpop.f32.mrb[40].mxu1  ;;  %v11222_v51 = vld [vmem:[%s12160_s30 + $0x13a8] ss:$472 sps:$4 sm:$0xff]  }
 0x23e   : > { %11689 = vtanh.f32 %v5981_v56  ;;  %v5983_v49 = vpop.f32.mrb[41].mxu0  ;;  %v6024_v55 = vpop.f32.mrb[41].mxu1  ;;  %v10005_v56 = vcombine.low %v913_v42, %v913_v42 }
 0x23f   : > { %11691 = vtanh.f32 %v6022_v57  ;;  %v5985_v58 = vpop.f32.mrb[42].mxu0  ;;  %6612 = vmatpush1.bf16.msra.mxu0 %v11173_v46  ;;  %6653 = vmatpush1.bf16.msra.mxu1 %v11176_v47  ;;  %v6026_v63 = vpop.f32.mrb[42].mxu1  ;;  %v10004_v46 = vcombine.high %v912_v39, %v912_v39 }
 0x240   : > { %11693 = vtanh.f32 %v5983_v49  ;;  %v5986_v1 = vpop.f32.mrb[43].mxu0  ;;  %6613 = vmatprep.subr.bf16.mxu0 %v11181_v52  ;;  %6654 = vmatprep.subr.bf16.mxu1 %v11184_v53  ;;  %v6027_v9 = vpop.f32.mrb[43].mxu1  ;;  %v10006_v53 = vcombine.high %v913_v42, %v913_v42  ;;  %v5008_v49 = vsel %vm4772_vm0, %v10005_v56, 0  ;;  %v11234_v58 = vld [vmem:[%s12160_s30 + $0x14c] ss:$472 sps:$4 sm:$0xff]  }
 0x241   : > { %11695 = vtanh.f32 %v6024_v55  ;;  %v11231_v55 = vld [vmem:[%s12160_s30 + $0x144] ss:$472 sps:$4 sm:$0xff]   ;;  %v11237_v63 = vld [vmem:[%s12160_s30 + $0x4f4] ss:$472 sps:$4 sm:$0xff]  }
 0x242   : > { %v11240_v1 = vld [vmem:[%s12160_s30 + $0x4fc] ss:$472 sps:$4 sm:$0xff]  }
 0x243   : > { %6614 = vmatpush1.bf16.msra.mxu0 %v11179_v59  ;;  %6655 = vmatpush1.bf16.msra.mxu1 %v11182_v60  ;;  %v11229_v59 = vld [vmem:[%s12160_s30 + $0x140] ss:$472 sps:$4 sm:$0xff]   ;;  %v11277_v56 = vld [vmem:[%s12160_s30 + $0x504] ss:$472 sps:$4 sm:$0xff]  }
 0x244   : > { %10117 = vmatprep.subr.msk.bf16.mxu0 %vm4772_vm0, %v10000_v61  ;;  %10119 = vmatprep.subr.msk.bf16.mxu1 %vm4772_vm0, %v10002_v2  ;;  %v11232_v60 = vld [vmem:[%s12160_s30 + $0x148] ss:$472 sps:$4 sm:$0xff]  }
 0x247   : > { %6616 = vmatpush1.bf16.msra.mxu0 %v4990_v10  ;;  %6657 = vmatpush1.bf16.msra.mxu1 %v4996_v5  ;;  %v11235_v5 = vld [vmem:[%s12160_s30 + $0x4f0] ss:$472 sps:$4 sm:$0xff]  }
 0x248   : > { %v11690_v12 = vpop.eup %11689  ;;  %6685 = vmatprep.subr.bf16.mxu0 %v11191_v6  ;;  %6726 = vmatprep.subr.bf16.mxu1 %v11194_v11  ;;  %v11238_v6 = vld [vmem:[%s12160_s30 + $0x4f8] ss:$472 sps:$4 sm:$0xff]  }
 0x249   : > { %v11692_v16 = vpop.eup %11691 }
 0x24a   : > { %v11694_v17 = vpop.eup %11693  ;;  %10118 = vmatmul.mubr.msk.bf16.vlgmr.msra.gmra.mrb[72].mxu0 %vm4768_vm1, %v12735_v7  ;;  %10120 = vmatmul.mubr.msk.bf16.vlgmr.msra.gmra.mrb[72].mxu1 %vm4768_vm1, %v12735_v7 }
 0x24b   : > { %v11696_v18 = vpop.eup %11695  ;;  %v10183_v19 = vpack.c.bf16 %v11694_v17, %v11690_v12  ;;  %6686 = vmatpush1.bf16.msra.mxu0 %v11189_v13  ;;  %6727 = vmatpush1.bf16.msra.mxu1 %v11192_v15  ;;  %v11243_v13 = vld [vmem:[%s12160_s30 + $0x8a4] ss:$472 sps:$4 sm:$0xff]  }
 0x24c   : > { %v10184_v22 = vpack.c.bf16 %v11696_v18, %v11692_v16  ;;  %6687 = vmatprep.subr.bf16.mxu0 %v11197_v8  ;;  %6728 = vmatprep.subr.bf16.mxu1 %v11200_v14  ;;  %v11246_v15 = vld [vmem:[%s12160_s30 + $0x8ac] ss:$472 sps:$4 sm:$0xff]   ;;  %v11241_v14 = vld [vmem:[%s12160_s30 + $0x8a0] ss:$472 sps:$4 sm:$0xff]  }
 0x24d   : > { %v12966_v25 = vrot.slane %v10183_v19, %v12502_v62  ;;  %6717 = vmatprep.mubr.bf16.mxu0 %v12048_v0  ;;  %6758 = vmatprep.mubr.bf16.mxu1 %v12048_v0  ;;  %v11244_v16 = vld [vmem:[%s12160_s30 + $0x8a8] ss:$472 sps:$4 sm:$0xff]   ;;  %v11249_v18 = vld [vmem:[%s12160_s30 + $0xc54] ss:$472 sps:$4 sm:$0xff]  }
 0x24e   : > { %v12971_v7 = vrot.slane %v10184_v22, %v12502_v62  ;;  %v11252_v19 = vld [vmem:[%s12160_s30 + $0xc5c] ss:$472 sps:$4 sm:$0xff]   ;;  %v11247_v22 = vld [vmem:[%s12160_s30 + $0xc50] ss:$472 sps:$4 sm:$0xff]  }
 0x24f   : > { %6688 = vmatpush1.bf16.msra.mxu0 %v11195_v20  ;;  %6729 = vmatpush1.bf16.msra.mxu1 %v11198_v21 }
 0x250   : > { %v8177_v29 = vcombine.low %v12966_v25, %v12971_v7  ;;  %6689 = vmatprep.subr.bf16.mxu0 %v11203_v23  ;;  %6730 = vmatprep.subr.bf16.mxu1 %v11206_v24  ;;  %v11250_v23 = vld [vmem:[%s12160_s30 + $0xc58] ss:$472 sps:$4 sm:$0xff]   ;;  %v11256_v7 = vld [vmem:[%s12160_s30 + $0x1008] ss:$472 sps:$4 sm:$0xff]  }
 0x251   : > { %v11253_v25 = vld [vmem:[%s12160_s30 + $0x1000] ss:$472 sps:$4 sm:$0xff]  }
 0x252   : > { %v8185_v20 = vrot.slane %v8177_v29, %v12502_v62  ;;  %v11261_v29 = vld [vmem:[%s12160_s30 + $0x13b4] ss:$472 sps:$4 sm:$0xff]  }
 0x253   : > { %6690 = vmatpush1.bf16.msra.mxu0 %v11201_v26  ;;  %6731 = vmatpush1.bf16.msra.mxu1 %v11204_v28  ;;  %v11255_v26 = vld [vmem:[%s12160_s30 + $0x1004] ss:$472 sps:$4 sm:$0xff]  }
 0x254   : > { %6691 = vmatprep.subr.bf16.mxu0 %v11209_v30  ;;  %6732 = vmatprep.subr.bf16.mxu1 %v11212_v31  ;;  %v11258_v28 = vld [vmem:[%s12160_s30 + $0x100c] ss:$472 sps:$4 sm:$0xff]   ;;  %v11264_v30 = vld [vmem:[%s12160_s30 + $0x13bc] ss:$472 sps:$4 sm:$0xff]  }
 0x255   : > { %v914_v31 = vld [vmem:[%s12160_s30 + $0x1760] sm:$0xff] }
 0x256   : > { %v10008_v39 = vcombine.high %v914_v31, %v914_v31 }
 0x257   : > { %6692 = vmatpush1.bf16.msra.mxu0 %v11207_v50  ;;  %6733 = vmatpush1.bf16.msra.mxu1 %v11210_v27 }
 0x258   : > { %6693 = vmatprep.subr.bf16.mxu0 %v11215_v32  ;;  %6734 = vmatprep.subr.bf16.mxu1 %v11218_v33  ;;  %v915_v32 = vld [vmem:[%s12160_s30 + $0x1768] sm:$0xff] }
 0x259   : > { %v6063_v40 = vpop.f32.mrb[44].mxu0  ;;  %v6104_v41 = vpop.f32.mrb[44].mxu1  ;;  %v10010_v42 = vcombine.high %v915_v32, %v915_v32 }
 0x25a   : > { %11697 = vtanh.f32 %v6063_v40  ;;  %v6065_v43 = vpop.f32.mrb[45].mxu0  ;;  %v6106_v44 = vpop.f32.mrb[45].mxu1 }
 0x25b   : > { %11699 = vtanh.f32 %v6104_v41  ;;  %v6067_v45 = vpop.f32.mrb[46].mxu0  ;;  %6694 = vmatpush1.bf16.msra.mxu0 %v11213_v34  ;;  %6735 = vmatpush1.bf16.msra.mxu1 %v11216_v36  ;;  %v6108_v47 = vpop.f32.mrb[46].mxu1 }
 0x25c   : > { %11701 = vtanh.f32 %v6065_v43  ;;  %v6068_v52 = vpop.f32.mrb[47].mxu0  ;;  %6695 = vmatprep.subr.bf16.mxu0 %v11221_v37  ;;  %6736 = vmatprep.subr.bf16.mxu1 %v11224_v38  ;;  %v6109_v57 = vpop.f32.mrb[47].mxu1  ;;  %v11259_v37 = vld [vmem:[%s12160_s30 + $0x13b0] ss:$472 sps:$4 sm:$0xff]   ;;  %v10007_v43 = vcombine.low %v914_v31, %v914_v31  ;;  %v11274_v47 = vld [vmem:[%s12160_s30 + $0x15c] ss:$472 sps:$4 sm:$0xff]  }
 0x25d   : > { %11703 = vtanh.f32 %v6106_v44  ;;  %v11262_v38 = vld [vmem:[%s12160_s30 + $0x13b8] ss:$472 sps:$4 sm:$0xff]   ;;  %v10009_v44 = vcombine.low %v915_v32, %v915_v32  ;;  %v11280_v57 = vld [vmem:[%s12160_s30 + $0x50c] ss:$472 sps:$4 sm:$0xff]  }
 0x25e   : > { %v11269_v52 = vld [vmem:[%s12160_s30 + $0x150] ss:$472 sps:$4 sm:$0xff]  }
 0x25f   : > { %6696 = vmatpush1.bf16.msra.mxu0 %v11219_v48  ;;  %6737 = vmatpush1.bf16.msra.mxu1 %v11222_v51  ;;  %v5014_v48 = vsel %vm4772_vm0, %v10007_v43, 0  ;;  %v5020_v51 = vsel %vm4772_vm0, %v10009_v44, 0 }
 0x260   : > { %10121 = vmatprep.subr.msk.bf16.mxu0 %vm4772_vm0, %v10004_v46  ;;  %10123 = vmatprep.subr.msk.bf16.mxu1 %vm4772_vm0, %v10006_v53  ;;  %v11271_v46 = vld [vmem:[%s12160_s30 + $0x154] ss:$472 sps:$4 sm:$0xff]   ;;  %v11272_v53 = vld [vmem:[%s12160_s30 + $0x158] ss:$472 sps:$4 sm:$0xff]  }
 0x263   : > { %6698 = vmatpush1.bf16.msra.mxu0 %v5002_v35  ;;  %6739 = vmatpush1.bf16.msra.mxu1 %v5008_v49 }
 0x264   : > { %v11698_v61 = vpop.eup %11697  ;;  %6767 = vmatprep.subr.bf16.mxu0 %v11231_v55  ;;  %6808 = vmatprep.subr.bf16.mxu1 %v11234_v58 }
 0x265   : > { %v11700_v2 = vpop.eup %11699 }
 0x266   : > { %v11702_v3 = vpop.eup %11701  ;;  %10122 = vmatmul.mubr.msk.bf16.vlgmr.msra.gmra.mrb[76].mxu0 %vm4768_vm1, %v13004_v4  ;;  %10124 = vmatmul.mubr.msk.bf16.vlgmr.msra.gmra.mrb[76].mxu1 %vm4768_vm1, %v13004_v4 }
 0x267   : > { %v11704_v9 = vpop.eup %11703  ;;  %v10185_v10 = vpack.c.bf16 %v11702_v3, %v11698_v61  ;;  %6768 = vmatpush1.bf16.msra.mxu0 %v11229_v59  ;;  %6809 = vmatpush1.bf16.msra.mxu1 %v11232_v60  ;;  %v11275_v59 = vld [vmem:[%s12160_s30 + $0x500] ss:$472 sps:$4 sm:$0xff]  }
 0x268   : > { %v10186_v11 = vpack.c.bf16 %v11704_v9, %v11700_v2  ;;  %6769 = vmatprep.subr.bf16.mxu0 %v11237_v63  ;;  %6810 = vmatprep.subr.bf16.mxu1 %v11240_v1  ;;  %v11278_v60 = vld [vmem:[%s12160_s30 + $0x508] ss:$472 sps:$4 sm:$0xff]   ;;  %v11283_v63 = vld [vmem:[%s12160_s30 + $0x8b4] ss:$472 sps:$4 sm:$0xff]  }
 0x269   : > { %v8169_v12 = vrot.slane %v10185_v10, %v12502_v62  ;;  %6799 = vmatprep.mubr.bf16.mxu0 %v12048_v0  ;;  %6840 = vmatprep.mubr.bf16.mxu1 %v12048_v0  ;;  %v11286_v1 = vld [vmem:[%s12160_s30 + $0x8bc] ss:$472 sps:$4 sm:$0xff]   ;;  %v11281_v9 = vld [vmem:[%s12160_s30 + $0x8b0] ss:$472 sps:$4 sm:$0xff]  }
 0x26a   : > { %v8176_v8 = vrot.slane %v10186_v11, %v12502_v62  ;;  %v11284_v10 = vld [vmem:[%s12160_s30 + $0x8b8] ss:$472 sps:$4 sm:$0xff]   ;;  %v11292_v11 = vld [vmem:[%s12160_s30 + $0xc6c] ss:$472 sps:$4 sm:$0xff]  }
 0x26b   : > { %6770 = vmatpush1.bf16.msra.mxu0 %v11235_v5  ;;  %6811 = vmatpush1.bf16.msra.mxu1 %v11238_v6  ;;  %v11289_v6 = vld [vmem:[%s12160_s30 + $0xc64] ss:$472 sps:$4 sm:$0xff]  }
 0x26c   : > { %v8178_v17 = vcombine.low %v8169_v12, %v8176_v8  ;;  %6771 = vmatprep.subr.bf16.mxu0 %v11243_v13  ;;  %6812 = vmatprep.subr.bf16.mxu1 %v11246_v15  ;;  %v11287_v13 = vld [vmem:[%s12160_s30 + $0xc60] ss:$472 sps:$4 sm:$0xff]   ;;  %v11295_v12 = vld [vmem:[%s12160_s30 + $0x1014] ss:$472 sps:$4 sm:$0xff]  }
 0x26d   : > { %v11290_v15 = vld [vmem:[%s12160_s30 + $0xc68] ss:$472 sps:$4 sm:$0xff]   ;;  %v11298_v8 = vld [vmem:[%s12160_s30 + $0x101c] ss:$472 sps:$4 sm:$0xff]  }
 0x26e   : > { %v8192_v21 = vrot.slane %v8178_v17, %v12502_v62  ;;  %v11301_v17 = vld [vmem:[%s12160_s30 + $0x13c4] ss:$472 sps:$4 sm:$0xff]  }
 0x26f   : > { %6772 = vmatpush1.bf16.msra.mxu0 %v11241_v14  ;;  %6813 = vmatpush1.bf16.msra.mxu1 %v11244_v16  ;;  %v11293_v14 = vld [vmem:[%s12160_s30 + $0x1010] ss:$472 sps:$4 sm:$0xff]  }
 0x270   : > { %v8193_v24 = vcombine.low %v8185_v20, %v8192_v21  ;;  %6773 = vmatprep.subr.bf16.mxu0 %v11249_v18  ;;  %6814 = vmatprep.subr.bf16.mxu1 %v11252_v19  ;;  %v11296_v16 = vld [vmem:[%s12160_s30 + $0x1018] ss:$472 sps:$4 sm:$0xff]   ;;  %v11304_v18 = vld [vmem:[%s12160_s30 + $0x13cc] ss:$472 sps:$4 sm:$0xff]  }
 0x271   : > { %v916_v19 = vld [vmem:[%s12160_s30 + $0x1770] sm:$0xff] }
 0x272   : > { %8646 = vst [vmem:[%s12581_s4 + $0x28] sm:$0xff] %v8193_v24 }
 0x273   : > { %6774 = vmatpush1.bf16.msra.mxu0 %v11247_v22  ;;  %6815 = vmatpush1.bf16.msra.mxu1 %v11250_v23  ;;  %v917_v22 = vld [vmem:[%s12160_s30 + $0x1778] sm:$0xff] }
 0x274   : > { %6775 = vmatprep.subr.bf16.mxu0 %v11255_v26  ;;  %6816 = vmatprep.subr.bf16.mxu1 %v11258_v28  ;;  %v11299_v28 = vld [vmem:[%s12160_s30 + $0x13c0] ss:$472 sps:$4 sm:$0xff]   ;;  %v10014_v31 = vcombine.high %v917_v22, %v917_v22 }
 0x275   : > { %v6145_v50 = vpop.f32.mrb[48].mxu0  ;;  %v6186_v27 = vpop.f32.mrb[48].mxu1 }
 0x276   : > { %11705 = vtanh.f32 %v6145_v50  ;;  %v6147_v33 = vpop.f32.mrb[49].mxu0  ;;  %v6188_v34 = vpop.f32.mrb[49].mxu1  ;;  %v10011_v50 = vcombine.low %v916_v19, %v916_v19 }
 0x277   : > { %11707 = vtanh.f32 %v6186_v27  ;;  %v6149_v36 = vpop.f32.mrb[50].mxu0  ;;  %6776 = vmatpush1.bf16.msra.mxu0 %v11253_v25  ;;  %6817 = vmatpush1.bf16.msra.mxu1 %v11256_v7  ;;  %v6190_v40 = vpop.f32.mrb[50].mxu1  ;;  %v11302_v25 = vld [vmem:[%s12160_s30 + $0x13c8] ss:$472 sps:$4 sm:$0xff]   ;;  %v10012_v7 = vcombine.high %v916_v19, %v916_v19  ;;  %v10013_v27 = vcombine.low %v917_v22, %v917_v22 }
 0x278   : > { %11709 = vtanh.f32 %v6147_v33  ;;  %v6150_v41 = vpop.f32.mrb[51].mxu0  ;;  %6777 = vmatprep.subr.bf16.mxu0 %v11261_v29  ;;  %6818 = vmatprep.subr.bf16.mxu1 %v11264_v30  ;;  %v6191_v45 = vpop.f32.mrb[51].mxu1  ;;  %v5026_v33 = vsel %vm4772_vm0, %v10011_v50, 0  ;;  %v11311_v36 = vld [vmem:[%s12160_s30 + $0x164] ss:$472 sps:$4 sm:$0xff]  }
 0x279   : > { %11711 = vtanh.f32 %v6188_v34  ;;  %v5032_v34 = vsel %vm4772_vm0, %v10013_v27, 0  ;;  %v11317_v41 = vld [vmem:[%s12160_s30 + $0x514] ss:$472 sps:$4 sm:$0xff]   ;;  %v11357_v27 = vld [vmem:[%s12160_s30 + $0x524] ss:$472 sps:$4 sm:$0xff]  }
 0x27b   : > { %6778 = vmatpush1.bf16.msra.mxu0 %v11259_v37  ;;  %6819 = vmatpush1.bf16.msra.mxu1 %v11262_v38  ;;  %v11314_v37 = vld [vmem:[%s12160_s30 + $0x16c] ss:$472 sps:$4 sm:$0xff]   ;;  %v11309_v38 = vld [vmem:[%s12160_s30 + $0x160] ss:$472 sps:$4 sm:$0xff]  }
 0x27c   : > { %10125 = vmatprep.subr.msk.bf16.mxu0 %vm4772_vm0, %v10008_v39  ;;  %10127 = vmatprep.subr.msk.bf16.mxu1 %vm4772_vm0, %v10010_v42  ;;  %v11312_v39 = vld [vmem:[%s12160_s30 + $0x168] ss:$472 sps:$4 sm:$0xff]   ;;  %v11320_v42 = vld [vmem:[%s12160_s30 + $0x51c] ss:$472 sps:$4 sm:$0xff]  }
 0x27f   : > { %6780 = vmatpush1.bf16.msra.mxu0 %v5014_v48  ;;  %6821 = vmatpush1.bf16.msra.mxu1 %v5020_v51  ;;  %v11315_v51 = vld [vmem:[%s12160_s30 + $0x510] ss:$472 sps:$4 sm:$0xff]  }
 0x280   : > { %v11706_v54 = vpop.eup %11705  ;;  %6849 = vmatprep.subr.bf16.mxu0 %v11271_v46  ;;  %6890 = vmatprep.subr.bf16.mxu1 %v11274_v47  ;;  %v11318_v46 = vld [vmem:[%s12160_s30 + $0x518] ss:$472 sps:$4 sm:$0xff]  }
 0x281   : > { %v11708_v35 = vpop.eup %11707 }
 0x282   : > { %v11710_v49 = vpop.eup %11709  ;;  %10126 = vmatmul.mubr.msk.bf16.vlgmr.msra.gmra.mrb[80].mxu0 %vm4768_vm1, %v13004_v4  ;;  %10128 = vmatmul.mubr.msk.bf16.vlgmr.msra.gmra.mrb[80].mxu1 %vm4768_vm1, %v13004_v4 }
 0x283   : > { %v11712_v55 = vpop.eup %11711  ;;  %v10187_v58 = vpack.c.bf16 %v11710_v49, %v11706_v54  ;;  %6850 = vmatpush1.bf16.msra.mxu0 %v11269_v52  ;;  %6891 = vmatpush1.bf16.msra.mxu1 %v11272_v53  ;;  %v11323_v52 = vld [vmem:[%s12160_s30 + $0x8c4] ss:$472 sps:$4 sm:$0xff]  }
 0x284   : > { %v10188_v61 = vpack.c.bf16 %v11712_v55, %v11708_v35  ;;  %6851 = vmatprep.subr.bf16.mxu0 %v11277_v56  ;;  %6892 = vmatprep.subr.bf16.mxu1 %v11280_v57  ;;  %v11326_v53 = vld [vmem:[%s12160_s30 + $0x8cc] ss:$472 sps:$4 sm:$0xff]   ;;  %v11321_v57 = vld [vmem:[%s12160_s30 + $0x8c0] ss:$472 sps:$4 sm:$0xff]  }
 0x285   : > { %v13059_v2 = vrot.slane %v10187_v58, %v12502_v62  ;;  %6881 = vmatprep.mubr.bf16.mxu0 %v12048_v0  ;;  %6922 = vmatprep.mubr.bf16.mxu1 %v12048_v0  ;;  %v11324_v35 = vld [vmem:[%s12160_s30 + $0x8c8] ss:$472 sps:$4 sm:$0xff]   ;;  %v11329_v55 = vld [vmem:[%s12160_s30 + $0xc74] ss:$472 sps:$4 sm:$0xff]  }
 0x286   : > { %v13064_v3 = vrot.slane %v10188_v61, %v12502_v62  ;;  %v11332_v58 = vld [vmem:[%s12160_s30 + $0xc7c] ss:$472 sps:$4 sm:$0xff]   ;;  %v11327_v61 = vld [vmem:[%s12160_s30 + $0xc70] ss:$472 sps:$4 sm:$0xff]  }
 0x287   : > { %6852 = vmatpush1.bf16.msra.mxu0 %v11275_v59  ;;  %6893 = vmatpush1.bf16.msra.mxu1 %v11278_v60 }
 0x288   : > { %v8226_v5 = vcombine.low %v13059_v2, %v13064_v3  ;;  %6853 = vmatprep.subr.bf16.mxu0 %v11283_v63  ;;  %6894 = vmatprep.subr.bf16.mxu1 %v11286_v1  ;;  %v11330_v63 = vld [vmem:[%s12160_s30 + $0xc78] ss:$472 sps:$4 sm:$0xff]   ;;  %v11336_v3 = vld [vmem:[%s12160_s30 + $0x1028] ss:$472 sps:$4 sm:$0xff]  }
 0x289   : > { %v11333_v2 = vld [vmem:[%s12160_s30 + $0x1020] ss:$472 sps:$4 sm:$0xff]  }
 0x28a   : > { %v8234_v59 = vrot.slane %v8226_v5, %v12502_v62  ;;  %v11341_v5 = vld [vmem:[%s12160_s30 + $0x13d4] ss:$472 sps:$4 sm:$0xff]  }
 0x28b   : > { %6854 = vmatpush1.bf16.msra.mxu0 %v11281_v9  ;;  %6895 = vmatpush1.bf16.msra.mxu1 %v11284_v10  ;;  %v11335_v9 = vld [vmem:[%s12160_s30 + $0x1024] ss:$472 sps:$4 sm:$0xff]  }
 0x28c   : > { %6855 = vmatprep.subr.bf16.mxu0 %v11289_v6  ;;  %6896 = vmatprep.subr.bf16.mxu1 %v11292_v11  ;;  %v11338_v10 = vld [vmem:[%s12160_s30 + $0x102c] ss:$472 sps:$4 sm:$0xff]   ;;  %v11344_v6 = vld [vmem:[%s12160_s30 + $0x13dc] ss:$472 sps:$4 sm:$0xff]  }
 0x28d   : > { %v918_v11 = vld [vmem:[%s12160_s30 + $0x1780] sm:$0xff] }
 0x28e   : > { %v10016_v19 = vcombine.high %v918_v11, %v918_v11 }
 0x28f   : > { %6856 = vmatpush1.bf16.msra.mxu0 %v11287_v13  ;;  %6897 = vmatpush1.bf16.msra.mxu1 %v11290_v15 }
 0x290   : > { %6857 = vmatprep.subr.bf16.mxu0 %v11295_v12  ;;  %6898 = vmatprep.subr.bf16.mxu1 %v11298_v8  ;;  %v919_v12 = vld [vmem:[%s12160_s30 + $0x1788] sm:$0xff] }
 0x291   : > { %v6227_v20 = vpop.f32.mrb[52].mxu0  ;;  %v6268_v21 = vpop.f32.mrb[52].mxu1  ;;  %v10018_v22 = vcombine.high %v919_v12, %v919_v12 }
 0x292   : > { %11713 = vtanh.f32 %v6227_v20  ;;  %v6229_v23 = vpop.f32.mrb[53].mxu0  ;;  %v6270_v24 = vpop.f32.mrb[53].mxu1 }
 0x293   : > { %11715 = vtanh.f32 %v6268_v21  ;;  %v6231_v26 = vpop.f32.mrb[54].mxu0  ;;  %6858 = vmatpush1.bf16.msra.mxu0 %v11293_v14  ;;  %6899 = vmatpush1.bf16.msra.mxu1 %v11296_v16  ;;  %v6272_v29 = vpop.f32.mrb[54].mxu1 }
 0x294   : > { %11717 = vtanh.f32 %v6229_v23  ;;  %v6232_v30 = vpop.f32.mrb[55].mxu0  ;;  %6859 = vmatprep.subr.bf16.mxu0 %v11301_v17  ;;  %6900 = vmatprep.subr.bf16.mxu1 %v11304_v18  ;;  %v6273_v32 = vpop.f32.mrb[55].mxu1  ;;  %v11339_v17 = vld [vmem:[%s12160_s30 + $0x13d0] ss:$472 sps:$4 sm:$0xff]   ;;  %v10015_v23 = vcombine.low %v918_v11, %v918_v11  ;;  %v11354_v29 = vld [vmem:[%s12160_s30 + $0x17c] ss:$472 sps:$4 sm:$0xff]  }
 0x295   : > { %11719 = vtanh.f32 %v6270_v24  ;;  %v11342_v18 = vld [vmem:[%s12160_s30 + $0x13d8] ss:$472 sps:$4 sm:$0xff]   ;;  %v10017_v24 = vcombine.low %v919_v12, %v919_v12  ;;  %v11360_v32 = vld [vmem:[%s12160_s30 + $0x52c] ss:$472 sps:$4 sm:$0xff]  }
 0x296   : > { %v11349_v30 = vld [vmem:[%s12160_s30 + $0x170] ss:$472 sps:$4 sm:$0xff]  }
 0x297   : > { %6860 = vmatpush1.bf16.msra.mxu0 %v11299_v28  ;;  %6901 = vmatpush1.bf16.msra.mxu1 %v11302_v25  ;;  %v5038_v28 = vsel %vm4772_vm0, %v10015_v23, 0  ;;  %v5044_v25 = vsel %vm4772_vm0, %v10017_v24, 0 }
 0x298   : > { %10129 = vmatprep.subr.msk.bf16.mxu0 %vm4772_vm0, %v10012_v7  ;;  %10131 = vmatprep.subr.msk.bf16.mxu1 %vm4772_vm0, %v10014_v31  ;;  %v11351_v7 = vld [vmem:[%s12160_s30 + $0x174] ss:$472 sps:$4 sm:$0xff]   ;;  %v11352_v31 = vld [vmem:[%s12160_s30 + $0x178] ss:$472 sps:$4 sm:$0xff]  }
 0x29b   : > { %6862 = vmatpush1.bf16.msra.mxu0 %v5026_v33  ;;  %6903 = vmatpush1.bf16.msra.mxu1 %v5032_v34 }
 0x29c   : > { %v11714_v40 = vpop.eup %11713  ;;  %6931 = vmatprep.subr.bf16.mxu0 %v11311_v36  ;;  %6972 = vmatprep.subr.bf16.mxu1 %v11314_v37 }
 0x29d   : > { %v11716_v43 = vpop.eup %11715 }
 0x29e   : > { %v11718_v44 = vpop.eup %11717  ;;  %10130 = vmatmul.mubr.msk.bf16.vlgmr.msra.gmra.mrb[84].mxu0 %vm4768_vm1, %v13004_v4  ;;  %10132 = vmatmul.mubr.msk.bf16.vlgmr.msra.gmra.mrb[84].mxu1 %vm4768_vm1, %v13004_v4 }
 0x29f   : > { %v11720_v45 = vpop.eup %11719  ;;  %v10189_v48 = vpack.c.bf16 %v11718_v44, %v11714_v40  ;;  %6932 = vmatpush1.bf16.msra.mxu0 %v11309_v38  ;;  %6973 = vmatpush1.bf16.msra.mxu1 %v11312_v39  ;;  %v11355_v38 = vld [vmem:[%s12160_s30 + $0x520] ss:$472 sps:$4 sm:$0xff]  }
 0x2a0   : > { %v10190_v47 = vpack.c.bf16 %v11720_v45, %v11716_v43  ;;  %6933 = vmatprep.subr.bf16.mxu0 %v11317_v41  ;;  %6974 = vmatprep.subr.bf16.mxu1 %v11320_v42  ;;  %v11358_v39 = vld [vmem:[%s12160_s30 + $0x528] ss:$472 sps:$4 sm:$0xff]   ;;  %v11363_v41 = vld [vmem:[%s12160_s30 + $0x8d4] ss:$472 sps:$4 sm:$0xff]  }
 0x2a1   : > { %v8218_v54 = vrot.slane %v10189_v48, %v12502_v62  ;;  %6963 = vmatprep.mubr.bf16.mxu0 %v12048_v0  ;;  %7004 = vmatprep.mubr.bf16.mxu1 %v12048_v0  ;;  %v11366_v42 = vld [vmem:[%s12160_s30 + $0x8dc] ss:$472 sps:$4 sm:$0xff]   ;;  %v11361_v45 = vld [vmem:[%s12160_s30 + $0x8d0] ss:$472 sps:$4 sm:$0xff]  }
 0x2a2   : > { %v8225_v56 = vrot.slane %v10190_v47, %v12502_v62  ;;  %v11364_v48 = vld [vmem:[%s12160_s30 + $0x8d8] ss:$472 sps:$4 sm:$0xff]   ;;  %v11372_v47 = vld [vmem:[%s12160_s30 + $0xc8c] ss:$472 sps:$4 sm:$0xff]  }
 0x2a3   : > { %6934 = vmatpush1.bf16.msra.mxu0 %v11315_v51  ;;  %6975 = vmatpush1.bf16.msra.mxu1 %v11318_v46  ;;  %v11369_v46 = vld [vmem:[%s12160_s30 + $0xc84] ss:$472 sps:$4 sm:$0xff]  }
 0x2a4   : > { %v8227_v49 = vcombine.low %v8218_v54, %v8225_v56  ;;  %6935 = vmatprep.subr.bf16.mxu0 %v11323_v52  ;;  %6976 = vmatprep.subr.bf16.mxu1 %v11326_v53  ;;  %v11367_v52 = vld [vmem:[%s12160_s30 + $0xc80] ss:$472 sps:$4 sm:$0xff]   ;;  %v11375_v54 = vld [vmem:[%s12160_s30 + $0x1034] ss:$472 sps:$4 sm:$0xff]  }
 0x2a5   : > { %v11370_v53 = vld [vmem:[%s12160_s30 + $0xc88] ss:$472 sps:$4 sm:$0xff]   ;;  %v11378_v56 = vld [vmem:[%s12160_s30 + $0x103c] ss:$472 sps:$4 sm:$0xff]  }
 0x2a6   : > { %v8241_v60 = vrot.slane %v8227_v49, %v12502_v62  ;;  %v11381_v49 = vld [vmem:[%s12160_s30 + $0x13e4] ss:$472 sps:$4 sm:$0xff]  }
 0x2a7   : > { %6936 = vmatpush1.bf16.msra.mxu0 %v11321_v57  ;;  %6977 = vmatpush1.bf16.msra.mxu1 %v11324_v35  ;;  %v11373_v57 = vld [vmem:[%s12160_s30 + $0x1030] ss:$472 sps:$4 sm:$0xff]  }
 0x2a8   : > { %v8242_v1 = vcombine.low %v8234_v59, %v8241_v60  ;;  %6937 = vmatprep.subr.bf16.mxu0 %v11329_v55  ;;  %6978 = vmatprep.subr.bf16.mxu1 %v11332_v58  ;;  %v11376_v35 = vld [vmem:[%s12160_s30 + $0x1038] ss:$472 sps:$4 sm:$0xff]   ;;  %v11384_v55 = vld [vmem:[%s12160_s30 + $0x13ec] ss:$472 sps:$4 sm:$0xff]  }
 0x2a9   : > { %v920_v58 = vld [vmem:[%s12160_s30 + $0x1790] sm:$0xff] }
 0x2aa   : > { %8647 = vst [vmem:[%s12581_s4 + $0x30] sm:$0xff] %v8242_v1 }
 0x2ab   : > { %6938 = vmatpush1.bf16.msra.mxu0 %v11327_v61  ;;  %6979 = vmatpush1.bf16.msra.mxu1 %v11330_v63  ;;  %v921_v61 = vld [vmem:[%s12160_s30 + $0x1798] sm:$0xff] }
 0x2ac   : > { %6939 = vmatprep.subr.bf16.mxu0 %v11335_v9  ;;  %6980 = vmatprep.subr.bf16.mxu1 %v11338_v10  ;;  %v11379_v10 = vld [vmem:[%s12160_s30 + $0x13e0] ss:$472 sps:$4 sm:$0xff]   ;;  %v10022_v11 = vcombine.high %v921_v61, %v921_v61 }
 0x2ad   : > { %v6309_v13 = vpop.f32.mrb[56].mxu0  ;;  %v6350_v15 = vpop.f32.mrb[56].mxu1 }
 0x2ae   : > { %11721 = vtanh.f32 %v6309_v13  ;;  %v6311_v8 = vpop.f32.mrb[57].mxu0  ;;  %v6352_v14 = vpop.f32.mrb[57].mxu1  ;;  %v10019_v13 = vcombine.low %v920_v58, %v920_v58 }
 0x2af   : > { %11723 = vtanh.f32 %v6350_v15  ;;  %v6313_v16 = vpop.f32.mrb[58].mxu0  ;;  %6940 = vmatpush1.bf16.msra.mxu0 %v11333_v2  ;;  %6981 = vmatpush1.bf16.msra.mxu1 %v11336_v3  ;;  %v6354_v20 = vpop.f32.mrb[58].mxu1  ;;  %v11382_v2 = vld [vmem:[%s12160_s30 + $0x13e8] ss:$472 sps:$4 sm:$0xff]   ;;  %v10020_v3 = vcombine.high %v920_v58, %v920_v58  ;;  %v10021_v15 = vcombine.low %v921_v61, %v921_v61 }
 0x2b0   : > { %11725 = vtanh.f32 %v6311_v8  ;;  %v6314_v21 = vpop.f32.mrb[59].mxu0  ;;  %6941 = vmatprep.subr.bf16.mxu0 %v11341_v5  ;;  %6982 = vmatprep.subr.bf16.mxu1 %v11344_v6  ;;  %v6355_v26 = vpop.f32.mrb[59].mxu1  ;;  %v5050_v8 = vsel %vm4772_vm0, %v10019_v13, 0  ;;  %v11391_v16 = vld [vmem:[%s12160_s30 + $0x184] ss:$472 sps:$4 sm:$0xff]  }
 0x2b1   : > { %11727 = vtanh.f32 %v6352_v14  ;;  %v5056_v14 = vsel %vm4772_vm0, %v10021_v15, 0  ;;  %v11397_v21 = vld [vmem:[%s12160_s30 + $0x534] ss:$472 sps:$4 sm:$0xff]   ;;  %v11437_v15 = vld [vmem:[%s12160_s30 + $0x544] ss:$472 sps:$4 sm:$0xff]  }
 0x2b3   : > { %6942 = vmatpush1.bf16.msra.mxu0 %v11339_v17  ;;  %6983 = vmatpush1.bf16.msra.mxu1 %v11342_v18  ;;  %v11394_v17 = vld [vmem:[%s12160_s30 + $0x18c] ss:$472 sps:$4 sm:$0xff]   ;;  %v11389_v18 = vld [vmem:[%s12160_s30 + $0x180] ss:$472 sps:$4 sm:$0xff]  }
 0x2b4   : > { %10133 = vmatprep.subr.msk.bf16.mxu0 %vm4772_vm0, %v10016_v19  ;;  %10135 = vmatprep.subr.msk.bf16.mxu1 %vm4772_vm0, %v10018_v22  ;;  %v11392_v19 = vld [vmem:[%s12160_s30 + $0x188] ss:$472 sps:$4 sm:$0xff]   ;;  %v11400_v22 = vld [vmem:[%s12160_s30 + $0x53c] ss:$472 sps:$4 sm:$0xff]  }
 0x2b7   : > { %6944 = vmatpush1.bf16.msra.mxu0 %v5038_v28  ;;  %6985 = vmatpush1.bf16.msra.mxu1 %v5044_v25  ;;  %v11395_v25 = vld [vmem:[%s12160_s30 + $0x530] ss:$472 sps:$4 sm:$0xff]  }
 0x2b8   : > { %v11722_v50 = vpop.eup %11721  ;;  %7013 = vmatprep.subr.bf16.mxu0 %v11351_v7  ;;  %7054 = vmatprep.subr.bf16.mxu1 %v11354_v29  ;;  %v11398_v7 = vld [vmem:[%s12160_s30 + $0x538] ss:$472 sps:$4 sm:$0xff]  }
 0x2b9   : > { %v11724_v33 = vpop.eup %11723 }
 0x2ba   : > { %v11726_v34 = vpop.eup %11725  ;;  %10134 = vmatmul.mubr.msk.bf16.vlgmr.msra.gmra.mrb[88].mxu0 %vm4768_vm1, %v13004_v4  ;;  %10136 = vmatmul.mubr.msk.bf16.vlgmr.msra.gmra.mrb[88].mxu1 %vm4768_vm1, %v13004_v4 }
 0x2bb   : > { %v11728_v36 = vpop.eup %11727  ;;  %v10191_v37 = vpack.c.bf16 %v11726_v34, %v11722_v50  ;;  %7014 = vmatpush1.bf16.msra.mxu0 %v11349_v30  ;;  %7055 = vmatpush1.bf16.msra.mxu1 %v11352_v31  ;;  %v11403_v30 = vld [vmem:[%s12160_s30 + $0x8e4] ss:$472 sps:$4 sm:$0xff]  }
 0x2bc   : > { %v10192_v40 = vpack.c.bf16 %v11728_v36, %v11724_v33  ;;  %7015 = vmatprep.subr.bf16.mxu0 %v11357_v27  ;;  %7056 = vmatprep.subr.bf16.mxu1 %v11360_v32  ;;  %v11406_v31 = vld [vmem:[%s12160_s30 + $0x8ec] ss:$472 sps:$4 sm:$0xff]   ;;  %v11401_v32 = vld [vmem:[%s12160_s30 + $0x8e0] ss:$472 sps:$4 sm:$0xff]  }
 0x2bd   : > { %v13147_v43 = vrot.slane %v10191_v37, %v12502_v62  ;;  %7045 = vmatprep.mubr.bf16.mxu0 %v12048_v0  ;;  %7086 = vmatprep.mubr.bf16.mxu1 %v12048_v0  ;;  %v11404_v33 = vld [vmem:[%s12160_s30 + $0x8e8] ss:$472 sps:$4 sm:$0xff]   ;;  %v11409_v36 = vld [vmem:[%s12160_s30 + $0xc94] ss:$472 sps:$4 sm:$0xff]  }
 0x2be   : > { %v13152_v44 = vrot.slane %v10192_v40, %v12502_v62  ;;  %v11412_v37 = vld [vmem:[%s12160_s30 + $0xc9c] ss:$472 sps:$4 sm:$0xff]   ;;  %v11407_v40 = vld [vmem:[%s12160_s30 + $0xc90] ss:$472 sps:$4 sm:$0xff]  }
 0x2bf   : > { %7016 = vmatpush1.bf16.msra.mxu0 %v11355_v38  ;;  %7057 = vmatpush1.bf16.msra.mxu1 %v11358_v39 }
 0x2c0   : > { %v8275_v51 = vcombine.low %v13147_v43, %v13152_v44  ;;  %7017 = vmatprep.subr.bf16.mxu0 %v11363_v41  ;;  %7058 = vmatprep.subr.bf16.mxu1 %v11366_v42  ;;  %v11410_v41 = vld [vmem:[%s12160_s30 + $0xc98] ss:$472 sps:$4 sm:$0xff]   ;;  %v11416_v44 = vld [vmem:[%s12160_s30 + $0x1048] ss:$472 sps:$4 sm:$0xff]  }
 0x2c1   : > { %v11413_v43 = vld [vmem:[%s12160_s30 + $0x1040] ss:$472 sps:$4 sm:$0xff]  }
 0x2c2   : > { %v8283_v38 = vrot.slane %v8275_v51, %v12502_v62  ;;  %v11421_v51 = vld [vmem:[%s12160_s30 + $0x13f4] ss:$472 sps:$4 sm:$0xff]  }
 0x2c3   : > { %7018 = vmatpush1.bf16.msra.mxu0 %v11361_v45  ;;  %7059 = vmatpush1.bf16.msra.mxu1 %v11364_v48  ;;  %v11415_v45 = vld [vmem:[%s12160_s30 + $0x1044] ss:$472 sps:$4 sm:$0xff]  }
 0x2c4   : > { %7019 = vmatprep.subr.bf16.mxu0 %v11369_v46  ;;  %7060 = vmatprep.subr.bf16.mxu1 %v11372_v47  ;;  %v11418_v48 = vld [vmem:[%s12160_s30 + $0x104c] ss:$472 sps:$4 sm:$0xff]   ;;  %v11424_v46 = vld [vmem:[%s12160_s30 + $0x13fc] ss:$472 sps:$4 sm:$0xff]  }
 0x2c5   : > { %v922_v47 = vld [vmem:[%s12160_s30 + $0x17a0] sm:$0xff] }
 0x2c6   : > { %v10024_v58 = vcombine.high %v922_v47, %v922_v47 }
 0x2c7   : > { %7020 = vmatpush1.bf16.msra.mxu0 %v11367_v52  ;;  %7061 = vmatpush1.bf16.msra.mxu1 %v11370_v53 }
 0x2c8   : > { %7021 = vmatprep.subr.bf16.mxu0 %v11375_v54  ;;  %7062 = vmatprep.subr.bf16.mxu1 %v11378_v56  ;;  %v923_v54 = vld [vmem:[%s12160_s30 + $0x17a8] sm:$0xff] }
 0x2c9   : > { %v6391_v59 = vpop.f32.mrb[60].mxu0  ;;  %v6432_v60 = vpop.f32.mrb[60].mxu1  ;;  %v10026_v61 = vcombine.high %v923_v54, %v923_v54 }
 0x2ca   : > { %11729 = vtanh.f32 %v6391_v59  ;;  %v6393_v63 = vpop.f32.mrb[61].mxu0  ;;  %v6434_v1 = vpop.f32.mrb[61].mxu1 }
 0x2cb   : > { %11731 = vtanh.f32 %v6432_v60  ;;  %v6395_v9 = vpop.f32.mrb[62].mxu0  ;;  %7022 = vmatpush1.bf16.msra.mxu0 %v11373_v57  ;;  %7063 = vmatpush1.bf16.msra.mxu1 %v11376_v35  ;;  %v6436_v5 = vpop.f32.mrb[62].mxu1 }
 0x2cc   : > { %11733 = vtanh.f32 %v6393_v63  ;;  %v6396_v6 = vpop.f32.mrb[63].mxu0  ;;  %7023 = vmatprep.subr.bf16.mxu0 %v11381_v49  ;;  %7064 = vmatprep.subr.bf16.mxu1 %v11384_v55  ;;  %v6437_v12 = vpop.f32.mrb[63].mxu1  ;;  %v11419_v49 = vld [vmem:[%s12160_s30 + $0x13f0] ss:$472 sps:$4 sm:$0xff]   ;;  %v10023_v63 = vcombine.low %v922_v47, %v922_v47  ;;  %v11434_v5 = vld [vmem:[%s12160_s30 + $0x19c] ss:$472 sps:$4 sm:$0xff]  }
 0x2cd   : > { %11735 = vtanh.f32 %v6434_v1  ;;  %v11422_v55 = vld [vmem:[%s12160_s30 + $0x13f8] ss:$472 sps:$4 sm:$0xff]   ;;  %v10025_v1 = vcombine.low %v923_v54, %v923_v54  ;;  %v11440_v12 = vld [vmem:[%s12160_s30 + $0x54c] ss:$472 sps:$4 sm:$0xff]  }
 0x2ce   : > { %v11429_v6 = vld [vmem:[%s12160_s30 + $0x190] ss:$472 sps:$4 sm:$0xff]  }
 0x2cf   : > { %7024 = vmatpush1.bf16.msra.mxu0 %v11379_v10  ;;  %7065 = vmatpush1.bf16.msra.mxu1 %v11382_v2  ;;  %v5062_v10 = vsel %vm4772_vm0, %v10023_v63, 0  ;;  %v5068_v2 = vsel %vm4772_vm0, %v10025_v1, 0  ;;  %v13273_v1 = vld [vmem:[%s13882_s0] sm:$0x1] }
 0x2d0   : > { %10137 = vmatprep.subr.msk.bf16.mxu0 %vm4772_vm0, %v10020_v3  ;;  %10139 = vmatprep.subr.msk.bf16.mxu1 %vm4772_vm0, %v10022_v11  ;;  %v11431_v3 = vld [vmem:[%s12160_s30 + $0x194] ss:$472 sps:$4 sm:$0xff]   ;;  %v11432_v11 = vld [vmem:[%s12160_s30 + $0x198] ss:$472 sps:$4 sm:$0xff]  }
 0x2d3   : > { %7026 = vmatpush1.bf16.msra.mxu0 %v5050_v8  ;;  %7067 = vmatpush1.bf16.msra.mxu1 %v5056_v14 }
 0x2d4   : > { %v11730_v20 = vpop.eup %11729  ;;  %7095 = vmatprep.subr.bf16.mxu0 %v11391_v16  ;;  %7136 = vmatprep.subr.bf16.mxu1 %v11394_v17 }
 0x2d5   : > { %v11732_v23 = vpop.eup %11731 }
 0x2d6   : > { %v11734_v24 = vpop.eup %11733  ;;  %10138 = vmatmul.mubr.msk.bf16.vlgmr.msra.gmra.mrb[92].mxu0 %vm4768_vm1, %v13004_v4  ;;  %10140 = vmatmul.mubr.msk.bf16.vlgmr.msra.gmra.mrb[92].mxu1 %vm4768_vm1, %v13004_v4 }
 0x2d7   : > { %v11736_v26 = vpop.eup %11735  ;;  %v10193_v28 = vpack.c.bf16 %v11734_v24, %v11730_v20  ;;  %7096 = vmatpush1.bf16.msra.mxu0 %v11389_v18  ;;  %7137 = vmatpush1.bf16.msra.mxu1 %v11392_v19  ;;  %v11435_v18 = vld [vmem:[%s12160_s30 + $0x540] ss:$472 sps:$4 sm:$0xff]   ;;  %v11441_v24 = vld [vmem:[%s12160_s30 + $0x8f0] ss:$472 sps:$4 sm:$0xff]  }
 0x2d8   : > { %v10194_v29 = vpack.c.bf16 %v11736_v26, %v11732_v23  ;;  %7097 = vmatprep.subr.bf16.mxu0 %v11397_v21  ;;  %7138 = vmatprep.subr.bf16.mxu1 %v11400_v22  ;;  %v11438_v19 = vld [vmem:[%s12160_s30 + $0x548] ss:$472 sps:$4 sm:$0xff]   ;;  %v11443_v21 = vld [vmem:[%s12160_s30 + $0x8f4] ss:$472 sps:$4 sm:$0xff]   ;;  %v11444_v26 = vld [vmem:[%s12160_s30 + $0x8f8] ss:$472 sps:$4 sm:$0xff]  }
 0x2d9   : > { %v8267_v50 = vrot.slane %v10193_v28, %v12502_v62  ;;  %7127 = vmatprep.mubr.bf16.mxu0 %v12048_v0  ;;  %7168 = vmatprep.mubr.bf16.mxu1 %v12048_v0  ;;  %v11446_v22 = vld [vmem:[%s12160_s30 + $0x8fc] ss:$472 sps:$4 sm:$0xff]  }
 0x2da   : > { %v8274_v27 = vrot.slane %v10194_v29, %v12502_v62  ;;  %v11447_v29 = vld [vmem:[%s12160_s30 + $0xca0] ss:$472 sps:$4 sm:$0xff]  }
 0x2db   : > { %7098 = vmatpush1.bf16.msra.mxu0 %v11395_v25  ;;  %7139 = vmatpush1.bf16.msra.mxu1 %v11398_v7  ;;  %v11449_v25 = vld [vmem:[%s12160_s30 + $0xca4] ss:$472 sps:$4 sm:$0xff]  }
 0x2dc   : > { %v8276_v34 = vcombine.low %v8267_v50, %v8274_v27  ;;  %7099 = vmatprep.subr.bf16.mxu0 %v11403_v30  ;;  %7140 = vmatprep.subr.bf16.mxu1 %v11406_v31  ;;  %v11452_v7 = vld [vmem:[%s12160_s30 + $0xcac] ss:$472 sps:$4 sm:$0xff]   ;;  %v11450_v30 = vld [vmem:[%s12160_s30 + $0xca8] ss:$472 sps:$4 sm:$0xff]   ;;  %v11458_v50 = vld [vmem:[%s12160_s30 + $0x105c] ss:$472 sps:$4 sm:$0xff]  }
 0x2dd   : > { %v11455_v31 = vld [vmem:[%s12160_s30 + $0x1054] ss:$472 sps:$4 sm:$0xff]   ;;  %v11453_v27 = vld [vmem:[%s12160_s30 + $0x1050] ss:$472 sps:$4 sm:$0xff]  }
 0x2de   : > { %v8290_v39 = vrot.slane %v8276_v34, %v12502_v62  ;;  %v11464_v34 = vld [vmem:[%s12160_s30 + $0x140c] ss:$472 sps:$4 sm:$0xff]  }
 0x2df   : > { %7100 = vmatpush1.bf16.msra.mxu0 %v11401_v32  ;;  %7141 = vmatpush1.bf16.msra.mxu1 %v11404_v33  ;;  %v11456_v32 = vld [vmem:[%s12160_s30 + $0x1058] ss:$472 sps:$4 sm:$0xff]   ;;  %v11461_v33 = vld [vmem:[%s12160_s30 + $0x1404] ss:$472 sps:$4 sm:$0xff]  }
 0x2e0   : > { %v8291_v42 = vcombine.low %v8283_v38, %v8290_v39  ;;  %7101 = vmatprep.subr.bf16.mxu0 %v11409_v36  ;;  %7142 = vmatprep.subr.bf16.mxu1 %v11412_v37  ;;  %v924_v36 = vld [vmem:[%s12160_s30 + $0x17b0] sm:$0xff]  ;;  %v925_v39 = vld [vmem:[%s12160_s30 + $0x17b8] sm:$0xff] }
 0x2e1   : > { %v10027_v47 = vcombine.low %v924_v36, %v924_v36 }
 0x2e2   : > { %8648 = vst [vmem:[%s12581_s4 + $0x38] sm:$0xff] %v8291_v42 }
 0x2e3   : > { %7102 = vmatpush1.bf16.msra.mxu0 %v11407_v40  ;;  %7143 = vmatpush1.bf16.msra.mxu1 %v11410_v41  ;;  %v5074_v54 = vsel %vm4772_vm0, %v10027_v47, 0 }
 0x2e4   : > { %7103 = vmatprep.subr.bf16.mxu0 %v11415_v45  ;;  %7144 = vmatprep.subr.bf16.mxu1 %v11418_v48  ;;  %v11459_v45 = vld [vmem:[%s12160_s30 + $0x1400] ss:$472 sps:$4 sm:$0xff]  }
 0x2e5   : > { %v6473_v52 = vpop.f32.mrb[64].mxu0  ;;  %v6514_v53 = vpop.f32.mrb[64].mxu1  ;;  %v11462_v48 = vld [vmem:[%s12160_s30 + $0x1408] ss:$472 sps:$4 sm:$0xff]  }
 0x2e6   : > { %11737 = vtanh.f32 %v6473_v52  ;;  %v6475_v56 = vpop.f32.mrb[65].mxu0  ;;  %v6516_v57 = vpop.f32.mrb[65].mxu1  ;;  %v10029_v52 = vcombine.low %v925_v39, %v925_v39 }
 0x2e7   : > { %11739 = vtanh.f32 %v6514_v53  ;;  %v6477_v35 = vpop.f32.mrb[66].mxu0  ;;  %7104 = vmatpush1.bf16.msra.mxu0 %v11413_v43  ;;  %7145 = vmatpush1.bf16.msra.mxu1 %v11416_v44  ;;  %v6518_v59 = vpop.f32.mrb[66].mxu1  ;;  %v10028_v43 = vcombine.high %v924_v36, %v924_v36 }
 0x2e8   : > { %11741 = vtanh.f32 %v6475_v56  ;;  %v6478_v60 = vpop.f32.mrb[67].mxu0  ;;  %7105 = vmatprep.subr.bf16.mxu0 %v11421_v51  ;;  %7146 = vmatprep.subr.bf16.mxu1 %v11424_v46  ;;  %v6519_v9 = vpop.f32.mrb[67].mxu1  ;;  %v10030_v46 = vcombine.high %v925_v39, %v925_v39  ;;  %v5080_v56 = vsel %vm4772_vm0, %v10029_v52, 0  ;;  %v11474_v35 = vld [vmem:[%s12160_s30 + $0x1ac] ss:$472 sps:$4 sm:$0xff]  }
 0x2e9   : > { %11743 = vtanh.f32 %v6516_v57  ;;  %v11471_v57 = vld [vmem:[%s12160_s30 + $0x1a4] ss:$472 sps:$4 sm:$0xff]   ;;  %v11477_v59 = vld [vmem:[%s12160_s30 + $0x554] ss:$472 sps:$4 sm:$0xff]  }
 0x2ea   : > { %v11480_v60 = vld [vmem:[%s12160_s30 + $0x55c] ss:$472 sps:$4 sm:$0xff]  }
 0x2eb   : > { %7106 = vmatpush1.bf16.msra.mxu0 %v11419_v49  ;;  %7147 = vmatpush1.bf16.msra.mxu1 %v11422_v55  ;;  %v11469_v49 = vld [vmem:[%s12160_s30 + $0x1a0] ss:$472 sps:$4 sm:$0xff]   ;;  %v11517_v52 = vld [vmem:[%s12160_s30 + $0x564] ss:$472 sps:$4 sm:$0xff]  }
 0x2ec   : > { %10141 = vmatprep.subr.msk.bf16.mxu0 %vm4772_vm0, %v10024_v58  ;;  %10143 = vmatprep.subr.msk.bf16.mxu1 %vm4772_vm0, %v10026_v61  ;;  %v11472_v55 = vld [vmem:[%s12160_s30 + $0x1a8] ss:$472 sps:$4 sm:$0xff]  }
 0x2ef   : > { %7108 = vmatpush1.bf16.msra.mxu0 %v5062_v10  ;;  %7149 = vmatpush1.bf16.msra.mxu1 %v5068_v2  ;;  %v11475_v2 = vld [vmem:[%s12160_s30 + $0x550] ss:$472 sps:$4 sm:$0xff]  }
 0x2f0   : > { %v11738_v13 = vpop.eup %11737  ;;  %7177 = vmatprep.subr.bf16.mxu0 %v11431_v3  ;;  %7218 = vmatprep.subr.bf16.mxu1 %v11434_v5  ;;  %v11478_v3 = vld [vmem:[%s12160_s30 + $0x558] ss:$472 sps:$4 sm:$0xff]  }
 0x2f1   : > { %v11740_v8 = vpop.eup %11739 }
 0x2f2   : > { %v11742_v14 = vpop.eup %11741  ;;  %10142 = vmatmul.mubr.msk.bf16.vlgmr.msra.gmra.mrb[96].mxu0 %vm4768_vm1, %v13004_v4  ;;  %10144 = vmatmul.mubr.msk.bf16.vlgmr.msra.gmra.mrb[96].mxu1 %vm4768_vm1, %v13004_v4 }
 0x2f3   : > { %v11744_v16 = vpop.eup %11743  ;;  %v10195_v17 = vpack.c.bf16 %v11742_v14, %v11738_v13  ;;  %7178 = vmatpush1.bf16.msra.mxu0 %v11429_v6  ;;  %7219 = vmatpush1.bf16.msra.mxu1 %v11432_v11  ;;  %v11483_v6 = vld [vmem:[%s12160_s30 + $0x904] ss:$472 sps:$4 sm:$0xff]  }
 0x2f4   : > { %v10196_v20 = vpack.c.bf16 %v11744_v16, %v11740_v8  ;;  %7179 = vmatprep.subr.bf16.mxu0 %v11437_v15  ;;  %7220 = vmatprep.subr.bf16.mxu1 %v11440_v12  ;;  %v11486_v11 = vld [vmem:[%s12160_s30 + $0x90c] ss:$472 sps:$4 sm:$0xff]   ;;  %v11481_v12 = vld [vmem:[%s12160_s30 + $0x900] ss:$472 sps:$4 sm:$0xff]  }
 0x2f5   : > { %v13235_v23 = vrot.slane %v10195_v17, %v12502_v62  ;;  %7209 = vmatprep.mubr.bf16.mxu0 %v12048_v0  ;;  %7250 = vmatprep.mubr.bf16.mxu1 %v12048_v0  ;;  %v11484_v8 = vld [vmem:[%s12160_s30 + $0x908] ss:$472 sps:$4 sm:$0xff]   ;;  %v11489_v16 = vld [vmem:[%s12160_s30 + $0xcb4] ss:$472 sps:$4 sm:$0xff]  }
 0x2f6   : > { %v13240_v4 = vrot.slane %v10196_v20, %v12502_v62  ;;  %v11492_v17 = vld [vmem:[%s12160_s30 + $0xcbc] ss:$472 sps:$4 sm:$0xff]   ;;  %v11487_v20 = vld [vmem:[%s12160_s30 + $0xcb0] ss:$472 sps:$4 sm:$0xff]  }
 0x2f7   : > { %7180 = vmatpush1.bf16.msra.mxu0 %v11435_v18  ;;  %7221 = vmatpush1.bf16.msra.mxu1 %v11438_v19 }
 0x2f8   : > { %v8324_v28 = vcombine.low %v13235_v23, %v13240_v4  ;;  %7181 = vmatprep.subr.bf16.mxu0 %v11443_v21  ;;  %7222 = vmatprep.subr.bf16.mxu1 %v11446_v22  ;;  %v11490_v21 = vld [vmem:[%s12160_s30 + $0xcb8] ss:$472 sps:$4 sm:$0xff]   ;;  %v11496_v4 = vld [vmem:[%s12160_s30 + $0x1068] ss:$472 sps:$4 sm:$0xff]  }
 0x2f9   : > { %v11493_v23 = vld [vmem:[%s12160_s30 + $0x1060] ss:$472 sps:$4 sm:$0xff]  }
 0x2fa   : > { %v8332_v18 = vrot.slane %v8324_v28, %v12502_v62  ;;  %v11501_v28 = vld [vmem:[%s12160_s30 + $0x1414] ss:$472 sps:$4 sm:$0xff]  }
 0x2fb   : > { %7182 = vmatpush1.bf16.msra.mxu0 %v11441_v24  ;;  %7223 = vmatpush1.bf16.msra.mxu1 %v11444_v26  ;;  %v11495_v24 = vld [vmem:[%s12160_s30 + $0x1064] ss:$472 sps:$4 sm:$0xff]  }
 0x2fc   : > { %7183 = vmatprep.subr.bf16.mxu0 %v11449_v25  ;;  %7224 = vmatprep.subr.bf16.mxu1 %v11452_v7  ;;  %v11498_v26 = vld [vmem:[%s12160_s30 + $0x106c] ss:$472 sps:$4 sm:$0xff]   ;;  %v11504_v25 = vld [vmem:[%s12160_s30 + $0x141c] ss:$472 sps:$4 sm:$0xff]  }
 0x2fd   : > { %v926_v7 = vld [vmem:[%s12160_s30 + $0x17c0] sm:$0xff] }
 0x2fe   : > { %v10032_v36 = vcombine.high %v926_v7, %v926_v7 }
 0x2ff   : > { %7184 = vmatpush1.bf16.msra.mxu0 %v11447_v29  ;;  %7225 = vmatpush1.bf16.msra.mxu1 %v11450_v30 }
 0x300   : > { %7185 = vmatprep.subr.bf16.mxu0 %v11455_v31  ;;  %7226 = vmatprep.subr.bf16.mxu1 %v11458_v50  ;;  %v927_v31 = vld [vmem:[%s12160_s30 + $0x17c8] sm:$0xff] }
 0x301   : > { %v6555_v37 = vpop.f32.mrb[68].mxu0  ;;  %v6596_v38 = vpop.f32.mrb[68].mxu1  ;;  %v10034_v39 = vcombine.high %v927_v31, %v927_v31 }
 0x302   : > { %11745 = vtanh.f32 %v6555_v37  ;;  %v6557_v40 = vpop.f32.mrb[69].mxu0  ;;  %v6598_v41 = vpop.f32.mrb[69].mxu1 }
 0x303   : > { %11747 = vtanh.f32 %v6596_v38  ;;  %v6559_v42 = vpop.f32.mrb[70].mxu0  ;;  %7186 = vmatpush1.bf16.msra.mxu0 %v11453_v27  ;;  %7227 = vmatpush1.bf16.msra.mxu1 %v11456_v32  ;;  %v6600_v44 = vpop.f32.mrb[70].mxu1 }
 0x304   : > { %11749 = vtanh.f32 %v6557_v40  ;;  %v6560_v51 = vpop.f32.mrb[71].mxu0  ;;  %7187 = vmatprep.subr.bf16.mxu0 %v11461_v33  ;;  %7228 = vmatprep.subr.bf16.mxu1 %v11464_v34  ;;  %v6601_v53 = vpop.f32.mrb[71].mxu1  ;;  %v11499_v33 = vld [vmem:[%s12160_s30 + $0x1410] ss:$472 sps:$4 sm:$0xff]   ;;  %v10031_v40 = vcombine.low %v926_v7, %v926_v7  ;;  %v11514_v44 = vld [vmem:[%s12160_s30 + $0x1bc] ss:$472 sps:$4 sm:$0xff]  }
 0x305   : > { %11751 = vtanh.f32 %v6598_v41  ;;  %v11502_v34 = vld [vmem:[%s12160_s30 + $0x1418] ss:$472 sps:$4 sm:$0xff]   ;;  %v10033_v41 = vcombine.low %v927_v31, %v927_v31  ;;  %v11520_v53 = vld [vmem:[%s12160_s30 + $0x56c] ss:$472 sps:$4 sm:$0xff]  }
 0x306   : > { %v11509_v51 = vld [vmem:[%s12160_s30 + $0x1b0] ss:$472 sps:$4 sm:$0xff]  }
 0x307   : > { %7188 = vmatpush1.bf16.msra.mxu0 %v11459_v45  ;;  %7229 = vmatpush1.bf16.msra.mxu1 %v11462_v48  ;;  %v5086_v45 = vsel %vm4772_vm0, %v10031_v40, 0  ;;  %v5092_v48 = vsel %vm4772_vm0, %v10033_v41, 0 }
 0x308   : > { %10145 = vmatprep.subr.msk.bf16.mxu0 %vm4772_vm0, %v10028_v43  ;;  %10147 = vmatprep.subr.msk.bf16.mxu1 %vm4772_vm0, %v10030_v46  ;;  %v11511_v43 = vld [vmem:[%s12160_s30 + $0x1b4] ss:$472 sps:$4 sm:$0xff]   ;;  %v11512_v46 = vld [vmem:[%s12160_s30 + $0x1b8] ss:$472 sps:$4 sm:$0xff]  }
 0x30b   : > { %7190 = vmatpush1.bf16.msra.mxu0 %v5074_v54  ;;  %7231 = vmatpush1.bf16.msra.mxu1 %v5080_v56 }
 0x30c   : > { %v11746_v58 = vpop.eup %11745  ;;  %7259 = vmatprep.subr.bf16.mxu0 %v11471_v57  ;;  %7300 = vmatprep.subr.bf16.mxu1 %v11474_v35 }
 0x30d   : > { %v11748_v61 = vpop.eup %11747 }
 0x30e   : > { %v11750_v63 = vpop.eup %11749  ;;  %10146 = vmatmul.mubr.msk.bf16.vlgmr.msra.gmra.mrb[100].mxu0 %vm4768_vm1, %v13273_v1  ;;  %10148 = vmatmul.mubr.msk.bf16.vlgmr.msra.gmra.mrb[100].mxu1 %vm4768_vm1, %v13273_v1 }
 0x30f   : > { %v11752_v9 = vpop.eup %11751  ;;  %v10197_v10 = vpack.c.bf16 %v11750_v63, %v11746_v58  ;;  %7260 = vmatpush1.bf16.msra.mxu0 %v11469_v49  ;;  %7301 = vmatpush1.bf16.msra.mxu1 %v11472_v55  ;;  %v11515_v49 = vld [vmem:[%s12160_s30 + $0x560] ss:$472 sps:$4 sm:$0xff]  }
 0x310   : > { %v10198_v5 = vpack.c.bf16 %v11752_v9, %v11748_v61  ;;  %7261 = vmatprep.subr.bf16.mxu0 %v11477_v59  ;;  %7302 = vmatprep.subr.bf16.mxu1 %v11480_v60  ;;  %v11518_v55 = vld [vmem:[%s12160_s30 + $0x568] ss:$472 sps:$4 sm:$0xff]   ;;  %v11523_v59 = vld [vmem:[%s12160_s30 + $0x914] ss:$472 sps:$4 sm:$0xff]  }
 0x311   : > { %v8316_v13 = vrot.slane %v10197_v10, %v12502_v62  ;;  %7291 = vmatprep.mubr.bf16.mxu0 %v12048_v0  ;;  %7332 = vmatprep.mubr.bf16.mxu1 %v12048_v0  ;;  %v11526_v60 = vld [vmem:[%s12160_s30 + $0x91c] ss:$472 sps:$4 sm:$0xff]   ;;  %v11521_v9 = vld [vmem:[%s12160_s30 + $0x910] ss:$472 sps:$4 sm:$0xff]  }
 0x312   : > { %v8323_v15 = vrot.slane %v10198_v5, %v12502_v62  ;;  %v11524_v10 = vld [vmem:[%s12160_s30 + $0x918] ss:$472 sps:$4 sm:$0xff]   ;;  %v11532_v5 = vld [vmem:[%s12160_s30 + $0xccc] ss:$472 sps:$4 sm:$0xff]  }
 0x313   : > { %7262 = vmatpush1.bf16.msra.mxu0 %v11475_v2  ;;  %7303 = vmatpush1.bf16.msra.mxu1 %v11478_v3  ;;  %v11529_v3 = vld [vmem:[%s12160_s30 + $0xcc4] ss:$472 sps:$4 sm:$0xff]  }
 0x314   : > { %v8325_v14 = vcombine.low %v8316_v13, %v8323_v15  ;;  %7263 = vmatprep.subr.bf16.mxu0 %v11483_v6  ;;  %7304 = vmatprep.subr.bf16.mxu1 %v11486_v11  ;;  %v11527_v6 = vld [vmem:[%s12160_s30 + $0xcc0] ss:$472 sps:$4 sm:$0xff]   ;;  %v11535_v13 = vld [vmem:[%s12160_s30 + $0x1074] ss:$472 sps:$4 sm:$0xff]  }
 0x315   : > { %v11530_v11 = vld [vmem:[%s12160_s30 + $0xcc8] ss:$472 sps:$4 sm:$0xff]   ;;  %v11538_v15 = vld [vmem:[%s12160_s30 + $0x107c] ss:$472 sps:$4 sm:$0xff]  }
 0x316   : > { %v8339_v19 = vrot.slane %v8325_v14, %v12502_v62  ;;  %v11541_v14 = vld [vmem:[%s12160_s30 + $0x1424] ss:$472 sps:$4 sm:$0xff]  }
 0x317   : > { %7264 = vmatpush1.bf16.msra.mxu0 %v11481_v12  ;;  %7305 = vmatpush1.bf16.msra.mxu1 %v11484_v8  ;;  %v11533_v12 = vld [vmem:[%s12160_s30 + $0x1070] ss:$472 sps:$4 sm:$0xff]  }
 0x318   : > { %v8340_v22 = vcombine.low %v8332_v18, %v8339_v19  ;;  %7265 = vmatprep.subr.bf16.mxu0 %v11489_v16  ;;  %7306 = vmatprep.subr.bf16.mxu1 %v11492_v17  ;;  %v11536_v8 = vld [vmem:[%s12160_s30 + $0x1078] ss:$472 sps:$4 sm:$0xff]   ;;  %v11544_v16 = vld [vmem:[%s12160_s30 + $0x142c] ss:$472 sps:$4 sm:$0xff]  }
 0x319   : > { %v928_v17 = vld [vmem:[%s12160_s30 + $0x17d0] sm:$0xff] }
 0x31a   : > { %8649 = vst [vmem:[%s12581_s4 + $0x40] sm:$0xff] %v8340_v22 }
 0x31b   : > { %7266 = vmatpush1.bf16.msra.mxu0 %v11487_v20  ;;  %7307 = vmatpush1.bf16.msra.mxu1 %v11490_v21  ;;  %v929_v20 = vld [vmem:[%s12160_s30 + $0x17d8] sm:$0xff] }
 0x31c   : > { %7267 = vmatprep.subr.bf16.mxu0 %v11495_v24  ;;  %7308 = vmatprep.subr.bf16.mxu1 %v11498_v26  ;;  %v11539_v26 = vld [vmem:[%s12160_s30 + $0x1420] ss:$472 sps:$4 sm:$0xff]   ;;  %v10038_v7 = vcombine.high %v929_v20, %v929_v20 }
 0x31d   : > { %v6637_v29 = vpop.f32.mrb[72].mxu0  ;;  %v6678_v30 = vpop.f32.mrb[72].mxu1 }
 0x31e   : > { %11753 = vtanh.f32 %v6637_v29  ;;  %v6639_v50 = vpop.f32.mrb[73].mxu0  ;;  %v6680_v27 = vpop.f32.mrb[73].mxu1  ;;  %v10035_v29 = vcombine.low %v928_v17, %v928_v17 }
 0x31f   : > { %11755 = vtanh.f32 %v6678_v30  ;;  %v6641_v32 = vpop.f32.mrb[74].mxu0  ;;  %7268 = vmatpush1.bf16.msra.mxu0 %v11493_v23  ;;  %7309 = vmatpush1.bf16.msra.mxu1 %v11496_v4  ;;  %v6682_v37 = vpop.f32.mrb[74].mxu1  ;;  %v11542_v23 = vld [vmem:[%s12160_s30 + $0x1428] ss:$472 sps:$4 sm:$0xff]   ;;  %v10036_v4 = vcombine.high %v928_v17, %v928_v17  ;;  %v10037_v30 = vcombine.low %v929_v20, %v929_v20 }
 0x320   : > { %11757 = vtanh.f32 %v6639_v50  ;;  %v6642_v38 = vpop.f32.mrb[75].mxu0  ;;  %7269 = vmatprep.subr.bf16.mxu0 %v11501_v28  ;;  %7310 = vmatprep.subr.bf16.mxu1 %v11504_v25  ;;  %v6683_v42 = vpop.f32.mrb[75].mxu1  ;;  %v5098_v50 = vsel %vm4772_vm0, %v10035_v29, 0  ;;  %v11551_v32 = vld [vmem:[%s12160_s30 + $0x1c4] ss:$472 sps:$4 sm:$0xff]  }
 0x321   : > { %11759 = vtanh.f32 %v6680_v27  ;;  %v5104_v27 = vsel %vm4772_vm0, %v10037_v30, 0  ;;  %v11557_v38 = vld [vmem:[%s12160_s30 + $0x574] ss:$472 sps:$4 sm:$0xff]  }
 0x323   : > { %7270 = vmatpush1.bf16.msra.mxu0 %v11499_v33  ;;  %7311 = vmatpush1.bf16.msra.mxu1 %v11502_v34  ;;  %v11554_v33 = vld [vmem:[%s12160_s30 + $0x1cc] ss:$472 sps:$4 sm:$0xff]   ;;  %v11549_v34 = vld [vmem:[%s12160_s30 + $0x1c0] ss:$472 sps:$4 sm:$0xff]  }
 0x324   : > { %10149 = vmatprep.subr.msk.bf16.mxu0 %vm4772_vm0, %v10032_v36  ;;  %10151 = vmatprep.subr.msk.bf16.mxu1 %vm4772_vm0, %v10034_v39  ;;  %v11552_v36 = vld [vmem:[%s12160_s30 + $0x1c8] ss:$472 sps:$4 sm:$0xff]   ;;  %v11560_v39 = vld [vmem:[%s12160_s30 + $0x57c] ss:$472 sps:$4 sm:$0xff]  }
 0x327   : > { %7272 = vmatpush1.bf16.msra.mxu0 %v5086_v45  ;;  %7313 = vmatpush1.bf16.msra.mxu1 %v5092_v48  ;;  %v11555_v48 = vld [vmem:[%s12160_s30 + $0x570] ss:$472 sps:$4 sm:$0xff]  }
 0x328   : > { %v11754_v47 = vpop.eup %11753  ;;  %7341 = vmatprep.subr.bf16.mxu0 %v11511_v43  ;;  %7382 = vmatprep.subr.bf16.mxu1 %v11514_v44  ;;  %v11558_v43 = vld [vmem:[%s12160_s30 + $0x578] ss:$472 sps:$4 sm:$0xff]  }
 0x329   : > { %v11756_v54 = vpop.eup %11755 }
 0x32a   : > { %v11758_v56 = vpop.eup %11757  ;;  %10150 = vmatmul.mubr.msk.bf16.vlgmr.msra.gmra.mrb[104].mxu0 %vm4768_vm1, %v13273_v1  ;;  %10152 = vmatmul.mubr.msk.bf16.vlgmr.msra.gmra.mrb[104].mxu1 %vm4768_vm1, %v13273_v1 }
 0x32b   : > { %v11760_v57 = vpop.eup %11759  ;;  %v10199_v35 = vpack.c.bf16 %v11758_v56, %v11754_v47  ;;  %7342 = vmatpush1.bf16.msra.mxu0 %v11509_v51  ;;  %7383 = vmatpush1.bf16.msra.mxu1 %v11512_v46  ;;  %v11563_v51 = vld [vmem:[%s12160_s30 + $0x924] ss:$472 sps:$4 sm:$0xff]  }
 0x32c   : > { %v10200_v58 = vpack.c.bf16 %v11760_v57, %v11756_v54  ;;  %7343 = vmatprep.subr.bf16.mxu0 %v11517_v52  ;;  %7384 = vmatprep.subr.bf16.mxu1 %v11520_v53  ;;  %v11566_v46 = vld [vmem:[%s12160_s30 + $0x92c] ss:$472 sps:$4 sm:$0xff]   ;;  %v11561_v53 = vld [vmem:[%s12160_s30 + $0x920] ss:$472 sps:$4 sm:$0xff]  }
 0x32d   : > { %v13328_v61 = vrot.slane %v10199_v35, %v12502_v62  ;;  %7373 = vmatprep.mubr.bf16.mxu0 %v12048_v0  ;;  %7414 = vmatprep.mubr.bf16.mxu1 %v12048_v0  ;;  %v11564_v54 = vld [vmem:[%s12160_s30 + $0x928] ss:$472 sps:$4 sm:$0xff]   ;;  %v11569_v57 = vld [vmem:[%s12160_s30 + $0xcd4] ss:$472 sps:$4 sm:$0xff]  }
 0x32e   : > { %v13333_v63 = vrot.slane %v10200_v58, %v12502_v62  ;;  %v11572_v35 = vld [vmem:[%s12160_s30 + $0xcdc] ss:$472 sps:$4 sm:$0xff]   ;;  %v11567_v58 = vld [vmem:[%s12160_s30 + $0xcd0] ss:$472 sps:$4 sm:$0xff]  }
 0x32f   : > { %7344 = vmatpush1.bf16.msra.mxu0 %v11515_v49  ;;  %7385 = vmatpush1.bf16.msra.mxu1 %v11518_v55 }
 0x330   : > { %v8373_v2 = vcombine.low %v13328_v61, %v13333_v63  ;;  %7345 = vmatprep.subr.bf16.mxu0 %v11523_v59  ;;  %7386 = vmatprep.subr.bf16.mxu1 %v11526_v60  ;;  %v11570_v59 = vld [vmem:[%s12160_s30 + $0xcd8] ss:$472 sps:$4 sm:$0xff]   ;;  %v11576_v63 = vld [vmem:[%s12160_s30 + $0x1088] ss:$472 sps:$4 sm:$0xff]  }
 0x331   : > { %v11573_v61 = vld [vmem:[%s12160_s30 + $0x1080] ss:$472 sps:$4 sm:$0xff]  }
 0x332   : > { %v8381_v49 = vrot.slane %v8373_v2, %v12502_v62  ;;  %v11581_v2 = vld [vmem:[%s12160_s30 + $0x1434] ss:$472 sps:$4 sm:$0xff]  }
 0x333   : > { %7346 = vmatpush1.bf16.msra.mxu0 %v11521_v9  ;;  %7387 = vmatpush1.bf16.msra.mxu1 %v11524_v10  ;;  %v11575_v9 = vld [vmem:[%s12160_s30 + $0x1084] ss:$472 sps:$4 sm:$0xff]  }
 0x334   : > { %7347 = vmatprep.subr.bf16.mxu0 %v11529_v3  ;;  %7388 = vmatprep.subr.bf16.mxu1 %v11532_v5  ;;  %v11578_v10 = vld [vmem:[%s12160_s30 + $0x108c] ss:$472 sps:$4 sm:$0xff]   ;;  %v11584_v3 = vld [vmem:[%s12160_s30 + $0x143c] ss:$472 sps:$4 sm:$0xff]  }
 0x335   : > { %v930_v5 = vld [vmem:[%s12160_s30 + $0x17e0] sm:$0xff] }
 0x336   : > { %v10040_v17 = vcombine.high %v930_v5, %v930_v5 }
 0x337   : > { %7348 = vmatpush1.bf16.msra.mxu0 %v11527_v6  ;;  %7389 = vmatpush1.bf16.msra.mxu1 %v11530_v11 }
 0x338   : > { %7349 = vmatprep.subr.bf16.mxu0 %v11535_v13  ;;  %7390 = vmatprep.subr.bf16.mxu1 %v11538_v15  ;;  %v931_v13 = vld [vmem:[%s12160_s30 + $0x17e8] sm:$0xff] }
 0x339   : > { %v6719_v18 = vpop.f32.mrb[76].mxu0  ;;  %v6760_v19 = vpop.f32.mrb[76].mxu1  ;;  %v10042_v20 = vcombine.high %v931_v13, %v931_v13 }
 0x33a   : > { %11761 = vtanh.f32 %v6719_v18  ;;  %v6721_v21 = vpop.f32.mrb[77].mxu0  ;;  %v6762_v22 = vpop.f32.mrb[77].mxu1 }
 0x33b   : > { %11763 = vtanh.f32 %v6760_v19  ;;  %v6723_v24 = vpop.f32.mrb[78].mxu0  ;;  %7350 = vmatpush1.bf16.msra.mxu0 %v11533_v12  ;;  %7391 = vmatpush1.bf16.msra.mxu1 %v11536_v8  ;;  %v6764_v28 = vpop.f32.mrb[78].mxu1 }
 0x33c   : > { %11765 = vtanh.f32 %v6721_v21  ;;  %v6724_v25 = vpop.f32.mrb[79].mxu0  ;;  %7351 = vmatprep.subr.bf16.mxu0 %v11541_v14  ;;  %7392 = vmatprep.subr.bf16.mxu1 %v11544_v16  ;;  %v6765_v31 = vpop.f32.mrb[79].mxu1  ;;  %v11579_v14 = vld [vmem:[%s12160_s30 + $0x1430] ss:$472 sps:$4 sm:$0xff]   ;;  %v10039_v21 = vcombine.low %v930_v5, %v930_v5 }
 0x33d   : > { %11767 = vtanh.f32 %v6762_v22  ;;  %v11582_v16 = vld [vmem:[%s12160_s30 + $0x1438] ss:$472 sps:$4 sm:$0xff]   ;;  %v10041_v22 = vcombine.low %v931_v13, %v931_v13 }
 0x33e   : > { %v11589_v28 = vld [vmem:[%s12160_s30 + $0x1d0] ss:$472 sps:$4 sm:$0xff]  }
 0x33f   : > { %7352 = vmatpush1.bf16.msra.mxu0 %v11539_v26  ;;  %7393 = vmatpush1.bf16.msra.mxu1 %v11542_v23  ;;  %v5110_v26 = vsel %vm4772_vm0, %v10039_v21, 0  ;;  %v5116_v23 = vsel %vm4772_vm0, %v10041_v22, 0 }
 0x340   : > { %10153 = vmatprep.subr.msk.bf16.mxu0 %vm4772_vm0, %v10036_v4  ;;  %10155 = vmatprep.subr.msk.bf16.mxu1 %vm4772_vm0, %v10038_v7  ;;  %v11591_v4 = vld [vmem:[%s12160_s30 + $0x1d4] ss:$472 sps:$4 sm:$0xff]   ;;  %v11594_v7 = vld [vmem:[%s12160_s30 + $0x584] ss:$472 sps:$4 sm:$0xff]  }
 0x343   : > { %7354 = vmatpush1.bf16.msra.mxu0 %v5098_v50  ;;  %7395 = vmatpush1.bf16.msra.mxu1 %v5104_v27  ;;  %v11592_v27 = vld [vmem:[%s12160_s30 + $0x580] ss:$472 sps:$4 sm:$0xff]  }
 0x344   : > { %v11762_v37 = vpop.eup %11761  ;;  %7423 = vmatprep.subr.bf16.mxu0 %v11551_v32  ;;  %7464 = vmatprep.subr.bf16.mxu1 %v11554_v33  ;;  %v11597_v33 = vld [vmem:[%s12160_s30 + $0x934] ss:$472 sps:$4 sm:$0xff]  }
 0x345   : > { %v11764_v40 = vpop.eup %11763 }
 0x346   : > { %v11766_v41 = vpop.eup %11765  ;;  %10154 = vmatmul.mubr.msk.bf16.vlgmr.msra.gmra.mrb[108].mxu0 %vm4768_vm1, %v13273_v1  ;;  %10156 = vmatmul.mubr.msk.bf16.vlgmr.msra.gmra.mrb[108].mxu1 %vm4768_vm1, %v13273_v1 }
 0x347   : > { %v11768_v42 = vpop.eup %11767  ;;  %v10201_v45 = vpack.c.bf16 %v11766_v41, %v11762_v37  ;;  %7424 = vmatpush1.bf16.msra.mxu0 %v11549_v34  ;;  %7465 = vmatpush1.bf16.msra.mxu1 %v11552_v36  ;;  %v11595_v37 = vld [vmem:[%s12160_s30 + $0x930] ss:$472 sps:$4 sm:$0xff]  }
 0x348   : > { %v10202_v44 = vpack.c.bf16 %v11768_v42, %v11764_v40  ;;  %7425 = vmatprep.subr.bf16.mxu0 %v11557_v38  ;;  %7466 = vmatprep.subr.bf16.mxu1 %v11560_v39  ;;  %v11600_v39 = vld [vmem:[%s12160_s30 + $0xce4] ss:$472 sps:$4 sm:$0xff]   ;;  %v11598_v40 = vld [vmem:[%s12160_s30 + $0xce0] ss:$472 sps:$4 sm:$0xff]   ;;  %v11601_v41 = vld [vmem:[%s12160_s30 + $0x1090] ss:$472 sps:$4 sm:$0xff]  }
 0x349   : > { %v8365_v47 = vrot.slane %v10201_v45, %v12502_v62  ;;  %7455 = vmatprep.mubr.bf16.mxu0 %v12048_v0  ;;  %7496 = vmatprep.mubr.bf16.mxu1 %v12048_v0  ;;  %v11606_v42 = vld [vmem:[%s12160_s30 + $0x1444] ss:$472 sps:$4 sm:$0xff]  }
 0x34a   : > { %v8372_v52 = vrot.slane %v10202_v44, %v12502_v62 }
 0x34b   : > { %7426 = vmatpush1.bf16.msra.mxu0 %v11555_v48  ;;  %7467 = vmatpush1.bf16.msra.mxu1 %v11558_v43  ;;  %v932_v43 = vld [vmem:[%s12160_s30 + $0x17f0] sm:$0xff] }
 0x34c   : > { %v8374_v56 = vcombine.low %v8365_v47, %v8372_v52  ;;  %7427 = vmatprep.subr.bf16.mxu0 %v11563_v51  ;;  %7468 = vmatprep.subr.bf16.mxu1 %v11566_v46  ;;  %v11604_v47 = vld [vmem:[%s12160_s30 + $0x1440] ss:$472 sps:$4 sm:$0xff]  }
 0x34e   : > { %v8388_v55 = vrot.slane %v8374_v56, %v12502_v62  ;;  %v10043_v56 = vcombine.low %v932_v43, %v932_v43 }
 0x34f   : > { %7428 = vmatpush1.bf16.msra.mxu0 %v11561_v53  ;;  %7469 = vmatpush1.bf16.msra.mxu1 %v11564_v54  ;;  %v10044_v54 = vcombine.high %v932_v43, %v932_v43 }
 0x350   : > { %v8389_v60 = vcombine.low %v8381_v49, %v8388_v55  ;;  %7429 = vmatprep.subr.bf16.mxu0 %v11569_v57  ;;  %7470 = vmatprep.subr.bf16.mxu1 %v11572_v35  ;;  %v5122_v35 = vsel %vm4772_vm0, %v10043_v56, 0 }
 0x352   : > { %8650 = vst [vmem:[%s12581_s4 + $0x48] sm:$0xff] %v8389_v60 }
 0x353   : > { %7430 = vmatpush1.bf16.msra.mxu0 %v11567_v58  ;;  %7471 = vmatpush1.bf16.msra.mxu1 %v11570_v59 }
 0x354   : > { %7431 = vmatprep.subr.bf16.mxu0 %v11575_v9  ;;  %7472 = vmatprep.subr.bf16.mxu1 %v11578_v10 }
 0x355   : > { %v6801_v6 = vpop.f32.mrb[80].mxu0  ;;  %v6842_v11 = vpop.f32.mrb[80].mxu1 }
 0x356   : > { %11769 = vtanh.f32 %v6801_v6  ;;  %v6803_v15 = vpop.f32.mrb[81].mxu0  ;;  %v6844_v12 = vpop.f32.mrb[81].mxu1 }
 0x357   : > { %11771 = vtanh.f32 %v6842_v11  ;;  %v6805_v8 = vpop.f32.mrb[82].mxu0  ;;  %7432 = vmatpush1.bf16.msra.mxu0 %v11573_v61  ;;  %7473 = vmatpush1.bf16.msra.mxu1 %v11576_v63  ;;  %v6846_v18 = vpop.f32.mrb[82].mxu1 }
 0x358   : > { %11773 = vtanh.f32 %v6803_v15  ;;  %v6806_v19 = vpop.f32.mrb[83].mxu0  ;;  %7433 = vmatprep.subr.bf16.mxu0 %v11581_v2  ;;  %7474 = vmatprep.subr.bf16.mxu1 %v11584_v3  ;;  %v6847_v24 = vpop.f32.mrb[83].mxu1 }
 0x359   : > { %11775 = vtanh.f32 %v6844_v12 }
 0x35b   : > { %7434 = vmatpush1.bf16.msra.mxu0 %v11579_v14  ;;  %7475 = vmatpush1.bf16.msra.mxu1 %v11582_v16 }
 0x35c   : > { %10157 = vmatprep.subr.msk.bf16.mxu0 %vm4772_vm0, %v10040_v17  ;;  %10159 = vmatprep.subr.msk.bf16.mxu1 %vm4772_vm0, %v10042_v20 }
 0x35f   : > { %7436 = vmatpush1.bf16.msra.mxu0 %v5110_v26  ;;  %7477 = vmatpush1.bf16.msra.mxu1 %v5116_v23 }
 0x360   : > { %v11770_v25 = vpop.eup %11769  ;;  %7505 = vmatprep.subr.bf16.mxu0 %v11591_v4 }
 0x361   : > { %v11772_v29 = vpop.eup %11771 }
 0x362   : > { %v11774_v30 = vpop.eup %11773  ;;  %10158 = vmatmul.mubr.msk.bf16.vlgmr.msra.gmra.mrb[112].mxu0 %vm4768_vm1, %v13273_v1  ;;  %10160 = vmatmul.mubr.msk.bf16.vlgmr.msra.gmra.mrb[112].mxu1 %vm4768_vm1, %v13273_v1 }
 0x363   : > { %v11776_v31 = vpop.eup %11775  ;;  %v10203_v50 = vpack.c.bf16 %v11774_v30, %v11770_v25  ;;  %7506 = vmatpush1.bf16.msra.mxu0 %v11589_v28  ;;  %7537 = vmatprep.mubr.bf16.mxu0 %v12048_v0  ;;  %v11603_v0 = vld [vmem:[%s12160_s30 + $0x1094] ss:$472 sps:$4 sm:$0xff]  }
 0x364   : > { %v10204_v32 = vpack.c.bf16 %v11776_v31, %v11772_v29  ;;  %7507 = vmatprep.subr.bf16.mxu0 %v11594_v7 }
 0x365   : > { %v8400_v34 = vrot.slane %v10203_v50, %v12502_v62 }
 0x366   : > { %v8407_v36 = vrot.slane %v10204_v32, %v12502_v62 }
 0x367   : > { %7508 = vmatpush1.bf16.msra.mxu0 %v11592_v27 }
 0x368   : > { %v8422_v38 = vcombine.low %v8400_v34, %v8407_v36  ;;  %7509 = vmatprep.subr.bf16.mxu0 %v11597_v33 }
 0x36a   : > { %v8430_v2 = vrot.slane %v8422_v38, %v12502_v62 }
 0x36b   : > { %7510 = vmatpush1.bf16.msra.mxu0 %v11595_v37 }
 0x36c   : > { %7511 = vmatprep.subr.bf16.mxu0 %v11600_v39 }
 0x36f   : > { %7512 = vmatpush1.bf16.msra.mxu0 %v11598_v40 }
 0x370   : > { %7513 = vmatprep.subr.bf16.mxu0 %v11603_v0 }
 0x371   : > { %v6883_v45 = vpop.f32.mrb[84].mxu0  ;;  %v6924_v48 = vpop.f32.mrb[84].mxu1 }
 0x372   : > { %11777 = vtanh.f32 %v6883_v45  ;;  %v6885_v44 = vpop.f32.mrb[85].mxu0  ;;  %v6926_v51 = vpop.f32.mrb[85].mxu1 }
 0x373   : > { %11779 = vtanh.f32 %v6924_v48  ;;  %v6887_v46 = vpop.f32.mrb[86].mxu0  ;;  %7514 = vmatpush1.bf16.msra.mxu0 %v11601_v41  ;;  %v6928_v52 = vpop.f32.mrb[86].mxu1 }
 0x374   : > { %11781 = vtanh.f32 %v6885_v44  ;;  %v6888_v53 = vpop.f32.mrb[87].mxu0  ;;  %7515 = vmatprep.subr.bf16.mxu0 %v11606_v42  ;;  %v6929_v57 = vpop.f32.mrb[87].mxu1 }
 0x375   : > { %11783 = vtanh.f32 %v6926_v51 }
 0x377   : > { %7516 = vmatpush1.bf16.msra.mxu0 %v11604_v47 }
 0x378   : > { %10161 = vmatprep.subr.msk.bf16.mxu0 %vm4772_vm0, %v10044_v54 }
 0x37b   : > { %7518 = vmatpush1.bf16.msra.mxu0 %v5122_v35 }
 0x37c   : > { %v11778_v49 = vpop.eup %11777 }
 0x37d   : > { %v11780_v55 = vpop.eup %11779 }
 0x37e   : > { %v11782_v58 = vpop.eup %11781  ;;  %10162 = vmatmul.mubr.msk.bf16.vlgmr.msra.gmra.mrb[116].mxu0 %vm4768_vm1, %v13273_v1 }
 0x37f   : > { %v11784_v59 = vpop.eup %11783  ;;  %v10205_v60 = vpack.c.bf16 %v11782_v58, %v11778_v49 }
 0x380   : > { %v10206_v9 = vpack.c.bf16 %v11784_v59, %v11780_v55 }
 0x381   : > { %v8414_v10 = vrot.slane %v10205_v60, %v12502_v62 }
 0x382   : > { %v8421_v61 = vrot.slane %v10206_v9, %v12502_v62 }
 0x384   : > { %v8423_v63 = vcombine.low %v8414_v10, %v8421_v61 }
 0x386   : > { %v8437_v3 = vrot.slane %v8423_v63, %v12502_v62 }
 0x388   : > { %v8438_v5 = vcombine.low %v8430_v2, %v8437_v3 }
 0x38a   : > { %8651 = vst [vmem:[%s12581_s4 + $0x50] sm:$0xff] %v8438_v5 }
 0x38d   : > { %v6965_v6 = vpop.f32.mrb[88].mxu0  ;;  %v7006_v11 = vpop.f32.mrb[88].mxu1 }
 0x38e   : > { %11785 = vtanh.f32 %v6965_v6  ;;  %v6967_v13 = vpop.f32.mrb[89].mxu0  ;;  %v7008_v15 = vpop.f32.mrb[89].mxu1 }
 0x38f   : > { %11787 = vtanh.f32 %v7006_v11  ;;  %v6969_v1 = vpop.f32.mrb[90].mxu0  ;;  %v7010_v12 = vpop.f32.mrb[90].mxu1 }
 0x390   : > { %11789 = vtanh.f32 %v6967_v13  ;;  %v6970_v8 = vpop.f32.mrb[91].mxu0  ;;  %v7011_v14 = vpop.f32.mrb[91].mxu1 }
 0x391   : > { %11791 = vtanh.f32 %v7008_v15 }
 0x398   : > { %v11786_v16 = vpop.eup %11785 }
 0x399   : > { %v11788_v17 = vpop.eup %11787 }
 0x39a   : > { %v11790_v18 = vpop.eup %11789 }
 0x39b   : > { %v11792_v19 = vpop.eup %11791  ;;  %v10207_v20 = vpack.c.bf16 %v11790_v18, %v11786_v16 }
 0x39c   : > { %v10208_v21 = vpack.c.bf16 %v11792_v19, %v11788_v17 }
 0x39d   : > { %v8449_v22 = vrot.slane %v10207_v20, %v12502_v62 }
 0x39e   : > { %v8456_v24 = vrot.slane %v10208_v21, %v12502_v62 }
 0x3a0   : > { %v8471_v26 = vcombine.low %v8449_v22, %v8456_v24 }
 0x3a2   : > { %v8479_v40 = vrot.slane %v8471_v26, %v12502_v62 }
 0x3a9   : > { %v7047_v23 = vpop.f32.mrb[92].mxu0  ;;  %v7088_v4 = vpop.f32.mrb[92].mxu1 }
 0x3aa   : > { %11793 = vtanh.f32 %v7047_v23  ;;  %v7049_v28 = vpop.f32.mrb[93].mxu0  ;;  %v7090_v25 = vpop.f32.mrb[93].mxu1 }
 0x3ab   : > { %11795 = vtanh.f32 %v7088_v4  ;;  %v7051_v7 = vpop.f32.mrb[94].mxu0  ;;  %v7092_v29 = vpop.f32.mrb[94].mxu1 }
 0x3ac   : > { %11797 = vtanh.f32 %v7049_v28  ;;  %v7052_v30 = vpop.f32.mrb[95].mxu0  ;;  %v7093_v31 = vpop.f32.mrb[95].mxu1 }
 0x3ad   : > { %11799 = vtanh.f32 %v7090_v25 }
 0x3b4   : > { %v11794_v50 = vpop.eup %11793 }
 0x3b5   : > { %v11796_v27 = vpop.eup %11795 }
 0x3b6   : > { %v11798_v32 = vpop.eup %11797 }
 0x3b7   : > { %v11800_v33 = vpop.eup %11799  ;;  %v10209_v34 = vpack.c.bf16 %v11798_v32, %v11794_v50 }
 0x3b8   : > { %v10210_v36 = vpack.c.bf16 %v11800_v33, %v11796_v27 }
 0x3b9   : > { %v8463_v37 = vrot.slane %v10209_v34, %v12502_v62 }
 0x3ba   : > { %v8470_v38 = vrot.slane %v10210_v36, %v12502_v62 }
 0x3bc   : > { %v8472_v39 = vcombine.low %v8463_v37, %v8470_v38 }
 0x3be   : > { %v8486_v0 = vrot.slane %v8472_v39, %v12502_v62 }
 0x3c0   : > { %v8487_v41 = vcombine.low %v8479_v40, %v8486_v0 }
 0x3c2   : > { %8652 = vst [vmem:[%s12581_s4 + $0x58] sm:$0xff] %v8487_v41 }
 0x3c5   : > { %v7129_v42 = vpop.f32.mrb[96].mxu0  ;;  %v7170_v45 = vpop.f32.mrb[96].mxu1 }
 0x3c6   : > { %11801 = vtanh.f32 %v7129_v42  ;;  %v7131_v48 = vpop.f32.mrb[97].mxu0  ;;  %v7172_v43 = vpop.f32.mrb[97].mxu1 }
 0x3c7   : > { %11803 = vtanh.f32 %v7170_v45  ;;  %v7133_v44 = vpop.f32.mrb[98].mxu0  ;;  %v7174_v51 = vpop.f32.mrb[98].mxu1 }
 0x3c8   : > { %11805 = vtanh.f32 %v7131_v48  ;;  %v7134_v46 = vpop.f32.mrb[99].mxu0  ;;  %v7175_v47 = vpop.f32.mrb[99].mxu1 }
 0x3c9   : > { %11807 = vtanh.f32 %v7172_v43 }
 0x3d0   : > { %v11802_v52 = vpop.eup %11801 }
 0x3d1   : > { %v11804_v53 = vpop.eup %11803 }
 0x3d2   : > { %v11806_v54 = vpop.eup %11805 }
 0x3d3   : > { %v11808_v56 = vpop.eup %11807  ;;  %v10211_v57 = vpack.c.bf16 %v11806_v54, %v11802_v52 }
 0x3d4   : > { %v10212_v35 = vpack.c.bf16 %v11808_v56, %v11804_v53 }
 0x3d5   : > { %v8498_v49 = vrot.slane %v10211_v57, %v12502_v62 }
 0x3d6   : > { %v8505_v55 = vrot.slane %v10212_v35, %v12502_v62 }
 0x3d8   : > { %v8520_v58 = vcombine.low %v8498_v49, %v8505_v55 }
 0x3da   : > { %v8528_v16 = vrot.slane %v8520_v58, %v12502_v62 }
 0x3e1   : > { %v7211_v59 = vpop.f32.mrb[100].mxu0  ;;  %v7252_v60 = vpop.f32.mrb[100].mxu1 }
 0x3e2   : > { %11809 = vtanh.f32 %v7211_v59  ;;  %v7213_v9 = vpop.f32.mrb[101].mxu0  ;;  %v7254_v10 = vpop.f32.mrb[101].mxu1 }
 0x3e3   : > { %11811 = vtanh.f32 %v7252_v60  ;;  %v7215_v61 = vpop.f32.mrb[102].mxu0  ;;  %v7256_v63 = vpop.f32.mrb[102].mxu1 }
 0x3e4   : > { %11813 = vtanh.f32 %v7213_v9  ;;  %v7216_v2 = vpop.f32.mrb[103].mxu0  ;;  %v7257_v3 = vpop.f32.mrb[103].mxu1 }
 0x3e5   : > { %11815 = vtanh.f32 %v7254_v10 }
 0x3ec   : > { %v11810_v5 = vpop.eup %11809 }
 0x3ed   : > { %v11812_v6 = vpop.eup %11811 }
 0x3ee   : > { %v11814_v11 = vpop.eup %11813 }
 0x3ef   : > { %v11816_v13 = vpop.eup %11815  ;;  %v10213_v15 = vpack.c.bf16 %v11814_v11, %v11810_v5 }
 0x3f0   : > { %v10214_v1 = vpack.c.bf16 %v11816_v13, %v11812_v6 }
 0x3f1   : > { %v8512_v12 = vrot.slane %v10213_v15, %v12502_v62 }
 0x3f2   : > { %v8519_v8 = vrot.slane %v10214_v1, %v12502_v62 }
 0x3f4   : > { %v8521_v14 = vcombine.low %v8512_v12, %v8519_v8 }
 0x3f6   : > { %v8535_v17 = vrot.slane %v8521_v14, %v12502_v62 }
 0x3f8   : > { %v8536_v18 = vcombine.low %v8528_v16, %v8535_v17 }
 0x3fa   : > { %8653 = vst [vmem:[%s12581_s4 + $0x60] sm:$0xff] %v8536_v18 }
 0x3fd   : > { %v7293_v19 = vpop.f32.mrb[104].mxu0  ;;  %v7334_v20 = vpop.f32.mrb[104].mxu1 }
 0x3fe   : > { %11817 = vtanh.f32 %v7293_v19  ;;  %v7295_v21 = vpop.f32.mrb[105].mxu0  ;;  %v7336_v22 = vpop.f32.mrb[105].mxu1 }
 0x3ff   : > { %11819 = vtanh.f32 %v7334_v20  ;;  %v7297_v24 = vpop.f32.mrb[106].mxu0  ;;  %v7338_v26 = vpop.f32.mrb[106].mxu1 }
 0x400   : > { %11821 = vtanh.f32 %v7295_v21  ;;  %v7298_v23 = vpop.f32.mrb[107].mxu0  ;;  %v7339_v4 = vpop.f32.mrb[107].mxu1 }
 0x401   : > { %11823 = vtanh.f32 %v7336_v22 }
 0x408   : > { %v11818_v28 = vpop.eup %11817 }
 0x409   : > { %v11820_v25 = vpop.eup %11819 }
 0x40a   : > { %v11822_v7 = vpop.eup %11821 }
 0x40b   : > { %v11824_v29 = vpop.eup %11823  ;;  %v10215_v30 = vpack.c.bf16 %v11822_v7, %v11818_v28 }
 0x40c   : > { %v10216_v31 = vpack.c.bf16 %v11824_v29, %v11820_v25 }
 0x40d   : > { %v8547_v50 = vrot.slane %v10215_v30, %v12502_v62 }
 0x40e   : > { %v8554_v27 = vrot.slane %v10216_v31, %v12502_v62 }
 0x410   : > { %v8569_v32 = vcombine.low %v8547_v50, %v8554_v27 }
 0x412   : > { %v8577_v52 = vrot.slane %v8569_v32, %v12502_v62 }
 0x419   : > { %v7375_v33 = vpop.f32.mrb[108].mxu0  ;;  %v7416_v34 = vpop.f32.mrb[108].mxu1 }
 0x41a   : > { %11825 = vtanh.f32 %v7375_v33  ;;  %v7377_v36 = vpop.f32.mrb[109].mxu0  ;;  %v7418_v37 = vpop.f32.mrb[109].mxu1 }
 0x41b   : > { %11827 = vtanh.f32 %v7416_v34  ;;  %v7379_v38 = vpop.f32.mrb[110].mxu0  ;;  %v7420_v39 = vpop.f32.mrb[110].mxu1 }
 0x41c   : > { %11829 = vtanh.f32 %v7377_v36  ;;  %v7380_v40 = vpop.f32.mrb[111].mxu0  ;;  %v7421_v0 = vpop.f32.mrb[111].mxu1 }
 0x41d   : > { %11831 = vtanh.f32 %v7418_v37 }
 0x424   : > { %v11826_v41 = vpop.eup %11825 }
 0x425   : > { %v11828_v42 = vpop.eup %11827 }
 0x426   : > { %v11830_v45 = vpop.eup %11829 }
 0x427   : > { %v11832_v48 = vpop.eup %11831  ;;  %v10217_v43 = vpack.c.bf16 %v11830_v45, %v11826_v41 }
 0x428   : > { %v10218_v44 = vpack.c.bf16 %v11832_v48, %v11828_v42 }
 0x429   : > { %v8561_v51 = vrot.slane %v10217_v43, %v12502_v62 }
 0x42a   : > { %v8568_v46 = vrot.slane %v10218_v44, %v12502_v62 }
 0x42c   : > { %v8570_v47 = vcombine.low %v8561_v51, %v8568_v46 }
 0x42e   : > { %v8584_v53 = vrot.slane %v8570_v47, %v12502_v62 }
 0x430   : > { %v8585_v54 = vcombine.low %v8577_v52, %v8584_v53 }
 0x432   : > { %8654 = vst [vmem:[%s12581_s4 + $0x68] sm:$0xff] %v8585_v54 }
 0x435   : > { %v7457_v56 = vpop.f32.mrb[112].mxu0  ;;  %v7498_v57 = vpop.f32.mrb[112].mxu1 }
 0x436   : > { %11833 = vtanh.f32 %v7457_v56  ;;  %v7459_v35 = vpop.f32.mrb[113].mxu0  ;;  %v7500_v49 = vpop.f32.mrb[113].mxu1 }
 0x437   : > { %11835 = vtanh.f32 %v7498_v57  ;;  %v7461_v55 = vpop.f32.mrb[114].mxu0  ;;  %v7502_v58 = vpop.f32.mrb[114].mxu1 }
 0x438   : > { %11837 = vtanh.f32 %v7459_v35  ;;  %v7462_v59 = vpop.f32.mrb[115].mxu0  ;;  %v7503_v60 = vpop.f32.mrb[115].mxu1 }
 0x439   : > { %11839 = vtanh.f32 %v7500_v49 }
 0x440   : > { %v11834_v9 = vpop.eup %11833 }
 0x441   : > { %v11836_v10 = vpop.eup %11835 }
 0x442   : > { %v11838_v61 = vpop.eup %11837 }
 0x443   : > { %v11840_v63 = vpop.eup %11839  ;;  %v10219_v2 = vpack.c.bf16 %v11838_v61, %v11834_v9 }
 0x444   : > { %v10220_v3 = vpack.c.bf16 %v11840_v63, %v11836_v10 }
 0x445   : > { %v8595_v5 = vrot.slane %v10219_v2, %v12502_v62 }
 0x446   : > { %v8602_v6 = vrot.slane %v10220_v3, %v12502_v62 }
 0x448   : > { %v8610_v11 = vcombine.low %v8595_v5, %v8602_v6 }
 0x44a   : > { %v8617_v18 = vrot.slane %v8610_v11, %v12502_v62 }
 0x451   : > { %v7539_v13 = vpop.f32.mrb[116].mxu0 }
 0x452   : > { %11841 = vtanh.f32 %v7539_v13  ;;  %v7541_v15 = vpop.f32.mrb[117].mxu0 }
 0x453   : > { %11843 = vtanh.f32 %v7541_v15  ;;  %v7543_v1 = vpop.f32.mrb[118].mxu0 }
 0x454   : > { %v7544_v12 = vpop.f32.mrb[119].mxu0 }
 0x45c   : > { %v11842_v8 = vpop.eup %11841 }
 0x45d   : > { %v11844_v14 = vpop.eup %11843 }
 0x45e   : > { %v10221_v16 = vpack.c.bf16 %v11844_v14, %v11842_v8 }
 0x460   : > { %v8609_v17 = vrot.slane %v10221_v16, %v12502_v62  ;;  %8662 = sbr.rel (!%p13888_p7) target bundleno = 1292 (0x50c), region = 36 }
 0x462   : > { %v8624_v19 = vrot.slane %v8609_v17, %v12502_v62 }
 0x464   : > { %v8625_v20 = vcombine.low %v8617_v18, %v8624_v19 }
 0x466   : > { %8655 = vst [vmem:[%s12581_s4 + $0x70] sm:$0x3f] %v8625_v20 }
 0x467   : > { %s13904_s20 = smov (!%p8665_p9, %s8664_s20), 118 }
 0x468   : > { %s10222_s25 = sshll.u32 %s13904_s20, 4 }
 0x469   : > { %p10224_p10 = scmp.eq.s32.totalorder %s10222_s25, 0 }
 0x46a   : > { %p8673_p5 = scmp.lt.u32.totalorder (!%p10224_p10), %s13904_s20, 8 }
 0x46b   : > { %8672 = sbr.rel (%p10224_p10) target bundleno = 1292 (0x50c), region = 40 }
 0x472   : > { %8676 = sbr.rel (%p8673_p5) target bundleno = 1283 (0x503), region = 44  ;;  %s13470_s19 = sand.u32 (!%p8673_p5), 7, %s13904_s20  }
 0x473   : > { %p8692_p6 = scmp.eq.s32.totalorder (!%p8673_p5), %s13470_s19, 0  ;;  %p10225_p8 = scmp.ne.s32.totalorder (!%p8673_p5), %s13470_s19, 0 }
 0x479   : > { %8695 = sbr.rel (%p10225_p8) target bundleno = 1212 (0x4bc), region = 59  ;;  %s8696_s13 = sshrl.u32 (!%p10225_p8), %s13904_s20, 3 }
 0x47a   : > { %s13477_s27 = sshrl.u32 (!%p10225_p8), %s8696_s13, 6 }
 0x47b   : > { %p10226_p11 = scmp.le.s32.totalorder (!%p10225_p8), %s13477_s27, 0 }
 0x480   : > { %9139 = sbr.rel (%p10226_p11) target bundleno = 1192 (0x4a8), region = 146  ;;  %s13889_s30 = smov (!%p10226_p11), %s13463_s24 }
 0x481   : > { %s13890_s12 = smov (!%p10226_p11), %s12581_s4  ;;  %s13486_s18 = smov (!%p10226_p11), 0  }
 0x482   : > { %s13488_s23 = smov (!%p10226_p11), 0  }
 0x487 LB: >> { %v8709_v62 = vld [vmem:[%s11986_s12] sm:$0xff]  ;;  %v8711_v21 = vld [vmem:[%s11986_s12 + $0x8] sm:$0xff]  ;;  %v8713_v22 = vld [vmem:[%s11986_s12 + $0x10] sm:$0xff]  ;;  %s8837_s26 = sadd.s32 1, %s11990_s18  ;;  %s8703_s23 = sadd.s32 1, %s11994_s23   ;;  %s11994_s23 = sphi %s13488_s23, %s8703_s23   ;;  %s11990_s18 = sphi %s13486_s18, %s13893_s18   ;;  %s11986_s12 = sphi %s13890_s12, %s13892_s12   ;;  %s11982_s30 = sphi %s13889_s30, %s13891_s30  }
 0x488   : >> { %8710 = vst [vmem:[%s11982_s30] sm:$0xff] %v8709_v62  ;;  %8712 = vst [vmem:[%s11982_s30 + $0x8] sm:$0xff] %v8711_v21  ;;  %v8715_v24 = vld [vmem:[%s11986_s12 + $0x18] sm:$0xff]  ;;  %v8717_v26 = vld [vmem:[%s11986_s12 + $0x20] sm:$0xff]  ;;  %p8838_p13 = scmp.ge.s32.totalorder %s8837_s26, %s13477_s27  ;;  %p8702_p1 = scmp.ge.s32.totalorder %s8703_s23, %s13477_s27 }
 0x489   : >> { %8714 = vst [vmem:[%s11982_s30 + $0x10] sm:$0xff] %v8713_v22  ;;  %v8719_v23 = vld [vmem:[%s11986_s12 + $0x28] sm:$0xff]  ;;  %8716 = vst [vmem:[%s11982_s30 + $0x18] sm:$0xff] %v8715_v24  ;;  %v8721_v4 = vld [vmem:[%s11986_s12 + $0x30] sm:$0xff] }
 0x48a   : >> { %8718 = vst [vmem:[%s11982_s30 + $0x20] sm:$0xff] %v8717_v26  ;;  %8720 = vst [vmem:[%s11982_s30 + $0x28] sm:$0xff] %v8719_v23  ;;  %v8723_v28 = vld [vmem:[%s11986_s12 + $0x38] sm:$0xff]  ;;  %v8725_v25 = vld [vmem:[%s11986_s12 + $0x40] sm:$0xff]  ;;  %s13906_s26 = smov (%p8838_p13, %s8837_s26), 0 }
 0x48b   : >> { %8722 = vst [vmem:[%s11982_s30 + $0x30] sm:$0xff] %v8721_v4  ;;  %8724 = vst [vmem:[%s11982_s30 + $0x38] sm:$0xff] %v8723_v28  ;;  %v8727_v7 = vld [vmem:[%s11986_s12 + $0x48] sm:$0xff]  ;;  %v8729_v29 = vld [vmem:[%s11986_s12 + $0x50] sm:$0xff]  ;;  %s10227_s28 = sshll.u32 %s13906_s26, 9  ;;  %s13893_s18 = smov %s13906_s26 }
 0x48c   : >> { %8726 = vst [vmem:[%s11982_s30 + $0x40] sm:$0xff] %v8725_v25  ;;  %v8731_v30 = vld [vmem:[%s11986_s12 + $0x58] sm:$0xff]  ;;  %8728 = vst [vmem:[%s11982_s30 + $0x48] sm:$0xff] %v8727_v7  ;;  %v8733_v31 = vld [vmem:[%s11986_s12 + $0x60] sm:$0xff]  ;;  %s13544_s29 = scalar_lea.vmem %s12581_s4, %s10227_s28 [#allocation4]   ;;  %s13547_s3 = scalar_lea.vmem %s13463_s24, %s10227_s28  }
 0x48d   : >> { %8730 = vst [vmem:[%s11982_s30 + $0x50] sm:$0xff] %v8729_v29  ;;  %8732 = vst [vmem:[%s11982_s30 + $0x58] sm:$0xff] %v8731_v30  ;;  %v8735_v50 = vld [vmem:[%s11986_s12 + $0x68] sm:$0xff]  ;;  %v8737_v27 = vld [vmem:[%s11986_s12 + $0x70] sm:$0xff] }
 0x48e   : >> { %8734 = vst [vmem:[%s11982_s30 + $0x60] sm:$0xff] %v8733_v31  ;;  %8736 = vst [vmem:[%s11982_s30 + $0x68] sm:$0xff] %v8735_v50  ;;  %v8739_v32 = vld [vmem:[%s11986_s12 + $0x78] sm:$0xff]  ;;  %v8741_v33 = vld [vmem:[%s11986_s12 + $0x80] sm:$0xff] }
 0x48f   : >> { %8738 = vst [vmem:[%s11982_s30 + $0x70] sm:$0xff] %v8737_v27  ;;  %v8743_v34 = vld [vmem:[%s11986_s12 + $0x88] sm:$0xff]  ;;  %8740 = vst [vmem:[%s11982_s30 + $0x78] sm:$0xff] %v8739_v32  ;;  %v8745_v36 = vld [vmem:[%s11986_s12 + $0x90] sm:$0xff] }
 0x490   : >> { %8742 = vst [vmem:[%s11982_s30 + $0x80] sm:$0xff] %v8741_v33  ;;  %8744 = vst [vmem:[%s11982_s30 + $0x88] sm:$0xff] %v8743_v34  ;;  %v8747_v37 = vld [vmem:[%s11986_s12 + $0x98] sm:$0xff]  ;;  %v8749_v38 = vld [vmem:[%s11986_s12 + $0xa0] sm:$0xff] }
 0x491   : >> { %8746 = vst [vmem:[%s11982_s30 + $0x90] sm:$0xff] %v8745_v36  ;;  %8748 = vst [vmem:[%s11982_s30 + $0x98] sm:$0xff] %v8747_v37  ;;  %v8751_v39 = vld [vmem:[%s11986_s12 + $0xa8] sm:$0xff]  ;;  %v8753_v40 = vld [vmem:[%s11986_s12 + $0xb0] sm:$0xff] }
 0x492   : >> { %8750 = vst [vmem:[%s11982_s30 + $0xa0] sm:$0xff] %v8749_v38  ;;  %v8755_v0 = vld [vmem:[%s11986_s12 + $0xb8] sm:$0xff]  ;;  %8752 = vst [vmem:[%s11982_s30 + $0xa8] sm:$0xff] %v8751_v39  ;;  %v8757_v41 = vld [vmem:[%s11986_s12 + $0xc0] sm:$0xff] }
 0x493   : >> { %8754 = vst [vmem:[%s11982_s30 + $0xb0] sm:$0xff] %v8753_v40  ;;  %8756 = vst [vmem:[%s11982_s30 + $0xb8] sm:$0xff] %v8755_v0  ;;  %v8759_v42 = vld [vmem:[%s11986_s12 + $0xc8] sm:$0xff]  ;;  %v8761_v45 = vld [vmem:[%s11986_s12 + $0xd0] sm:$0xff] }
 0x494   : >> { %8758 = vst [vmem:[%s11982_s30 + $0xc0] sm:$0xff] %v8757_v41  ;;  %8760 = vst [vmem:[%s11982_s30 + $0xc8] sm:$0xff] %v8759_v42  ;;  %v8763_v48 = vld [vmem:[%s11986_s12 + $0xd8] sm:$0xff]  ;;  %v8765_v43 = vld [vmem:[%s11986_s12 + $0xe0] sm:$0xff] }
 0x495   : >> { %8762 = vst [vmem:[%s11982_s30 + $0xd0] sm:$0xff] %v8761_v45  ;;  %v8767_v44 = vld [vmem:[%s11986_s12 + $0xe8] sm:$0xff]  ;;  %8764 = vst [vmem:[%s11982_s30 + $0xd8] sm:$0xff] %v8763_v48  ;;  %v8769_v51 = vld [vmem:[%s11986_s12 + $0xf0] sm:$0xff] }
 0x496   : >> { %8766 = vst [vmem:[%s11982_s30 + $0xe0] sm:$0xff] %v8765_v43  ;;  %8768 = vst [vmem:[%s11982_s30 + $0xe8] sm:$0xff] %v8767_v44  ;;  %v8771_v46 = vld [vmem:[%s11986_s12 + $0xf8] sm:$0xff]  ;;  %v8773_v47 = vld [vmem:[%s11986_s12 + $0x100] sm:$0xff] }
 0x497   : >> { %8770 = vst [vmem:[%s11982_s30 + $0xf0] sm:$0xff] %v8769_v51  ;;  %8772 = vst [vmem:[%s11982_s30 + $0xf8] sm:$0xff] %v8771_v46  ;;  %v8775_v52 = vld [vmem:[%s11986_s12 + $0x108] sm:$0xff]  ;;  %v8777_v53 = vld [vmem:[%s11986_s12 + $0x110] sm:$0xff] }
 0x498   : >> { %8774 = vst [vmem:[%s11982_s30 + $0x100] sm:$0xff] %v8773_v47  ;;  %v8779_v54 = vld [vmem:[%s11986_s12 + $0x118] sm:$0xff]  ;;  %8776 = vst [vmem:[%s11982_s30 + $0x108] sm:$0xff] %v8775_v52  ;;  %v8781_v56 = vld [vmem:[%s11986_s12 + $0x120] sm:$0xff] }
 0x499   : >> { %8778 = vst [vmem:[%s11982_s30 + $0x110] sm:$0xff] %v8777_v53  ;;  %8780 = vst [vmem:[%s11982_s30 + $0x118] sm:$0xff] %v8779_v54  ;;  %v8783_v57 = vld [vmem:[%s11986_s12 + $0x128] sm:$0xff]  ;;  %v8785_v35 = vld [vmem:[%s11986_s12 + $0x130] sm:$0xff] }
 0x49a   : >> { %8782 = vst [vmem:[%s11982_s30 + $0x120] sm:$0xff] %v8781_v56  ;;  %8784 = vst [vmem:[%s11982_s30 + $0x128] sm:$0xff] %v8783_v57  ;;  %v8787_v49 = vld [vmem:[%s11986_s12 + $0x138] sm:$0xff]  ;;  %v8789_v55 = vld [vmem:[%s11986_s12 + $0x140] sm:$0xff] }
 0x49b   : >> { %8786 = vst [vmem:[%s11982_s30 + $0x130] sm:$0xff] %v8785_v35  ;;  %v8791_v58 = vld [vmem:[%s11986_s12 + $0x148] sm:$0xff]  ;;  %8788 = vst [vmem:[%s11982_s30 + $0x138] sm:$0xff] %v8787_v49  ;;  %v8793_v59 = vld [vmem:[%s11986_s12 + $0x150] sm:$0xff] }
 0x49c   : >> { %8790 = vst [vmem:[%s11982_s30 + $0x140] sm:$0xff] %v8789_v55  ;;  %8792 = vst [vmem:[%s11982_s30 + $0x148] sm:$0xff] %v8791_v58  ;;  %v8795_v60 = vld [vmem:[%s11986_s12 + $0x158] sm:$0xff]  ;;  %v8797_v9 = vld [vmem:[%s11986_s12 + $0x160] sm:$0xff] }
 0x49d   : >> { %8794 = vst [vmem:[%s11982_s30 + $0x150] sm:$0xff] %v8793_v59  ;;  %8796 = vst [vmem:[%s11982_s30 + $0x158] sm:$0xff] %v8795_v60  ;;  %v8799_v10 = vld [vmem:[%s11986_s12 + $0x168] sm:$0xff]  ;;  %v8801_v61 = vld [vmem:[%s11986_s12 + $0x170] sm:$0xff] }
 0x49e   : >> { %8798 = vst [vmem:[%s11982_s30 + $0x160] sm:$0xff] %v8797_v9  ;;  %v8803_v63 = vld [vmem:[%s11986_s12 + $0x178] sm:$0xff]  ;;  %8800 = vst [vmem:[%s11982_s30 + $0x168] sm:$0xff] %v8799_v10  ;;  %v8805_v2 = vld [vmem:[%s11986_s12 + $0x180] sm:$0xff] }
 0x49f   : >> { %8802 = vst [vmem:[%s11982_s30 + $0x170] sm:$0xff] %v8801_v61  ;;  %8804 = vst [vmem:[%s11982_s30 + $0x178] sm:$0xff] %v8803_v63  ;;  %v8807_v3 = vld [vmem:[%s11986_s12 + $0x188] sm:$0xff]  ;;  %v8809_v5 = vld [vmem:[%s11986_s12 + $0x190] sm:$0xff] }
 0x4a0   : >> { %8806 = vst [vmem:[%s11982_s30 + $0x180] sm:$0xff] %v8805_v2  ;;  %8808 = vst [vmem:[%s11982_s30 + $0x188] sm:$0xff] %v8807_v3  ;;  %v8811_v6 = vld [vmem:[%s11986_s12 + $0x198] sm:$0xff]  ;;  %v8813_v11 = vld [vmem:[%s11986_s12 + $0x1a0] sm:$0xff] }
 0x4a1   : >> { %8810 = vst [vmem:[%s11982_s30 + $0x190] sm:$0xff] %v8809_v5  ;;  %v8815_v13 = vld [vmem:[%s11986_s12 + $0x1a8] sm:$0xff]  ;;  %8812 = vst [vmem:[%s11982_s30 + $0x198] sm:$0xff] %v8811_v6  ;;  %v8817_v15 = vld [vmem:[%s11986_s12 + $0x1b0] sm:$0xff]  ;;  %8705 = sbr.rel (!%p8702_p1) target bundleno = 1159 (0x487), region = 152 }
 0x4a2   : >> { %8814 = vst [vmem:[%s11982_s30 + $0x1a0] sm:$0xff] %v8813_v11  ;;  %8816 = vst [vmem:[%s11982_s30 + $0x1a8] sm:$0xff] %v8815_v13  ;;  %v8819_v1 = vld [vmem:[%s11986_s12 + $0x1b8] sm:$0xff]  ;;  %v8821_v12 = vld [vmem:[%s11986_s12 + $0x1c0] sm:$0xff] }
 0x4a3   : >> { %8818 = vst [vmem:[%s11982_s30 + $0x1b0] sm:$0xff] %v8817_v15  ;;  %8820 = vst [vmem:[%s11982_s30 + $0x1b8] sm:$0xff] %v8819_v1  ;;  %v8823_v8 = vld [vmem:[%s11986_s12 + $0x1c8] sm:$0xff]  ;;  %v8825_v14 = vld [vmem:[%s11986_s12 + $0x1d0] sm:$0xff] }
 0x4a4   : >> { %8822 = vst [vmem:[%s11982_s30 + $0x1c0] sm:$0xff] %v8821_v12  ;;  %v8827_v16 = vld [vmem:[%s11986_s12 + $0x1d8] sm:$0xff]  ;;  %8824 = vst [vmem:[%s11982_s30 + $0x1c8] sm:$0xff] %v8823_v8  ;;  %v8829_v17 = vld [vmem:[%s11986_s12 + $0x1e0] sm:$0xff] }
 0x4a5   : >> { %8826 = vst [vmem:[%s11982_s30 + $0x1d0] sm:$0xff] %v8825_v14  ;;  %8828 = vst [vmem:[%s11982_s30 + $0x1d8] sm:$0xff] %v8827_v16  ;;  %v8831_v18 = vld [vmem:[%s11986_s12 + $0x1e8] sm:$0xff]  ;;  %v8833_v19 = vld [vmem:[%s11986_s12 + $0x1f0] sm:$0xff] }
 0x4a6   : >> { %8830 = vst [vmem:[%s11982_s30 + $0x1e0] sm:$0xff] %v8829_v17  ;;  %8832 = vst [vmem:[%s11982_s30 + $0x1e8] sm:$0xff] %v8831_v18  ;;  %v8835_v20 = vld [vmem:[%s11986_s12 + $0x1f8] sm:$0xff]  ;;  %s13892_s12 = smov %s13544_s29 }
 0x4a7   : >> { %8834 = vst [vmem:[%s11982_s30 + $0x1f0] sm:$0xff] %v8833_v19  ;;  %8836 = vst [vmem:[%s11982_s30 + $0x1f8] sm:$0xff] %v8835_v20  ;;  %s13891_s30 = smov %s13547_s3 }
 0x4a8 PF: > { %s13653_s5 = sand.u32 63, %s8696_s13   ;;  %s10248_s6 = sshll.u32 %s13477_s27, 13 }
 0x4a9   : > { %s8848_s7 = sshra.s32 %s10248_s6, 4  ;;  %p10232_p2 = scmp.le.s32.totalorder %s13653_s5, 0 }
 0x4aa   : > { %s8849_s8 = scalar_lea.vmem %s12581_s4, %s8848_s7 [#allocation4]   ;;  %s8852_s9 = scalar_lea.vmem %s13463_s24, %s8848_s7  }
 0x4ab   : > { %9153 = sbr.rel (%p10232_p2) target bundleno = 1212 (0x4bc), region = 157  ;;  %s11996_s15 = smov (!%p10232_p2), %s8852_s9  }
 0x4ac   : > { %s12000_s16 = smov (!%p10232_p2), %s8849_s8   ;;  %s12004_s21 = smov (!%p10232_p2), 0  }
 0x4ad   : > { %s12008_s22 = smov (!%p10232_p2), 0  }
 0x4b2 LB: >> { %v8864_v62 = vld [vmem:[%s12002_s16] sm:$0xff]  ;;  %s8866_s25 = sadd.s32 1, %s12006_s21  ;;  %s8858_s22 = sadd.s32 1, %s12010_s22   ;;  %s12010_s22 = sphi %s12008_s22, %s8858_s22   ;;  %s12006_s21 = sphi %s12004_s21, %s12005_s21   ;;  %s12002_s16 = sphi %s12000_s16, %s8871_s16   ;;  %s11998_s15 = sphi %s11996_s15, %s8872_s15  }
 0x4b3   : >> { %8865 = vst [vmem:[%s11998_s15] sm:$0xff] %v8864_v62  ;;  %p8867_p3 = scmp.ge.s32.totalorder %s8866_s25, %s13653_s5  ;;  %p8857_p12 = scmp.ge.s32.totalorder %s8858_s22, %s13653_s5 }
 0x4b5   : >> { %s13908_s25 = smov (%p8867_p3, %s8866_s25), 0  ;;  %8860 = sbr.rel (!%p8857_p12) target bundleno = 1202 (0x4b2), region = 163 }
 0x4b6   : >> { %s10233_s13 = sshll.u32 %s13908_s25, 3  ;;  %s12005_s21 = smov %s13908_s25  }
 0x4b7   : >> { %s8871_s16 = scalar_lea.vmem %s8849_s8, %s10233_s13 [#allocation4]   ;;  %s8872_s15 = scalar_lea.vmem %s8852_s9, %s10233_s13  }
 0x4bc PF: > { %8875 = sbr.rel (%p8692_p6) target bundleno = 1283 (0x503), region = 77  ;;  %s13665_s27 = ssub.s32 (!%p8692_p6), %s13904_s20, %s13470_s19 }
 0x4bd   : > { %s8881_s30 = sshrl.u32 (!%p8692_p6), %s13904_s20, 3  ;;  %s8878_s12 = scalar_lea.vmem (!%p8692_p6), %s12581_s4, %s13665_s27 [#allocation4] }
 0x4be   : > { %s8880_s18 = scalar_lea.vmem (!%p8692_p6), %s13463_s24, %s13665_s27  ;;  %s13674_s23 = sshrl.u32 (!%p8692_p6), %s8881_s30, 6 }
 0x4bf   : > { %p10235_p0 = scmp.le.s32.totalorder (!%p8692_p6), %s13674_s23, 0 }
 0x4c3   : > { %9167 = sbr.rel (%p10235_p0) target bundleno = 1259 (0x4eb), region = 168  ;;  %s13894_s26 = smov (!%p10235_p0), %s13463_s24 }
 0x4c4   : > { %s13895_s28 = smov (!%p10235_p0), %s12581_s4  ;;  %s13683_s29 = smov (!%p10235_p0), 0  }
 0x4c5   : > { %s13685_s3 = smov (!%p10235_p0), 0  }
 0x4ca LB: >> { %v8894_v21 = vld [vmem:[%s12018_s28] sm:$0xff]  ;;  %v8896_v22 = vld [vmem:[%s12018_s28 + $0x8] sm:$0xff]  ;;  %v8898_v24 = vld [vmem:[%s12018_s28 + $0x10] sm:$0xff]  ;;  %s9022_s5 = sadd.s32 1, %s12022_s29  ;;  %s8888_s3 = sadd.s32 1, %s12026_s3   ;;  %s12026_s3 = sphi %s13685_s3, %s8888_s3   ;;  %s12022_s29 = sphi %s13683_s29, %s13898_s29   ;;  %s12018_s28 = sphi %s13895_s28, %s13897_s28   ;;  %s12014_s26 = sphi %s13894_s26, %s13896_s26  }
 0x4cb   : >> { %8895 = vst [vmem:[%s12014_s26] sm:$0xff] %v8894_v21  ;;  %8897 = vst [vmem:[%s12014_s26 + $0x8] sm:$0xff] %v8896_v22  ;;  %v8900_v26 = vld [vmem:[%s12018_s28 + $0x18] sm:$0xff]  ;;  %v8902_v23 = vld [vmem:[%s12018_s28 + $0x20] sm:$0xff]  ;;  %p9023_p4 = scmp.ge.s32.totalorder %s9022_s5, %s13674_s23  ;;  %p8887_p7 = scmp.ge.s32.totalorder %s8888_s3, %s13674_s23 }
 0x4cc   : >> { %8899 = vst [vmem:[%s12014_s26 + $0x10] sm:$0xff] %v8898_v24  ;;  %v8904_v4 = vld [vmem:[%s12018_s28 + $0x28] sm:$0xff]  ;;  %8901 = vst [vmem:[%s12014_s26 + $0x18] sm:$0xff] %v8900_v26  ;;  %v8906_v28 = vld [vmem:[%s12018_s28 + $0x30] sm:$0xff] }
 0x4cd   : >> { %8903 = vst [vmem:[%s12014_s26 + $0x20] sm:$0xff] %v8902_v23  ;;  %8905 = vst [vmem:[%s12014_s26 + $0x28] sm:$0xff] %v8904_v4  ;;  %v8908_v25 = vld [vmem:[%s12018_s28 + $0x38] sm:$0xff]  ;;  %v8910_v7 = vld [vmem:[%s12018_s28 + $0x40] sm:$0xff]  ;;  %s13910_s5 = smov (%p9023_p4, %s9022_s5), 0 }
 0x4ce   : >> { %8907 = vst [vmem:[%s12014_s26 + $0x30] sm:$0xff] %v8906_v28  ;;  %8909 = vst [vmem:[%s12014_s26 + $0x38] sm:$0xff] %v8908_v25  ;;  %v8912_v29 = vld [vmem:[%s12018_s28 + $0x48] sm:$0xff]  ;;  %v8914_v30 = vld [vmem:[%s12018_s28 + $0x50] sm:$0xff]  ;;  %s10236_s6 = sshll.u32 %s13910_s5, 9  ;;  %s13898_s29 = smov %s13910_s5 }
 0x4cf   : >> { %8911 = vst [vmem:[%s12014_s26 + $0x40] sm:$0xff] %v8910_v7  ;;  %v8916_v31 = vld [vmem:[%s12018_s28 + $0x58] sm:$0xff]  ;;  %8913 = vst [vmem:[%s12014_s26 + $0x48] sm:$0xff] %v8912_v29  ;;  %v8918_v50 = vld [vmem:[%s12018_s28 + $0x60] sm:$0xff]  ;;  %s13741_s7 = scalar_lea.vmem %s12581_s4, %s10236_s6 [#allocation4]   ;;  %s13744_s8 = scalar_lea.vmem %s13463_s24, %s10236_s6  }
 0x4d0   : >> { %8915 = vst [vmem:[%s12014_s26 + $0x50] sm:$0xff] %v8914_v30  ;;  %8917 = vst [vmem:[%s12014_s26 + $0x58] sm:$0xff] %v8916_v31  ;;  %v8920_v27 = vld [vmem:[%s12018_s28 + $0x68] sm:$0xff]  ;;  %v8922_v32 = vld [vmem:[%s12018_s28 + $0x70] sm:$0xff] }
 0x4d1   : >> { %8919 = vst [vmem:[%s12014_s26 + $0x60] sm:$0xff] %v8918_v50  ;;  %8921 = vst [vmem:[%s12014_s26 + $0x68] sm:$0xff] %v8920_v27  ;;  %v8924_v33 = vld [vmem:[%s12018_s28 + $0x78] sm:$0xff]  ;;  %v8926_v34 = vld [vmem:[%s12018_s28 + $0x80] sm:$0xff] }
 0x4d2   : >> { %8923 = vst [vmem:[%s12014_s26 + $0x70] sm:$0xff] %v8922_v32  ;;  %v8928_v36 = vld [vmem:[%s12018_s28 + $0x88] sm:$0xff]  ;;  %8925 = vst [vmem:[%s12014_s26 + $0x78] sm:$0xff] %v8924_v33  ;;  %v8930_v37 = vld [vmem:[%s12018_s28 + $0x90] sm:$0xff] }
 0x4d3   : >> { %8927 = vst [vmem:[%s12014_s26 + $0x80] sm:$0xff] %v8926_v34  ;;  %8929 = vst [vmem:[%s12014_s26 + $0x88] sm:$0xff] %v8928_v36  ;;  %v8932_v38 = vld [vmem:[%s12018_s28 + $0x98] sm:$0xff]  ;;  %v8934_v39 = vld [vmem:[%s12018_s28 + $0xa0] sm:$0xff] }
 0x4d4   : >> { %8931 = vst [vmem:[%s12014_s26 + $0x90] sm:$0xff] %v8930_v37  ;;  %8933 = vst [vmem:[%s12014_s26 + $0x98] sm:$0xff] %v8932_v38  ;;  %v8936_v40 = vld [vmem:[%s12018_s28 + $0xa8] sm:$0xff]  ;;  %v8938_v0 = vld [vmem:[%s12018_s28 + $0xb0] sm:$0xff] }
 0x4d5   : >> { %8935 = vst [vmem:[%s12014_s26 + $0xa0] sm:$0xff] %v8934_v39  ;;  %v8940_v41 = vld [vmem:[%s12018_s28 + $0xb8] sm:$0xff]  ;;  %8937 = vst [vmem:[%s12014_s26 + $0xa8] sm:$0xff] %v8936_v40  ;;  %v8942_v42 = vld [vmem:[%s12018_s28 + $0xc0] sm:$0xff] }
 0x4d6   : >> { %8939 = vst [vmem:[%s12014_s26 + $0xb0] sm:$0xff] %v8938_v0  ;;  %8941 = vst [vmem:[%s12014_s26 + $0xb8] sm:$0xff] %v8940_v41  ;;  %v8944_v45 = vld [vmem:[%s12018_s28 + $0xc8] sm:$0xff]  ;;  %v8946_v48 = vld [vmem:[%s12018_s28 + $0xd0] sm:$0xff] }
 0x4d7   : >> { %8943 = vst [vmem:[%s12014_s26 + $0xc0] sm:$0xff] %v8942_v42  ;;  %8945 = vst [vmem:[%s12014_s26 + $0xc8] sm:$0xff] %v8944_v45  ;;  %v8948_v43 = vld [vmem:[%s12018_s28 + $0xd8] sm:$0xff]  ;;  %v8950_v44 = vld [vmem:[%s12018_s28 + $0xe0] sm:$0xff] }
 0x4d8   : >> { %8947 = vst [vmem:[%s12014_s26 + $0xd0] sm:$0xff] %v8946_v48  ;;  %v8952_v51 = vld [vmem:[%s12018_s28 + $0xe8] sm:$0xff]  ;;  %8949 = vst [vmem:[%s12014_s26 + $0xd8] sm:$0xff] %v8948_v43  ;;  %v8954_v46 = vld [vmem:[%s12018_s28 + $0xf0] sm:$0xff] }
 0x4d9   : >> { %8951 = vst [vmem:[%s12014_s26 + $0xe0] sm:$0xff] %v8950_v44  ;;  %8953 = vst [vmem:[%s12014_s26 + $0xe8] sm:$0xff] %v8952_v51  ;;  %v8956_v47 = vld [vmem:[%s12018_s28 + $0xf8] sm:$0xff]  ;;  %v8958_v52 = vld [vmem:[%s12018_s28 + $0x100] sm:$0xff] }
 0x4da   : >> { %8955 = vst [vmem:[%s12014_s26 + $0xf0] sm:$0xff] %v8954_v46  ;;  %8957 = vst [vmem:[%s12014_s26 + $0xf8] sm:$0xff] %v8956_v47  ;;  %v8960_v53 = vld [vmem:[%s12018_s28 + $0x108] sm:$0xff]  ;;  %v8962_v54 = vld [vmem:[%s12018_s28 + $0x110] sm:$0xff] }
 0x4db   : >> { %8959 = vst [vmem:[%s12014_s26 + $0x100] sm:$0xff] %v8958_v52  ;;  %v8964_v56 = vld [vmem:[%s12018_s28 + $0x118] sm:$0xff]  ;;  %8961 = vst [vmem:[%s12014_s26 + $0x108] sm:$0xff] %v8960_v53  ;;  %v8966_v57 = vld [vmem:[%s12018_s28 + $0x120] sm:$0xff] }
 0x4dc   : >> { %8963 = vst [vmem:[%s12014_s26 + $0x110] sm:$0xff] %v8962_v54  ;;  %8965 = vst [vmem:[%s12014_s26 + $0x118] sm:$0xff] %v8964_v56  ;;  %v8968_v35 = vld [vmem:[%s12018_s28 + $0x128] sm:$0xff]  ;;  %v8970_v49 = vld [vmem:[%s12018_s28 + $0x130] sm:$0xff] }
 0x4dd   : >> { %8967 = vst [vmem:[%s12014_s26 + $0x120] sm:$0xff] %v8966_v57  ;;  %8969 = vst [vmem:[%s12014_s26 + $0x128] sm:$0xff] %v8968_v35  ;;  %v8972_v55 = vld [vmem:[%s12018_s28 + $0x138] sm:$0xff]  ;;  %v8974_v58 = vld [vmem:[%s12018_s28 + $0x140] sm:$0xff] }
 0x4de   : >> { %8971 = vst [vmem:[%s12014_s26 + $0x130] sm:$0xff] %v8970_v49  ;;  %v8976_v59 = vld [vmem:[%s12018_s28 + $0x148] sm:$0xff]  ;;  %8973 = vst [vmem:[%s12014_s26 + $0x138] sm:$0xff] %v8972_v55  ;;  %v8978_v60 = vld [vmem:[%s12018_s28 + $0x150] sm:$0xff] }
 0x4df   : >> { %8975 = vst [vmem:[%s12014_s26 + $0x140] sm:$0xff] %v8974_v58  ;;  %8977 = vst [vmem:[%s12014_s26 + $0x148] sm:$0xff] %v8976_v59  ;;  %v8980_v9 = vld [vmem:[%s12018_s28 + $0x158] sm:$0xff]  ;;  %v8982_v10 = vld [vmem:[%s12018_s28 + $0x160] sm:$0xff] }
 0x4e0   : >> { %8979 = vst [vmem:[%s12014_s26 + $0x150] sm:$0xff] %v8978_v60  ;;  %8981 = vst [vmem:[%s12014_s26 + $0x158] sm:$0xff] %v8980_v9  ;;  %v8984_v61 = vld [vmem:[%s12018_s28 + $0x168] sm:$0xff]  ;;  %v8986_v63 = vld [vmem:[%s12018_s28 + $0x170] sm:$0xff] }
 0x4e1   : >> { %8983 = vst [vmem:[%s12014_s26 + $0x160] sm:$0xff] %v8982_v10  ;;  %v8988_v2 = vld [vmem:[%s12018_s28 + $0x178] sm:$0xff]  ;;  %8985 = vst [vmem:[%s12014_s26 + $0x168] sm:$0xff] %v8984_v61  ;;  %v8990_v3 = vld [vmem:[%s12018_s28 + $0x180] sm:$0xff] }
 0x4e2   : >> { %8987 = vst [vmem:[%s12014_s26 + $0x170] sm:$0xff] %v8986_v63  ;;  %8989 = vst [vmem:[%s12014_s26 + $0x178] sm:$0xff] %v8988_v2  ;;  %v8992_v5 = vld [vmem:[%s12018_s28 + $0x188] sm:$0xff]  ;;  %v8994_v6 = vld [vmem:[%s12018_s28 + $0x190] sm:$0xff] }
 0x4e3   : >> { %8991 = vst [vmem:[%s12014_s26 + $0x180] sm:$0xff] %v8990_v3  ;;  %8993 = vst [vmem:[%s12014_s26 + $0x188] sm:$0xff] %v8992_v5  ;;  %v8996_v11 = vld [vmem:[%s12018_s28 + $0x198] sm:$0xff]  ;;  %v8998_v13 = vld [vmem:[%s12018_s28 + $0x1a0] sm:$0xff] }
 0x4e4   : >> { %8995 = vst [vmem:[%s12014_s26 + $0x190] sm:$0xff] %v8994_v6  ;;  %v9000_v15 = vld [vmem:[%s12018_s28 + $0x1a8] sm:$0xff]  ;;  %8997 = vst [vmem:[%s12014_s26 + $0x198] sm:$0xff] %v8996_v11  ;;  %v9002_v1 = vld [vmem:[%s12018_s28 + $0x1b0] sm:$0xff]  ;;  %8890 = sbr.rel (!%p8887_p7) target bundleno = 1226 (0x4ca), region = 174 }
 0x4e5   : >> { %8999 = vst [vmem:[%s12014_s26 + $0x1a0] sm:$0xff] %v8998_v13  ;;  %9001 = vst [vmem:[%s12014_s26 + $0x1a8] sm:$0xff] %v9000_v15  ;;  %v9004_v12 = vld [vmem:[%s12018_s28 + $0x1b8] sm:$0xff]  ;;  %v9006_v8 = vld [vmem:[%s12018_s28 + $0x1c0] sm:$0xff] }
 0x4e6   : >> { %9003 = vst [vmem:[%s12014_s26 + $0x1b0] sm:$0xff] %v9002_v1  ;;  %9005 = vst [vmem:[%s12014_s26 + $0x1b8] sm:$0xff] %v9004_v12  ;;  %v9008_v14 = vld [vmem:[%s12018_s28 + $0x1c8] sm:$0xff]  ;;  %v9010_v16 = vld [vmem:[%s12018_s28 + $0x1d0] sm:$0xff] }
 0x4e7   : >> { %9007 = vst [vmem:[%s12014_s26 + $0x1c0] sm:$0xff] %v9006_v8  ;;  %v9012_v17 = vld [vmem:[%s12018_s28 + $0x1d8] sm:$0xff]  ;;  %9009 = vst [vmem:[%s12014_s26 + $0x1c8] sm:$0xff] %v9008_v14  ;;  %v9014_v18 = vld [vmem:[%s12018_s28 + $0x1e0] sm:$0xff] }
 0x4e8   : >> { %9011 = vst [vmem:[%s12014_s26 + $0x1d0] sm:$0xff] %v9010_v16  ;;  %9013 = vst [vmem:[%s12014_s26 + $0x1d8] sm:$0xff] %v9012_v17  ;;  %v9016_v19 = vld [vmem:[%s12018_s28 + $0x1e8] sm:$0xff]  ;;  %v9018_v20 = vld [vmem:[%s12018_s28 + $0x1f0] sm:$0xff] }
 0x4e9   : >> { %9015 = vst [vmem:[%s12014_s26 + $0x1e0] sm:$0xff] %v9014_v18  ;;  %9017 = vst [vmem:[%s12014_s26 + $0x1e8] sm:$0xff] %v9016_v19  ;;  %v9020_v62 = vld [vmem:[%s12018_s28 + $0x1f8] sm:$0xff]  ;;  %s13897_s28 = smov %s13741_s7 }
 0x4ea   : >> { %9019 = vst [vmem:[%s12014_s26 + $0x1f0] sm:$0xff] %v9018_v20  ;;  %9021 = vst [vmem:[%s12014_s26 + $0x1f8] sm:$0xff] %v9020_v62  ;;  %s13896_s26 = smov %s13744_s8 }
 0x4eb PF: > { %s13850_s9 = sand.u32 63, %s8881_s30   ;;  %s10250_s15 = sshll.u32 %s13674_s23, 13 }
 0x4ec   : > { %s9033_s16 = sshra.s32 %s10250_s15, 4  ;;  %p10241_p9 = scmp.le.s32.totalorder %s13850_s9, 0 }
 0x4ed   : > { %s9034_s21 = scalar_lea.vmem %s12581_s4, %s9033_s16 [#allocation4]   ;;  %s9037_s22 = scalar_lea.vmem %s13463_s24, %s9033_s16  }
 0x4ee   : > { %9181 = sbr.rel (%p10241_p9) target bundleno = 1279 (0x4ff), region = 179  ;;  %s12028_s25 = smov (!%p10241_p9), %s9037_s22  }
 0x4ef   : > { %s12032_s13 = smov (!%p10241_p9), %s9034_s21   ;;  %s12036_s5 = smov (!%p10241_p9), 0  }
 0x4f0   : > { %s12040_s3 = smov (!%p10241_p9), 0  }
 0x4f5 LB: >> { %v9049_v21 = vld [vmem:[%s12034_s13] sm:$0xff]  ;;  %s9051_s30 = sadd.s32 1, %s12038_s5  ;;  %s9043_s3 = sadd.s32 1, %s12042_s3   ;;  %s12042_s3 = sphi %s12040_s3, %s9043_s3   ;;  %s12038_s5 = sphi %s12036_s5, %s12037_s5   ;;  %s12034_s13 = sphi %s12032_s13, %s9056_s13   ;;  %s12030_s25 = sphi %s12028_s25, %s9057_s25  }
 0x4f6   : >> { %9050 = vst [vmem:[%s12030_s25] sm:$0xff] %v9049_v21  ;;  %p9052_p10 = scmp.ge.s32.totalorder %s9051_s30, %s13850_s9  ;;  %p9042_p5 = scmp.ge.s32.totalorder %s9043_s3, %s13850_s9 }
 0x4f8   : >> { %s13912_s30 = smov (%p9052_p10, %s9051_s30), 0  ;;  %9045 = sbr.rel (!%p9042_p5) target bundleno = 1269 (0x4f5), region = 185 }
 0x4f9   : >> { %s10242_s23 = sshll.u32 %s13912_s30, 3  ;;  %s12037_s5 = smov %s13912_s30  }
 0x4fa   : >> { %s9056_s13 = scalar_lea.vmem %s9034_s21, %s10242_s23 [#allocation4]   ;;  %s9057_s25 = scalar_lea.vmem %s9037_s22, %s10242_s23  }
 0x4ff PF: > { %s12050_s26 = smov 0  }
 0x500   : > { %s9058_s28 = sshllo.u32 %s12050_s26, %s13470_s19 }
 0x501   : > { %v9067_v22 = vld [vmem:[%s8878_s12] sm:%s9058_s28] }
 0x502   : > { %9068 = vst [vmem:[%s8880_s18] sm:%s9058_s28] %v9067_v22 }
 0x503 PF: > { %p10244_p6 = scmp.ge.u32.totalorder %s13904_s20, 8 }
 0x504   : > { %s12051_s29 = smov (!%p10244_p6), 0  }
 0x505   : > { %8679 = sbr.rel (%p10244_p6) target bundleno = 1292 (0x50c), region = 48  ;;  %s8680_s6 = sshllo.u32 (!%p10244_p6), %s12051_s29, %s13904_s20 }
 0x506   : > { %v8689_v24 = vld [vmem:[%s12581_s4] sm:%s8680_s6] (!%p10244_p6) }
 0x507   : > { %8690 = vst [vmem:[%s13463_s24] sm:%s8680_s6] (!%p10244_p6), %v8689_v24 }
 0x50c PF: > { %p12_p8 = scmp.ge.s32.totalorder %s12089_s14, 4   ;;  %s13899_s9 = smov %s11970_s10 }
 0x50d   : > { %s13900_s10 = smov %s11974_s11  ;;  %s13901_s11 = smov %s12099_s17 }
 0x50e   : > { %s13902_s12 = smov %s12089_s14  ;;  %14 = sbr.rel (!%p12_p8) target bundleno = 3 (0x3), region = 196 }
 0x515   :  { %9082 = vsyncpa [#allocation3], 1 }
 0x516   :  { %9084 = vsyncpa [#allocation3 + $0x1], 1 }

</bundles_post_ra>
